<compile_context>
chip_gen: v7x
topology: tpu7x:2x2x1
jax: 0.10.0
libtpu: 0.0.40
codegen_flags: <defaults>
</compile_context>

<pallas_src>
import jax
import jax.numpy as jnp
from jax.experimental import pallas as pl
from jax.experimental.pallas import tpu as pltpu

# ----------------------------- toy config ------------------------------------
BATCH = 2
IN_CHANS = 3
IMG = 64                          # 4x4 grid of 16x16 patches
PATCH = 16
EMBED_DIM = 128                   # lane-aligned (multiple of 128)
NUM_HEADS = 4
HEAD_DIM = EMBED_DIM // NUM_HEADS
DEPTH = 4
MLP_HIDDEN = 4 * EMBED_DIM        # 512, lane-aligned
LN_EPS = 1e-6

GRID_PATCHES = (IMG // PATCH) ** 2
SEQ = 1 + GRID_PATCHES            # cls + patches
SEQ_PAD = ((SEQ + 7) // 8) * 8    # pad token axis to a multiple of 8 sublanes
PATCH_K = IN_CHANS * PATCH * PATCH  # 768, multiple of 128
NUM_VEC_ROWS = 16                 # packed per-layer vector slab rows
ATTN_SCALE = HEAD_DIM ** -0.5


# ----------------------------- kernel helpers --------------------------------
def _layernorm(x, w, b):
    mu = jnp.mean(x, axis=-1, keepdims=True)
    xc = x - mu
    var = jnp.mean(xc * xc, axis=-1, keepdims=True)
    return xc * jax.lax.rsqrt(var + LN_EPS) * w + b


# ----------------------------- kernels ----------------------------------------
def patch_embed_kernel(p_ref, w_ref, b_ref, o_ref):
    # conv(k=stride=16) as matmul: [TILE_M, K]bf16 @ [K, D]bf16 -> f32 + bias
    o_ref[...] = (
        jnp.dot(p_ref[...], w_ref[...], preferred_element_type=jnp.float32)
        + b_ref[...]
    )


def vit_blocks_kernel(tok_ref, qkvw_ref, projw_ref, fc1w_ref, fc2w_ref,
                      vec_ref, normwb_ref, out_ref, x_scr):
    """One grid step = one transformer block applied to the whole batch block.

    grid = (DEPTH,).  The activation [B*SEQ_PAD, D] stays resident in VMEM
    scratch across the depth axis; each layer's weights are a depth-indexed
    block that the Pallas pipeline prefetches under the previous layer's
    compute, and they are streamed from HBM exactly once (not once per
    sample).  The final LayerNorm + cls-token head runs on the last step.
    """
    d = pl.program_id(0)
    Bblk, T, D = tok_ref.shape            # static block shape
    M = Bblk * T

    @pl.when(d == 0)
    def _init():
        x_scr[...] = tok_ref[...].reshape(M, D)

    vec = vec_ref[0]                      # [16, D] packed per-layer vectors
    ln1_w, ln1_b = vec[0:1], vec[1:2]
    proj_b = vec[2:3]
    ln2_w, ln2_b = vec[3:4], vec[4:5]
    fc2_b = vec[5:6]
    q_b, k_b, v_b = vec[6:7], vec[7:8], vec[8:9]
    fc1_b = jnp.concatenate(
        [vec[9 + i:10 + i] for i in range(MLP_HIDDEN // EMBED_DIM)], axis=-1)

    x = x_scr[...]                        # [M, D] f32 residual stream

    # -------------------- attention branch (pre-norm) --------------------
    h = _layernorm(x, ln1_w, ln1_b).astype(jnp.bfloat16)
    qkv = jnp.dot(h, qkvw_ref[0], preferred_element_type=jnp.float32)  # [M,3D]
    q = qkv[:, 0:D] + q_b
    k = qkv[:, D:2 * D] + k_b
    v = qkv[:, 2 * D:3 * D] + v_b

    def heads_of(t, b):                   # [M, D] -> [H, T, head_dim], sample b
        rows = t[b * T:(b + 1) * T, :]
        return jnp.stack(
            [rows[:, hh * HEAD_DIM:(hh + 1) * HEAD_DIM]
             for hh in range(NUM_HEADS)], axis=0)

    kidx = jax.lax.broadcasted_iota(jnp.int32, (1, 1, T), 2)
    attn_rows = []
    # Batch is static & small (the whole batch lives in this block); the
    # score/AV contractions are inherently per-(sample, head) at head_dim
    # width, so a per-sample loop costs no MXU work vs. a 4D batched einsum.
    for b in range(Bblk):
        qh = (heads_of(q, b) * ATTN_SCALE).astype(jnp.bfloat16)
        kh = heads_of(k, b).astype(jnp.bfloat16)
        vh = heads_of(v, b).astype(jnp.bfloat16)
        # scores kept f32 (safe on v5e; bf16 is fine/cheaper on v6e/v7x)
        s = jnp.einsum('htd,hsd->hts', qh, kh,
                       preferred_element_type=jnp.float32)           # [H,T,T]
        s = jnp.where(kidx < SEQ, s, -1e30)      # mask padded key positions
        s = s - jnp.max(s, axis=-1, keepdims=True)
        e = jnp.exp(s)
        p = e * pl.reciprocal(jnp.sum(e, axis=-1, keepdims=True), approx=True)
        o_h = jnp.einsum('hts,hsd->htd', p.astype(jnp.bfloat16), vh,
                         preferred_element_type=jnp.float32)         # [H,T,hd]
        # merge heads back onto the lane axis -> [T, D]
        attn_rows.append(jnp.concatenate(
            [o_h[hh] for hh in range(NUM_HEADS)], axis=-1))
    o = jnp.concatenate(attn_rows, axis=0).astype(jnp.bfloat16)      # [M, D]
    # single K=D output projection: head reduction happens inside the MXU
    attn = jnp.dot(o, projw_ref[0], preferred_element_type=jnp.float32)
    x = x + attn + proj_b

    # -------------------- MLP branch (pre-norm, GELU) --------------------
    h2 = _layernorm(x, ln2_w, ln2_b).astype(jnp.bfloat16)
    h1 = jnp.dot(h2, fc1w_ref[0], preferred_element_type=jnp.float32) + fc1_b
    g = jax.nn.gelu(h1, approximate=True).astype(jnp.bfloat16)
    y = jnp.dot(g, fc2w_ref[0], preferred_element_type=jnp.float32) + fc2_b
    x = x + y

    x_scr[...] = x

    # ------------- final LayerNorm + cls-token head (num_classes=0) -------
    @pl.when(d == pl.num_programs(0) - 1)
    def _head():
        nw, nb = normwb_ref[0:1, :], normwb_ref[1:2, :]
        for b in range(Bblk):
            cls = x[b * T:b * T + 1, :]           # [1, D] class token
            out_ref[b] = _layernorm(cls, nw, nb)


# ----------------------------- parameters ------------------------------------
def init_params(key):
    ks = jax.random.split(key, 7)
    f32, bf16 = jnp.float32, jnp.bfloat16
    D = EMBED_DIM
    p = {
        # patch embed (conv as matmul), weights in bf16
        'patch_w': (0.02 * jax.random.normal(ks[0], (PATCH_K, D), f32)).astype(bf16),
        'patch_b': jnp.zeros((1, D), f32),
        'cls': 0.02 * jax.random.normal(ks[1], (1, 1, D), f32),
        'pos': 0.02 * jax.random.normal(ks[2], (1, SEQ, D), f32),
        # per-layer weights stacked along a leading depth axis (bf16)
        'qkv_w': (0.02 * jax.random.normal(ks[3], (DEPTH, D, 3 * D), f32)).astype(bf16),
        # output projection as a plain [D, D] (rows ordered head-major)
        'proj_w': (0.02 * jax.random.normal(ks[4], (DEPTH, D, D), f32)).astype(bf16),
        'fc1_w': (0.02 * jax.random.normal(ks[5], (DEPTH, D, MLP_HIDDEN), f32)).astype(bf16),
        'fc2_w': (0.02 * jax.random.normal(ks[6], (DEPTH, MLP_HIDDEN, D), f32)).astype(bf16),
        # final norm packed as [w; b]
        'norm_wb': jnp.stack([jnp.ones((D,), f32), jnp.zeros((D,), f32)], axis=0),
    }
    # packed per-layer small vectors (one DMA descriptor per layer):
    # rows 0..5: ln1_w, ln1_b, proj_b, ln2_w, ln2_b, fc2_b
    # rows 6..8: qkv bias (q_b, k_b, v_b)
    # rows 9..12: fc1 bias (4 x 128 lanes = MLP_HIDDEN), rows 13..15: pad
    vecs = jnp.zeros((DEPTH, NUM_VEC_ROWS, D), jnp.float32)
    vecs = vecs.at[:, 0].set(1.0)   # ln1 weight
    vecs = vecs.at[:, 3].set(1.0)   # ln2 weight
    p['vecs'] = vecs
    return p


# ----------------------------- forward wrapper --------------------------------
def kaiko_encoder_forward(params, x):
    """x: [B, C, H, W] NCHW -> [B, D] class-token embedding (timm num_classes=0)."""
    B, C, H, W = x.shape
    hp, wp = H // PATCH, W // PATCH
    n_patches = hp * wp

    # glue: im2col for the stride-16 conv patch embed (c, ph, pw order)
    patches = x.reshape(B, C, hp, PATCH, wp, PATCH)
    patches = patches.transpose(0, 2, 4, 1, 3, 5).reshape(
        B * n_patches, C * PATCH * PATCH).astype(jnp.bfloat16)

    rows = B * n_patches
    tile_m = rows if rows <= 256 else 256      # single block at this toy size
    assert rows % tile_m == 0
    tok = pl.pallas_call(
        patch_embed_kernel,
        out_shape=jax.ShapeDtypeStruct((rows, EMBED_DIM), jnp.float32),
        grid=(rows // tile_m,),
        in_specs=[pl.BlockSpec((tile_m, PATCH_K), lambda i: (i, 0)),
                  pl.BlockSpec((PATCH_K, EMBED_DIM), lambda i: (0, 0)),
                  pl.BlockSpec((1, EMBED_DIM), lambda i: (0, 0))],
        out_specs=pl.BlockSpec((tile_m, EMBED_DIM), lambda i: (i, 0)),
        compiler_params=pltpu.CompilerParams(
            dimension_semantics=("parallel",)),
    )(patches, params['patch_w'], params['patch_b'])
    tok = tok.reshape(B, n_patches, EMBED_DIM)

    # glue: prepend cls token, add positional embedding, pad token axis to 8k
    cls = jnp.broadcast_to(params['cls'], (B, 1, EMBED_DIM))
    seq = jnp.concatenate([cls, tok], axis=1) + params['pos']       # [B, SEQ, D]
    seq = jnp.pad(seq, ((0, 0), (0, SEQ_PAD - SEQ), (0, 0)))        # [B, SEQ_PAD, D]

    # all transformer blocks + final norm + cls head in ONE pallas_call.
    # grid = (DEPTH,): the whole batch lives in the activation block (weights
    # streamed once total, not once per sample); depth-indexed weight blocks
    # are prefetched by the auto-pipeline while the activation stays resident
    # in VMEM scratch.
    out = pl.pallas_call(
        vit_blocks_kernel,
        out_shape=jax.ShapeDtypeStruct((B, 1, EMBED_DIM), jnp.float32),
        grid=(DEPTH,),
        in_specs=[
            pl.BlockSpec((B, SEQ_PAD, EMBED_DIM), lambda d: (0, 0, 0)),
            pl.BlockSpec((1, EMBED_DIM, 3 * EMBED_DIM), lambda d: (d, 0, 0)),
            pl.BlockSpec((1, EMBED_DIM, EMBED_DIM), lambda d: (d, 0, 0)),
            pl.BlockSpec((1, EMBED_DIM, MLP_HIDDEN), lambda d: (d, 0, 0)),
            pl.BlockSpec((1, MLP_HIDDEN, EMBED_DIM), lambda d: (d, 0, 0)),
            pl.BlockSpec((1, NUM_VEC_ROWS, EMBED_DIM), lambda d: (d, 0, 0)),
            pl.BlockSpec((2, EMBED_DIM), lambda d: (0, 0)),
        ],
        out_specs=pl.BlockSpec((B, 1, EMBED_DIM), lambda d: (0, 0, 0)),
        scratch_shapes=[pltpu.VMEM((B * SEQ_PAD, EMBED_DIM), jnp.float32)],
        compiler_params=pltpu.CompilerParams(
            # depth carries the resident activation -> "arbitrary".
            # On v7x add a leading size-2 "parallel" axis (B/2 samples per
            # block) to feed both TensorCores; at real ViT-B/L sizes raise
            # vmem_limit_bytes on v5e/v6e and column-tile qkv/fc1/fc2 on v7x.
            dimension_semantics=("arbitrary",),
            vmem_limit_bytes=32 * 1024 * 1024),
    )(seq, params['qkv_w'], params['proj_w'], params['fc1_w'], params['fc2_w'],
      params['vecs'], params['norm_wb'])

    return out[:, 0, :]                                            # [B, D]


# ----------------------------- main -------------------------------------------
if __name__ == "__main__":
    key = jax.random.PRNGKey(0)
    pkey, xkey = jax.random.split(key)
    params = init_params(pkey)
    x = jax.random.normal(xkey, (BATCH, IN_CHANS, IMG, IMG), jnp.float32)

    fwd = jax.jit(kaiko_encoder_forward)
    out = jax.block_until_ready(fwd(params, x))

    assert out.shape == (BATCH, EMBED_DIM), out.shape
    assert bool(jnp.all(jnp.isfinite(out)))
    print("KERNEL_OK")
</pallas_src>

<mosaic_0001>
module attributes {stable_mosaic.version = 11 : i64} {
  func.func @patch_embed_kernel(%arg0: i32, %arg1: memref<32x768xbf16, #tpu.memory_space<vmem>>, %arg2: memref<768x128xbf16, #tpu.memory_space<vmem>>, %arg3: memref<1x128xf32, #tpu.memory_space<vmem>>, %arg4: memref<32x128xf32, #tpu.memory_space<vmem>>) attributes {dimension_semantics = [#tpu.dimension_semantics<parallel>], iteration_bounds = array<i64: 1>, scalar_prefetch = 0 : i64, scratch_operands = 0 : i64, tpu.core_type = #tpu.core_type<tc>, window_params = [{transform_indices = @transform_0, window_bounds = array<i64: 32, 768>}, {pipeline_mode = #tpu.pipeline_mode<synchronous>, transform_indices = @transform_1, window_bounds = array<i64: 768, 128>}, {pipeline_mode = #tpu.pipeline_mode<synchronous>, transform_indices = @transform_2, window_bounds = array<i64: 1, 128>}, {transform_indices = @transform_3, window_bounds = array<i64: 32, 128>}]} {
    %c0 = arith.constant 0 : index
    %c0_0 = arith.constant 0 : index
    %0 = vector.load %arg1[%c0, %c0_0] : memref<32x768xbf16, #tpu.memory_space<vmem>>, vector<32x768xbf16>
    %c0_1 = arith.constant 0 : index
    %c0_2 = arith.constant 0 : index
    %1 = vector.load %arg2[%c0_1, %c0_2] : memref<768x128xbf16, #tpu.memory_space<vmem>>, vector<768x128xbf16>
    %cst = arith.constant dense<0.000000e+00> : vector<32x128xf32>
    %2 = tpu.matmul %0, %1, %cst {dimension_numbers = #tpu.dot_dimension_numbers<[1], [0], [0], [1], [0, 0, 1, 1], [], []>} : vector<32x768xbf16>, vector<768x128xbf16>, vector<32x128xf32> -> vector<32x128xf32>
    %c0_3 = arith.constant 0 : index
    %c0_4 = arith.constant 0 : index
    %3 = vector.load %arg3[%c0_3, %c0_4] : memref<1x128xf32, #tpu.memory_space<vmem>>, vector<1x128xf32>
    %4 = vector.broadcast %3 : vector<1x128xf32> to vector<32x128xf32>
    %5 = arith.addf %2, %4 : vector<32x128xf32>
    %c0_5 = arith.constant 0 : index
    %c0_6 = arith.constant 0 : index
    %6 = vector.load %arg4[%c0_5, %c0_6] : memref<32x128xf32, #tpu.memory_space<vmem>>, vector<32x128xf32>
    tpu.vector_store %arg4[%c0_5, %c0_6], %5 {strides = array<i32>} : memref<32x128xf32, #tpu.memory_space<vmem>>, vector<32x128xf32>,
    return
  }
  func.func @transform_0(%arg0: i32) -> (i32, i32) {
    %c0_i32 = arith.constant 0 : i32
    %c0_i32_0 = arith.constant 0 : i32
    return %arg0, %c0_i32 : i32, i32
  }
  func.func @transform_1(%arg0: i32) -> (i32, i32) {
    %c0_i32 = arith.constant 0 : i32
    %c0_i32_0 = arith.constant 0 : i32
    %c0_i32_1 = arith.constant 0 : i32
    return %c0_i32, %c0_i32_0 : i32, i32
  }
  func.func @transform_2(%arg0: i32) -> (i32, i32) {
    %c0_i32 = arith.constant 0 : i32
    %c0_i32_0 = arith.constant 0 : i32
    %c0_i32_1 = arith.constant 0 : i32
    return %c0_i32, %c0_i32_0 : i32, i32
  }
  func.func @transform_3(%arg0: i32) -> (i32, i32) {
    %c0_i32 = arith.constant 0 : i32
    %c0_i32_0 = arith.constant 0 : i32
    return %arg0, %c0_i32 : i32, i32
  }
}

module attributes {stable_mosaic.version = 11 : i64} {
  func.func @vit_blocks_kernel(%arg0: i32, %arg1: memref<2x24x128xf32, #tpu.memory_space<vmem>>, %arg2: memref<1x128x384xbf16, #tpu.memory_space<vmem>>, %arg3: memref<1x128x128xbf16, #tpu.memory_space<vmem>>, %arg4: memref<1x128x512xbf16, #tpu.memory_space<vmem>>, %arg5: memref<1x512x128xbf16, #tpu.memory_space<vmem>>, %arg6: memref<1x16x128xf32, #tpu.memory_space<vmem>>, %arg7: memref<2x128xf32, #tpu.memory_space<vmem>>, %arg8: memref<2x1x128xf32, #tpu.memory_space<vmem>>, %arg9: memref<48x128xf32, #tpu.memory_space<vmem>>) attributes {dimension_semantics = [#tpu.dimension_semantics<arbitrary>], iteration_bounds = array<i64: 4>, scalar_prefetch = 0 : i64, scratch_operands = 1 : i64, tpu.core_type = #tpu.core_type<tc>, window_params = [{pipeline_mode = #tpu.pipeline_mode<synchronous>, transform_indices = @transform_0, window_bounds = array<i64: 2, 24, 128>}, {transform_indices = @transform_1, window_bounds = array<i64: 1, 128, 384>}, {transform_indices = @transform_2, window_bounds = array<i64: 1, 128, 128>}, {transform_indices = @transform_3, window_bounds = array<i64: 1, 128, 512>}, {transform_indices = @transform_4, window_bounds = array<i64: 1, 512, 128>}, {transform_indices = @transform_5, window_bounds = array<i64: 1, 16, 128>}, {pipeline_mode = #tpu.pipeline_mode<synchronous>, transform_indices = @transform_6, window_bounds = array<i64: 2, 128>}, {pipeline_mode = #tpu.pipeline_mode<synchronous>, transform_indices = @transform_7, window_bounds = array<i64: 2, 1, 128>}]} {
    %c0_i32 = arith.constant 0 : i32
    %0 = arith.cmpi eq, %arg0, %c0_i32 : i32
    %1 = arith.extui %0 : i1 to i32
    %c0_i32_0 = arith.constant 0 : i32
    %2 = arith.cmpi ne, %1, %c0_i32_0 : i32
    scf.if %2 {
      %c0_50 = arith.constant 0 : index
      %c0_51 = arith.constant 0 : index
      %c0_52 = arith.constant 0 : index
      %238 = vector.load %arg1[%c0_50, %c0_51, %c0_52] : memref<2x24x128xf32, #tpu.memory_space<vmem>>, vector<2x24x128xf32>
      %239 = vector.shape_cast %238 : vector<2x24x128xf32> to vector<48x128xf32>
      %c0_53 = arith.constant 0 : index
      %c0_54 = arith.constant 0 : index
      %240 = vector.load %arg9[%c0_53, %c0_54] : memref<48x128xf32, #tpu.memory_space<vmem>>, vector<48x128xf32>
      tpu.vector_store %arg9[%c0_53, %c0_54], %239 {strides = array<i32>} : memref<48x128xf32, #tpu.memory_space<vmem>>, vector<48x128xf32>,
    } else {
    }
    %c0 = arith.constant 0 : index
    %c0_1 = arith.constant 0 : index
    %c0_2 = arith.constant 0 : index
    %3 = vector.load %arg6[%c0, %c0_1, %c0_2] : memref<1x16x128xf32, #tpu.memory_space<vmem>>, vector<1x16x128xf32>
    %4 = vector.shape_cast %3 : vector<1x16x128xf32> to vector<16x128xf32>
    %5 = vector.extract_strided_slice %4 {offsets = [0, 0], sizes = [1, 128], strides = [1, 1]} : vector<16x128xf32> to vector<1x128xf32>
    %6 = vector.extract_strided_slice %4 {offsets = [1, 0], sizes = [1, 128], strides = [1, 1]} : vector<16x128xf32> to vector<1x128xf32>
    %7 = vector.extract_strided_slice %4 {offsets = [2, 0], sizes = [1, 128], strides = [1, 1]} : vector<16x128xf32> to vector<1x128xf32>
    %8 = vector.extract_strided_slice %4 {offsets = [3, 0], sizes = [1, 128], strides = [1, 1]} : vector<16x128xf32> to vector<1x128xf32>
    %9 = vector.extract_strided_slice %4 {offsets = [4, 0], sizes = [1, 128], strides = [1, 1]} : vector<16x128xf32> to vector<1x128xf32>
    %10 = vector.extract_strided_slice %4 {offsets = [5, 0], sizes = [1, 128], strides = [1, 1]} : vector<16x128xf32> to vector<1x128xf32>
    %11 = vector.extract_strided_slice %4 {offsets = [6, 0], sizes = [1, 128], strides = [1, 1]} : vector<16x128xf32> to vector<1x128xf32>
    %12 = vector.extract_strided_slice %4 {offsets = [7, 0], sizes = [1, 128], strides = [1, 1]} : vector<16x128xf32> to vector<1x128xf32>
    %13 = vector.extract_strided_slice %4 {offsets = [8, 0], sizes = [1, 128], strides = [1, 1]} : vector<16x128xf32> to vector<1x128xf32>
    %14 = vector.extract_strided_slice %4 {offsets = [9, 0], sizes = [1, 128], strides = [1, 1]} : vector<16x128xf32> to vector<1x128xf32>
    %15 = vector.extract_strided_slice %4 {offsets = [10, 0], sizes = [1, 128], strides = [1, 1]} : vector<16x128xf32> to vector<1x128xf32>
    %16 = vector.extract_strided_slice %4 {offsets = [11, 0], sizes = [1, 128], strides = [1, 1]} : vector<16x128xf32> to vector<1x128xf32>
    %17 = vector.extract_strided_slice %4 {offsets = [12, 0], sizes = [1, 128], strides = [1, 1]} : vector<16x128xf32> to vector<1x128xf32>
    %18 = tpu.concatenate %14, %15, %16, %17 in 1 : vector<1x128xf32>, vector<1x128xf32>, vector<1x128xf32>, vector<1x128xf32> -> vector<1x512xf32>
    %c0_3 = arith.constant 0 : index
    %c0_4 = arith.constant 0 : index
    %19 = vector.load %arg9[%c0_3, %c0_4] : memref<48x128xf32, #tpu.memory_space<vmem>>, vector<48x128xf32>
    %cst = arith.constant dense<0.000000e+00> : vector<48xf32>
    %20 = vector.multi_reduction <add>, %19, %cst [1] : vector<48x128xf32> to vector<48xf32>
    %21 = vector.shape_cast %20 : vector<48xf32> to vector<48x1xf32>
    %cst_5 = arith.constant 1.280000e+02 : f32
    %22 = vector.broadcast %cst_5 : f32 to vector<48x1xf32>
    %23 = arith.divf %21, %22 : vector<48x1xf32>
    %24 = vector.broadcast %23 : vector<48x1xf32> to vector<48x128xf32>
    %25 = arith.subf %19, %24 : vector<48x128xf32>
    %26 = arith.mulf %25, %25 : vector<48x128xf32>
    %cst_6 = arith.constant dense<0.000000e+00> : vector<48xf32>
    %27 = vector.multi_reduction <add>, %26, %cst_6 [1] : vector<48x128xf32> to vector<48xf32>
    %28 = vector.shape_cast %27 : vector<48xf32> to vector<48x1xf32>
    %cst_7 = arith.constant 1.280000e+02 : f32
    %29 = vector.broadcast %cst_7 : f32 to vector<48x1xf32>
    %30 = arith.divf %28, %29 : vector<48x1xf32>
    %cst_8 = arith.constant 9.99999997E-7 : f32
    %31 = vector.broadcast %cst_8 : f32 to vector<48x1xf32>
    %32 = arith.addf %30, %31 : vector<48x1xf32>
    %33 = math.rsqrt %32 : vector<48x1xf32>
    %34 = vector.broadcast %33 : vector<48x1xf32> to vector<48x128xf32>
    %35 = arith.mulf %25, %34 : vector<48x128xf32>
    %36 = vector.broadcast %5 : vector<1x128xf32> to vector<48x128xf32>
    %37 = arith.mulf %35, %36 : vector<48x128xf32>
    %38 = vector.broadcast %6 : vector<1x128xf32> to vector<48x128xf32>
    %39 = arith.addf %37, %38 : vector<48x128xf32>
    %40 = arith.truncf %39 : vector<48x128xf32> to vector<48x128xbf16>
    %c0_9 = arith.constant 0 : index
    %c0_10 = arith.constant 0 : index
    %c0_11 = arith.constant 0 : index
    %41 = vector.load %arg2[%c0_9, %c0_10, %c0_11] : memref<1x128x384xbf16, #tpu.memory_space<vmem>>, vector<1x128x384xbf16>
    %42 = vector.shape_cast %41 : vector<1x128x384xbf16> to vector<128x384xbf16>
    %cst_12 = arith.constant dense<0.000000e+00> : vector<48x384xf32>
    %43 = tpu.matmul %40, %42, %cst_12 {dimension_numbers = #tpu.dot_dimension_numbers<[1], [0], [0], [1], [0, 0, 1, 1], [], []>} : vector<48x128xbf16>, vector<128x384xbf16>, vector<48x384xf32> -> vector<48x384xf32>
    %44 = vector.extract_strided_slice %43 {offsets = [0, 0], sizes = [48, 128], strides = [1, 1]} : vector<48x384xf32> to vector<48x128xf32>
    %45 = vector.broadcast %11 : vector<1x128xf32> to vector<48x128xf32>
    %46 = arith.addf %44, %45 : vector<48x128xf32>
    %47 = vector.extract_strided_slice %43 {offsets = [0, 128], sizes = [48, 128], strides = [1, 1]} : vector<48x384xf32> to vector<48x128xf32>
    %48 = vector.broadcast %12 : vector<1x128xf32> to vector<48x128xf32>
    %49 = arith.addf %47, %48 : vector<48x128xf32>
    %50 = vector.extract_strided_slice %43 {offsets = [0, 256], sizes = [48, 128], strides = [1, 1]} : vector<48x384xf32> to vector<48x128xf32>
    %51 = vector.broadcast %13 : vector<1x128xf32> to vector<48x128xf32>
    %52 = arith.addf %50, %51 : vector<48x128xf32>
    %53 = tpu.iota {dimensions = array<i32: 2>} : vector<1x1x24xi32>
    %54 = vector.extract_strided_slice %46 {offsets = [0, 0], sizes = [24, 128], strides = [1, 1]} : vector<48x128xf32> to vector<24x128xf32>
    %55 = vector.extract_strided_slice %54 {offsets = [0, 0], sizes = [24, 32], strides = [1, 1]} : vector<24x128xf32> to vector<24x32xf32>
    %56 = vector.extract_strided_slice %54 {offsets = [0, 32], sizes = [24, 32], strides = [1, 1]} : vector<24x128xf32> to vector<24x32xf32>
    %57 = vector.extract_strided_slice %54 {offsets = [0, 64], sizes = [24, 32], strides = [1, 1]} : vector<24x128xf32> to vector<24x32xf32>
    %58 = vector.extract_strided_slice %54 {offsets = [0, 96], sizes = [24, 32], strides = [1, 1]} : vector<24x128xf32> to vector<24x32xf32>
    %59 = vector.shape_cast %55 : vector<24x32xf32> to vector<1x24x32xf32>
    %60 = vector.shape_cast %56 : vector<24x32xf32> to vector<1x24x32xf32>
    %61 = vector.shape_cast %57 : vector<24x32xf32> to vector<1x24x32xf32>
    %62 = vector.shape_cast %58 : vector<24x32xf32> to vector<1x24x32xf32>
    %63 = tpu.concatenate %59, %60, %61, %62 in 0 : vector<1x24x32xf32>, vector<1x24x32xf32>, vector<1x24x32xf32>, vector<1x24x32xf32> -> vector<4x24x32xf32>
    %cst_13 = arith.constant 0.176776692 : f32
    %64 = vector.broadcast %cst_13 : f32 to vector<4x24x32xf32>
    %65 = arith.mulf %63, %64 : vector<4x24x32xf32>
    %66 = arith.truncf %65 : vector<4x24x32xf32> to vector<4x24x32xbf16>
    %67 = vector.extract_strided_slice %49 {offsets = [0, 0], sizes = [24, 128], strides = [1, 1]} : vector<48x128xf32> to vector<24x128xf32>
    %68 = vector.extract_strided_slice %67 {offsets = [0, 0], sizes = [24, 32], strides = [1, 1]} : vector<24x128xf32> to vector<24x32xf32>
    %69 = vector.extract_strided_slice %67 {offsets = [0, 32], sizes = [24, 32], strides = [1, 1]} : vector<24x128xf32> to vector<24x32xf32>
    %70 = vector.extract_strided_slice %67 {offsets = [0, 64], sizes = [24, 32], strides = [1, 1]} : vector<24x128xf32> to vector<24x32xf32>
    %71 = vector.extract_strided_slice %67 {offsets = [0, 96], sizes = [24, 32], strides = [1, 1]} : vector<24x128xf32> to vector<24x32xf32>
    %72 = vector.shape_cast %68 : vector<24x32xf32> to vector<1x24x32xf32>
    %73 = vector.shape_cast %69 : vector<24x32xf32> to vector<1x24x32xf32>
    %74 = vector.shape_cast %70 : vector<24x32xf32> to vector<1x24x32xf32>
    %75 = vector.shape_cast %71 : vector<24x32xf32> to vector<1x24x32xf32>
    %76 = tpu.concatenate %72, %73, %74, %75 in 0 : vector<1x24x32xf32>, vector<1x24x32xf32>, vector<1x24x32xf32>, vector<1x24x32xf32> -> vector<4x24x32xf32>
    %77 = arith.truncf %76 : vector<4x24x32xf32> to vector<4x24x32xbf16>
    %78 = vector.extract_strided_slice %52 {offsets = [0, 0], sizes = [24, 128], strides = [1, 1]} : vector<48x128xf32> to vector<24x128xf32>
    %79 = vector.extract_strided_slice %78 {offsets = [0, 0], sizes = [24, 32], strides = [1, 1]} : vector<24x128xf32> to vector<24x32xf32>
    %80 = vector.extract_strided_slice %78 {offsets = [0, 32], sizes = [24, 32], strides = [1, 1]} : vector<24x128xf32> to vector<24x32xf32>
    %81 = vector.extract_strided_slice %78 {offsets = [0, 64], sizes = [24, 32], strides = [1, 1]} : vector<24x128xf32> to vector<24x32xf32>
    %82 = vector.extract_strided_slice %78 {offsets = [0, 96], sizes = [24, 32], strides = [1, 1]} : vector<24x128xf32> to vector<24x32xf32>
    %83 = vector.shape_cast %79 : vector<24x32xf32> to vector<1x24x32xf32>
    %84 = vector.shape_cast %80 : vector<24x32xf32> to vector<1x24x32xf32>
    %85 = vector.shape_cast %81 : vector<24x32xf32> to vector<1x24x32xf32>
    %86 = vector.shape_cast %82 : vector<24x32xf32> to vector<1x24x32xf32>
    %87 = tpu.concatenate %83, %84, %85, %86 in 0 : vector<1x24x32xf32>, vector<1x24x32xf32>, vector<1x24x32xf32>, vector<1x24x32xf32> -> vector<4x24x32xf32>
    %88 = arith.truncf %87 : vector<4x24x32xf32> to vector<4x24x32xbf16>
    "tpu.trace_start"() <{level = 10 : i32, message = "htd,hsd->hts"}> : () -> ()
    %cst_14 = arith.constant dense<0.000000e+00> : vector<4x24x24xf32>
    %89 = tpu.matmul %66, %77, %cst_14 {dimension_numbers = #tpu.dot_dimension_numbers<[2], [2], [1], [1], [0, 0, 0, 1, 1, 1], [0], [0]>} : vector<4x24x32xbf16>, vector<4x24x32xbf16>, vector<4x24x24xf32> -> vector<4x24x24xf32>
    %c17_i32 = arith.constant 17 : i32
    "tpu.trace_stop"() : () -> ()
    %90 = vector.broadcast %c17_i32 : i32 to vector<1x1x24xi32>
    %91 = arith.cmpi slt, %53, %90 : vector<1x1x24xi32>
    %cst_15 = arith.constant -1.000000e+30 : f32
    %92 = vector.shape_cast %91 : vector<1x1x24xi1> to vector<1x1x24xi1>
    %93 = vector.broadcast %92 : vector<1x1x24xi1> to vector<4x24x24xi1>
    %94 = vector.broadcast %cst_15 : f32 to vector<4x24x24xf32>
    %95 = arith.select %93, %89, %94 : vector<4x24x24xi1>, vector<4x24x24xf32>
    %cst_16 = arith.constant dense<0xFF800000> : vector<4x24xf32>
    %96 = vector.multi_reduction <maximumf>, %95, %cst_16 [2] : vector<4x24x24xf32> to vector<4x24xf32>
    %97 = vector.shape_cast %96 : vector<4x24xf32> to vector<4x24x1xf32>
    %98 = vector.broadcast %97 : vector<4x24x1xf32> to vector<4x24x24xf32>
    %99 = arith.subf %95, %98 : vector<4x24x24xf32>
    %100 = math.exp %99 : vector<4x24x24xf32>
    %cst_17 = arith.constant dense<0.000000e+00> : vector<4x24xf32>
    %101 = vector.multi_reduction <add>, %100, %cst_17 [2] : vector<4x24x24xf32> to vector<4x24xf32>
    %102 = vector.shape_cast %101 : vector<4x24xf32> to vector<4x24x1xf32>
    %103 = tpu.reciprocal %102 {approx = true} : vector<4x24x1xf32> -> vector<4x24x1xf32>
    %104 = vector.broadcast %103 : vector<4x24x1xf32> to vector<4x24x24xf32>
    %105 = arith.mulf %100, %104 : vector<4x24x24xf32>
    %106 = arith.truncf %105 : vector<4x24x24xf32> to vector<4x24x24xbf16>
    "tpu.trace_start"() <{level = 10 : i32, message = "hts,hsd->htd"}> : () -> ()
    %cst_18 = arith.constant dense<0.000000e+00> : vector<4x24x32xf32>
    %107 = tpu.matmul %106, %88, %cst_18 {dimension_numbers = #tpu.dot_dimension_numbers<[2], [1], [1], [2], [0, 0, 0, 1, 1, 2], [0], [0]>} : vector<4x24x24xbf16>, vector<4x24x32xbf16>, vector<4x24x32xf32> -> vector<4x24x32xf32>
    "tpu.trace_stop"() : () -> ()
    %108 = vector.extract_strided_slice %107 {offsets = [0, 0, 0], sizes = [1, 24, 32], strides = [1, 1, 1]} : vector<4x24x32xf32> to vector<1x24x32xf32>
    %109 = vector.shape_cast %108 : vector<1x24x32xf32> to vector<24x32xf32>
    %110 = vector.extract_strided_slice %107 {offsets = [1, 0, 0], sizes = [1, 24, 32], strides = [1, 1, 1]} : vector<4x24x32xf32> to vector<1x24x32xf32>
    %111 = vector.shape_cast %110 : vector<1x24x32xf32> to vector<24x32xf32>
    %112 = vector.extract_strided_slice %107 {offsets = [2, 0, 0], sizes = [1, 24, 32], strides = [1, 1, 1]} : vector<4x24x32xf32> to vector<1x24x32xf32>
    %113 = vector.shape_cast %112 : vector<1x24x32xf32> to vector<24x32xf32>
    %114 = vector.extract_strided_slice %107 {offsets = [3, 0, 0], sizes = [1, 24, 32], strides = [1, 1, 1]} : vector<4x24x32xf32> to vector<1x24x32xf32>
    %115 = vector.shape_cast %114 : vector<1x24x32xf32> to vector<24x32xf32>
    %116 = tpu.concatenate %109, %111, %113, %115 in 1 : vector<24x32xf32>, vector<24x32xf32>, vector<24x32xf32>, vector<24x32xf32> -> vector<24x128xf32>
    %117 = vector.extract_strided_slice %46 {offsets = [24, 0], sizes = [24, 128], strides = [1, 1]} : vector<48x128xf32> to vector<24x128xf32>
    %118 = vector.extract_strided_slice %117 {offsets = [0, 0], sizes = [24, 32], strides = [1, 1]} : vector<24x128xf32> to vector<24x32xf32>
    %119 = vector.extract_strided_slice %117 {offsets = [0, 32], sizes = [24, 32], strides = [1, 1]} : vector<24x128xf32> to vector<24x32xf32>
    %120 = vector.extract_strided_slice %117 {offsets = [0, 64], sizes = [24, 32], strides = [1, 1]} : vector<24x128xf32> to vector<24x32xf32>
    %121 = vector.extract_strided_slice %117 {offsets = [0, 96], sizes = [24, 32], strides = [1, 1]} : vector<24x128xf32> to vector<24x32xf32>
    %122 = vector.shape_cast %118 : vector<24x32xf32> to vector<1x24x32xf32>
    %123 = vector.shape_cast %119 : vector<24x32xf32> to vector<1x24x32xf32>
    %124 = vector.shape_cast %120 : vector<24x32xf32> to vector<1x24x32xf32>
    %125 = vector.shape_cast %121 : vector<24x32xf32> to vector<1x24x32xf32>
    %126 = tpu.concatenate %122, %123, %124, %125 in 0 : vector<1x24x32xf32>, vector<1x24x32xf32>, vector<1x24x32xf32>, vector<1x24x32xf32> -> vector<4x24x32xf32>
    %cst_19 = arith.constant 0.176776692 : f32
    %127 = vector.broadcast %cst_19 : f32 to vector<4x24x32xf32>
    %128 = arith.mulf %126, %127 : vector<4x24x32xf32>
    %129 = arith.truncf %128 : vector<4x24x32xf32> to vector<4x24x32xbf16>
    %130 = vector.extract_strided_slice %49 {offsets = [24, 0], sizes = [24, 128], strides = [1, 1]} : vector<48x128xf32> to vector<24x128xf32>
    %131 = vector.extract_strided_slice %130 {offsets = [0, 0], sizes = [24, 32], strides = [1, 1]} : vector<24x128xf32> to vector<24x32xf32>
    %132 = vector.extract_strided_slice %130 {offsets = [0, 32], sizes = [24, 32], strides = [1, 1]} : vector<24x128xf32> to vector<24x32xf32>
    %133 = vector.extract_strided_slice %130 {offsets = [0, 64], sizes = [24, 32], strides = [1, 1]} : vector<24x128xf32> to vector<24x32xf32>
    %134 = vector.extract_strided_slice %130 {offsets = [0, 96], sizes = [24, 32], strides = [1, 1]} : vector<24x128xf32> to vector<24x32xf32>
    %135 = vector.shape_cast %131 : vector<24x32xf32> to vector<1x24x32xf32>
    %136 = vector.shape_cast %132 : vector<24x32xf32> to vector<1x24x32xf32>
    %137 = vector.shape_cast %133 : vector<24x32xf32> to vector<1x24x32xf32>
    %138 = vector.shape_cast %134 : vector<24x32xf32> to vector<1x24x32xf32>
    %139 = tpu.concatenate %135, %136, %137, %138 in 0 : vector<1x24x32xf32>, vector<1x24x32xf32>, vector<1x24x32xf32>, vector<1x24x32xf32> -> vector<4x24x32xf32>
    %140 = arith.truncf %139 : vector<4x24x32xf32> to vector<4x24x32xbf16>
    %141 = vector.extract_strided_slice %52 {offsets = [24, 0], sizes = [24, 128], strides = [1, 1]} : vector<48x128xf32> to vector<24x128xf32>
    %142 = vector.extract_strided_slice %141 {offsets = [0, 0], sizes = [24, 32], strides = [1, 1]} : vector<24x128xf32> to vector<24x32xf32>
    %143 = vector.extract_strided_slice %141 {offsets = [0, 32], sizes = [24, 32], strides = [1, 1]} : vector<24x128xf32> to vector<24x32xf32>
    %144 = vector.extract_strided_slice %141 {offsets = [0, 64], sizes = [24, 32], strides = [1, 1]} : vector<24x128xf32> to vector<24x32xf32>
    %145 = vector.extract_strided_slice %141 {offsets = [0, 96], sizes = [24, 32], strides = [1, 1]} : vector<24x128xf32> to vector<24x32xf32>
    %146 = vector.shape_cast %142 : vector<24x32xf32> to vector<1x24x32xf32>
    %147 = vector.shape_cast %143 : vector<24x32xf32> to vector<1x24x32xf32>
    %148 = vector.shape_cast %144 : vector<24x32xf32> to vector<1x24x32xf32>
    %149 = vector.shape_cast %145 : vector<24x32xf32> to vector<1x24x32xf32>
    %150 = tpu.concatenate %146, %147, %148, %149 in 0 : vector<1x24x32xf32>, vector<1x24x32xf32>, vector<1x24x32xf32>, vector<1x24x32xf32> -> vector<4x24x32xf32>
    %151 = arith.truncf %150 : vector<4x24x32xf32> to vector<4x24x32xbf16>
    "tpu.trace_start"() <{level = 10 : i32, message = "htd,hsd->hts"}> : () -> ()
    %cst_20 = arith.constant dense<0.000000e+00> : vector<4x24x24xf32>
    %152 = tpu.matmul %129, %140, %cst_20 {dimension_numbers = #tpu.dot_dimension_numbers<[2], [2], [1], [1], [0, 0, 0, 1, 1, 1], [0], [0]>} : vector<4x24x32xbf16>, vector<4x24x32xbf16>, vector<4x24x24xf32> -> vector<4x24x24xf32>
    %c17_i32_21 = arith.constant 17 : i32
    "tpu.trace_stop"() : () -> ()
    %153 = vector.broadcast %c17_i32_21 : i32 to vector<1x1x24xi32>
    %154 = arith.cmpi slt, %53, %153 : vector<1x1x24xi32>
    %cst_22 = arith.constant -1.000000e+30 : f32
    %155 = vector.shape_cast %154 : vector<1x1x24xi1> to vector<1x1x24xi1>
    %156 = vector.broadcast %155 : vector<1x1x24xi1> to vector<4x24x24xi1>
    %157 = vector.broadcast %cst_22 : f32 to vector<4x24x24xf32>
    %158 = arith.select %156, %152, %157 : vector<4x24x24xi1>, vector<4x24x24xf32>
    %cst_23 = arith.constant dense<0xFF800000> : vector<4x24xf32>
    %159 = vector.multi_reduction <maximumf>, %158, %cst_23 [2] : vector<4x24x24xf32> to vector<4x24xf32>
    %160 = vector.shape_cast %159 : vector<4x24xf32> to vector<4x24x1xf32>
    %161 = vector.broadcast %160 : vector<4x24x1xf32> to vector<4x24x24xf32>
    %162 = arith.subf %158, %161 : vector<4x24x24xf32>
    %163 = math.exp %162 : vector<4x24x24xf32>
    %cst_24 = arith.constant dense<0.000000e+00> : vector<4x24xf32>
    %164 = vector.multi_reduction <add>, %163, %cst_24 [2] : vector<4x24x24xf32> to vector<4x24xf32>
    %165 = vector.shape_cast %164 : vector<4x24xf32> to vector<4x24x1xf32>
    %166 = tpu.reciprocal %165 {approx = true} : vector<4x24x1xf32> -> vector<4x24x1xf32>
    %167 = vector.broadcast %166 : vector<4x24x1xf32> to vector<4x24x24xf32>
    %168 = arith.mulf %163, %167 : vector<4x24x24xf32>
    %169 = arith.truncf %168 : vector<4x24x24xf32> to vector<4x24x24xbf16>
    "tpu.trace_start"() <{level = 10 : i32, message = "hts,hsd->htd"}> : () -> ()
    %cst_25 = arith.constant dense<0.000000e+00> : vector<4x24x32xf32>
    %170 = tpu.matmul %169, %151, %cst_25 {dimension_numbers = #tpu.dot_dimension_numbers<[2], [1], [1], [2], [0, 0, 0, 1, 1, 2], [0], [0]>} : vector<4x24x24xbf16>, vector<4x24x32xbf16>, vector<4x24x32xf32> -> vector<4x24x32xf32>
    "tpu.trace_stop"() : () -> ()
    %171 = vector.extract_strided_slice %170 {offsets = [0, 0, 0], sizes = [1, 24, 32], strides = [1, 1, 1]} : vector<4x24x32xf32> to vector<1x24x32xf32>
    %172 = vector.shape_cast %171 : vector<1x24x32xf32> to vector<24x32xf32>
    %173 = vector.extract_strided_slice %170 {offsets = [1, 0, 0], sizes = [1, 24, 32], strides = [1, 1, 1]} : vector<4x24x32xf32> to vector<1x24x32xf32>
    %174 = vector.shape_cast %173 : vector<1x24x32xf32> to vector<24x32xf32>
    %175 = vector.extract_strided_slice %170 {offsets = [2, 0, 0], sizes = [1, 24, 32], strides = [1, 1, 1]} : vector<4x24x32xf32> to vector<1x24x32xf32>
    %176 = vector.shape_cast %175 : vector<1x24x32xf32> to vector<24x32xf32>
    %177 = vector.extract_strided_slice %170 {offsets = [3, 0, 0], sizes = [1, 24, 32], strides = [1, 1, 1]} : vector<4x24x32xf32> to vector<1x24x32xf32>
    %178 = vector.shape_cast %177 : vector<1x24x32xf32> to vector<24x32xf32>
    %179 = tpu.concatenate %172, %174, %176, %178 in 1 : vector<24x32xf32>, vector<24x32xf32>, vector<24x32xf32>, vector<24x32xf32> -> vector<24x128xf32>
    %180 = tpu.concatenate %116, %179 in 0 : vector<24x128xf32>, vector<24x128xf32> -> vector<48x128xf32>
    %181 = arith.truncf %180 : vector<48x128xf32> to vector<48x128xbf16>
    %c0_26 = arith.constant 0 : index
    %c0_27 = arith.constant 0 : index
    %c0_28 = arith.constant 0 : index
    %182 = vector.load %arg3[%c0_26, %c0_27, %c0_28] : memref<1x128x128xbf16, #tpu.memory_space<vmem>>, vector<1x128x128xbf16>
    %183 = vector.shape_cast %182 : vector<1x128x128xbf16> to vector<128x128xbf16>
    %cst_29 = arith.constant dense<0.000000e+00> : vector<48x128xf32>
    %184 = tpu.matmul %181, %183, %cst_29 {dimension_numbers = #tpu.dot_dimension_numbers<[1], [0], [0], [1], [0, 0, 1, 1], [], []>} : vector<48x128xbf16>, vector<128x128xbf16>, vector<48x128xf32> -> vector<48x128xf32>
    %185 = arith.addf %19, %184 : vector<48x128xf32>
    %186 = vector.broadcast %7 : vector<1x128xf32> to vector<48x128xf32>
    %187 = arith.addf %185, %186 : vector<48x128xf32>
    %cst_30 = arith.constant dense<0.000000e+00> : vector<48xf32>
    %188 = vector.multi_reduction <add>, %187, %cst_30 [1] : vector<48x128xf32> to vector<48xf32>
    %189 = vector.shape_cast %188 : vector<48xf32> to vector<48x1xf32>
    %cst_31 = arith.constant 1.280000e+02 : f32
    %190 = vector.broadcast %cst_31 : f32 to vector<48x1xf32>
    %191 = arith.divf %189, %190 : vector<48x1xf32>
    %192 = vector.broadcast %191 : vector<48x1xf32> to vector<48x128xf32>
    %193 = arith.subf %187, %192 : vector<48x128xf32>
    %194 = arith.mulf %193, %193 : vector<48x128xf32>
    %cst_32 = arith.constant dense<0.000000e+00> : vector<48xf32>
    %195 = vector.multi_reduction <add>, %194, %cst_32 [1] : vector<48x128xf32> to vector<48xf32>
    %196 = vector.shape_cast %195 : vector<48xf32> to vector<48x1xf32>
    %cst_33 = arith.constant 1.280000e+02 : f32
    %197 = vector.broadcast %cst_33 : f32 to vector<48x1xf32>
    %198 = arith.divf %196, %197 : vector<48x1xf32>
    %cst_34 = arith.constant 9.99999997E-7 : f32
    %199 = vector.broadcast %cst_34 : f32 to vector<48x1xf32>
    %200 = arith.addf %198, %199 : vector<48x1xf32>
    %201 = math.rsqrt %200 : vector<48x1xf32>
    %202 = vector.broadcast %201 : vector<48x1xf32> to vector<48x128xf32>
    %203 = arith.mulf %193, %202 : vector<48x128xf32>
    %204 = vector.broadcast %8 : vector<1x128xf32> to vector<48x128xf32>
    %205 = arith.mulf %203, %204 : vector<48x128xf32>
    %206 = vector.broadcast %9 : vector<1x128xf32> to vector<48x128xf32>
    %207 = arith.addf %205, %206 : vector<48x128xf32>
    %208 = arith.truncf %207 : vector<48x128xf32> to vector<48x128xbf16>
    %c0_35 = arith.constant 0 : index
    %c0_36 = arith.constant 0 : index
    %c0_37 = arith.constant 0 : index
    %209 = vector.load %arg4[%c0_35, %c0_36, %c0_37] : memref<1x128x512xbf16, #tpu.memory_space<vmem>>, vector<1x128x512xbf16>
    %210 = vector.shape_cast %209 : vector<1x128x512xbf16> to vector<128x512xbf16>
    %cst_38 = arith.constant dense<0.000000e+00> : vector<48x512xf32>
    %211 = tpu.matmul %208, %210, %cst_38 {dimension_numbers = #tpu.dot_dimension_numbers<[1], [0], [0], [1], [0, 0, 1, 1], [], []>} : vector<48x128xbf16>, vector<128x512xbf16>, vector<48x512xf32> -> vector<48x512xf32>
    %212 = vector.broadcast %18 : vector<1x512xf32> to vector<48x512xf32>
    %213 = arith.addf %211, %212 : vector<48x512xf32>
    %214 = arith.mulf %213, %213 : vector<48x512xf32>
    %215 = arith.mulf %213, %214 : vector<48x512xf32>
    %cst_39 = arith.constant 4.471500e-02 : f32
    %216 = vector.broadcast %cst_39 : f32 to vector<48x512xf32>
    %217 = arith.mulf %216, %215 : vector<48x512xf32>
    %218 = arith.addf %213, %217 : vector<48x512xf32>
    %cst_40 = arith.constant 0.797884583 : f32
    %219 = vector.broadcast %cst_40 : f32 to vector<48x512xf32>
    %220 = arith.mulf %219, %218 : vector<48x512xf32>
    %221 = math.tanh %220 : vector<48x512xf32>
    %cst_41 = arith.constant 1.000000e+00 : f32
    %222 = vector.broadcast %cst_41 : f32 to vector<48x512xf32>
    %223 = arith.addf %222, %221 : vector<48x512xf32>
    %cst_42 = arith.constant 5.000000e-01 : f32
    %224 = vector.broadcast %cst_42 : f32 to vector<48x512xf32>
    %225 = arith.mulf %224, %223 : vector<48x512xf32>
    %226 = arith.mulf %213, %225 : vector<48x512xf32>
    %227 = arith.truncf %226 : vector<48x512xf32> to vector<48x512xbf16>
    %c0_43 = arith.constant 0 : index
    %c0_44 = arith.constant 0 : index
    %c0_45 = arith.constant 0 : index
    %228 = vector.load %arg5[%c0_43, %c0_44, %c0_45] : memref<1x512x128xbf16, #tpu.memory_space<vmem>>, vector<1x512x128xbf16>
    %229 = vector.shape_cast %228 : vector<1x512x128xbf16> to vector<512x128xbf16>
    %cst_46 = arith.constant dense<0.000000e+00> : vector<48x128xf32>
    %230 = tpu.matmul %227, %229, %cst_46 {dimension_numbers = #tpu.dot_dimension_numbers<[1], [0], [0], [1], [0, 0, 1, 1], [], []>} : vector<48x512xbf16>, vector<512x128xbf16>, vector<48x128xf32> -> vector<48x128xf32>
    %231 = vector.broadcast %10 : vector<1x128xf32> to vector<48x128xf32>
    %232 = arith.addf %230, %231 : vector<48x128xf32>
    %233 = arith.addf %187, %232 : vector<48x128xf32>
    %c0_47 = arith.constant 0 : index
    %c0_48 = arith.constant 0 : index
    %234 = vector.load %arg9[%c0_47, %c0_48] : memref<48x128xf32, #tpu.memory_space<vmem>>, vector<48x128xf32>
    tpu.vector_store %arg9[%c0_47, %c0_48], %233 {strides = array<i32>} : memref<48x128xf32, #tpu.memory_space<vmem>>, vector<48x128xf32>,
    %c3_i32 = arith.constant 3 : i32
    %235 = arith.cmpi eq, %arg0, %c3_i32 : i32
    %236 = arith.extui %235 : i1 to i32
    %c0_i32_49 = arith.constant 0 : i32
    %237 = arith.cmpi ne, %236, %c0_i32_49 : i32
    scf.if %237 {
      %c0_50 = arith.constant 0 : index
      %c0_51 = arith.constant 0 : index
      %238 = vector.load %arg7[%c0_50, %c0_51] : memref<2x128xf32, #tpu.memory_space<vmem>>, vector<1x128xf32>
      %c1 = arith.constant 1 : index
      %c0_52 = arith.constant 0 : index
      %239 = vector.load %arg7[%c1, %c0_52] : memref<2x128xf32, #tpu.memory_space<vmem>>, vector<1x128xf32>
      %240 = vector.extract_strided_slice %233 {offsets = [0, 0], sizes = [1, 128], strides = [1, 1]} : vector<48x128xf32> to vector<1x128xf32>
      %cst_53 = arith.constant dense<0.000000e+00> : vector<1xf32>
      %241 = vector.multi_reduction <add>, %240, %cst_53 [1] : vector<1x128xf32> to vector<1xf32>
      %242 = vector.shape_cast %241 : vector<1xf32> to vector<1x1xf32>
      %cst_54 = arith.constant 1.280000e+02 : f32
      %243 = vector.broadcast %cst_54 : f32 to vector<1x1xf32>
      %244 = arith.divf %242, %243 : vector<1x1xf32>
      %245 = vector.broadcast %244 : vector<1x1xf32> to vector<1x128xf32>
      %246 = arith.subf %240, %245 : vector<1x128xf32>
      %247 = arith.mulf %246, %246 : vector<1x128xf32>
      %cst_55 = arith.constant dense<0.000000e+00> : vector<1xf32>
      %248 = vector.multi_reduction <add>, %247, %cst_55 [1] : vector<1x128xf32> to vector<1xf32>
      %249 = vector.shape_cast %248 : vector<1xf32> to vector<1x1xf32>
      %cst_56 = arith.constant 1.280000e+02 : f32
      %250 = vector.broadcast %cst_56 : f32 to vector<1x1xf32>
      %251 = arith.divf %249, %250 : vector<1x1xf32>
      %cst_57 = arith.constant 9.99999997E-7 : f32
      %252 = vector.broadcast %cst_57 : f32 to vector<1x1xf32>
      %253 = arith.addf %251, %252 : vector<1x1xf32>
      %254 = math.rsqrt %253 : vector<1x1xf32>
      %255 = vector.broadcast %254 : vector<1x1xf32> to vector<1x128xf32>
      %256 = arith.mulf %246, %255 : vector<1x128xf32>
      %257 = arith.mulf %256, %238 : vector<1x128xf32>
      %258 = arith.addf %257, %239 : vector<1x128xf32>
      %c0_58 = arith.constant 0 : index
      %c0_59 = arith.constant 0 : index
      %c0_60 = arith.constant 0 : index
      %259 = vector.load %arg8[%c0_58, %c0_59, %c0_60] : memref<2x1x128xf32, #tpu.memory_space<vmem>>, vector<1x1x128xf32>
      %260 = vector.shape_cast %259 : vector<1x1x128xf32> to vector<1x128xf32>
      %261 = vector.shape_cast %258 : vector<1x128xf32> to vector<1x1x128xf32>
      tpu.vector_store %arg8[%c0_58, %c0_59, %c0_60], %261 {strides = array<i32>} : memref<2x1x128xf32, #tpu.memory_space<vmem>>, vector<1x1x128xf32>,
      %262 = vector.extract_strided_slice %233 {offsets = [24, 0], sizes = [1, 128], strides = [1, 1]} : vector<48x128xf32> to vector<1x128xf32>
      %cst_61 = arith.constant dense<0.000000e+00> : vector<1xf32>
      %263 = vector.multi_reduction <add>, %262, %cst_61 [1] : vector<1x128xf32> to vector<1xf32>
      %264 = vector.shape_cast %263 : vector<1xf32> to vector<1x1xf32>
      %cst_62 = arith.constant 1.280000e+02 : f32
      %265 = vector.broadcast %cst_62 : f32 to vector<1x1xf32>
      %266 = arith.divf %264, %265 : vector<1x1xf32>
      %267 = vector.broadcast %266 : vector<1x1xf32> to vector<1x128xf32>
      %268 = arith.subf %262, %267 : vector<1x128xf32>
      %269 = arith.mulf %268, %268 : vector<1x128xf32>
      %cst_63 = arith.constant dense<0.000000e+00> : vector<1xf32>
      %270 = vector.multi_reduction <add>, %269, %cst_63 [1] : vector<1x128xf32> to vector<1xf32>
      %271 = vector.shape_cast %270 : vector<1xf32> to vector<1x1xf32>
      %cst_64 = arith.constant 1.280000e+02 : f32
      %272 = vector.broadcast %cst_64 : f32 to vector<1x1xf32>
      %273 = arith.divf %271, %272 : vector<1x1xf32>
      %cst_65 = arith.constant 9.99999997E-7 : f32
      %274 = vector.broadcast %cst_65 : f32 to vector<1x1xf32>
      %275 = arith.addf %273, %274 : vector<1x1xf32>
      %276 = math.rsqrt %275 : vector<1x1xf32>
      %277 = vector.broadcast %276 : vector<1x1xf32> to vector<1x128xf32>
      %278 = arith.mulf %268, %277 : vector<1x128xf32>
      %279 = arith.mulf %278, %238 : vector<1x128xf32>
      %280 = arith.addf %279, %239 : vector<1x128xf32>
      %c1_66 = arith.constant 1 : index
      %c0_67 = arith.constant 0 : index
      %c0_68 = arith.constant 0 : index
      %281 = vector.load %arg8[%c1_66, %c0_67, %c0_68] : memref<2x1x128xf32, #tpu.memory_space<vmem>>, vector<1x1x128xf32>
      %282 = vector.shape_cast %281 : vector<1x1x128xf32> to vector<1x128xf32>
      %283 = vector.shape_cast %280 : vector<1x128xf32> to vector<1x1x128xf32>
      tpu.vector_store %arg8[%c1_66, %c0_67, %c0_68], %283 {strides = array<i32>} : memref<2x1x128xf32, #tpu.memory_space<vmem>>, vector<1x1x128xf32>,
    } else {
    }
    return
  }
  func.func @transform_0(%arg0: i32) -> (i32, i32, i32) {
    %c0_i32 = arith.constant 0 : i32
    %c0_i32_0 = arith.constant 0 : i32
    %c0_i32_1 = arith.constant 0 : i32
    %c0_i32_2 = arith.constant 0 : i32
    return %c0_i32, %c0_i32_0, %c0_i32_1 : i32, i32, i32
  }
  func.func @transform_1(%arg0: i32) -> (i32, i32, i32) {
    %c0_i32 = arith.constant 0 : i32
    %c0_i32_0 = arith.constant 0 : i32
    %c0_i32_1 = arith.constant 0 : i32
    return %arg0, %c0_i32, %c0_i32_0 : i32, i32, i32
  }
  func.func @transform_2(%arg0: i32) -> (i32, i32, i32) {
    %c0_i32 = arith.constant 0 : i32
    %c0_i32_0 = arith.constant 0 : i32
    %c0_i32_1 = arith.constant 0 : i32
    return %arg0, %c0_i32, %c0_i32_0 : i32, i32, i32
  }
  func.func @transform_3(%arg0: i32) -> (i32, i32, i32) {
    %c0_i32 = arith.constant 0 : i32
    %c0_i32_0 = arith.constant 0 : i32
    %c0_i32_1 = arith.constant 0 : i32
    return %arg0, %c0_i32, %c0_i32_0 : i32, i32, i32
  }
  func.func @transform_4(%arg0: i32) -> (i32, i32, i32) {
    %c0_i32 = arith.constant 0 : i32
    %c0_i32_0 = arith.constant 0 : i32
    %c0_i32_1 = arith.constant 0 : i32
    return %arg0, %c0_i32, %c0_i32_0 : i32, i32, i32
  }
  func.func @transform_5(%arg0: i32) -> (i32, i32, i32) {
    %c0_i32 = arith.constant 0 : i32
    %c0_i32_0 = arith.constant 0 : i32
    %c0_i32_1 = arith.constant 0 : i32
    return %arg0, %c0_i32, %c0_i32_0 : i32, i32, i32
  }
  func.func @transform_6(%arg0: i32) -> (i32, i32) {
    %c0_i32 = arith.constant 0 : i32
    %c0_i32_0 = arith.constant 0 : i32
    %c0_i32_1 = arith.constant 0 : i32
    return %c0_i32, %c0_i32_0 : i32, i32
  }
  func.func @transform_7(%arg0: i32) -> (i32, i32, i32) {
    %c0_i32 = arith.constant 0 : i32
    %c0_i32_0 = arith.constant 0 : i32
    %c0_i32_1 = arith.constant 0 : i32
    %c0_i32_2 = arith.constant 0 : i32
    return %c0_i32, %c0_i32_0, %c0_i32_1 : i32, i32, i32
  }
}

</mosaic_0001>

<bundles_post_ra>
// kernel: kaiko_encoder_forward.2
= control target key start
LH: loop header
LB: loop body
LE: loop exit
PB: predicated region body
PF: predicated region fallthrough
CT: control target
= control target key end

     0   :  { %s1075_s1 = inlined_call_operand.vmem [shape: bf16[768,128], index: 1, kind: input, shape index: {}]   ;;  %s1076_s0 = inlined_call_operand.vmem [shape: bf16[32,768], index: 0, kind: input, shape index: {}]   ;;  %s1077_s2 = inlined_call_operand.vmem [shape: f32[1,128], index: 2, kind: input, shape index: {}]   ;;  %s1078_s3 = inlined_call_operand.vmem [shape: f32[32,128], index: 3, kind: output, shape index: {}]  }
   0x1   :  { %v794_v0 = vld [vmem:[%s1075_s1 + $0x40] sm:$0xff]   ;;  %v798_v4 = vld [vmem:[%s1075_s1 + $0x48] sm:$0xff]   ;;  %v802_v8 = vld [vmem:[%s1075_s1 + $0x50] sm:$0xff]  }
   0x2   :  { %v795_v1 = vld [vmem:[%s1075_s1 + $0xc0] sm:$0xff]   ;;  %694 = vmatprep.subr.bf16.mxu0 %v794_v0  ;;  %v799_v5 = vld [vmem:[%s1075_s1 + $0xc8] sm:$0xff]   ;;  %v803_v9 = vld [vmem:[%s1075_s1 + $0xd0] sm:$0xff]  }
   0x3   :  { %v796_v2 = vld [vmem:[%s1075_s1] sm:$0xff]   ;;  %722 = vmatprep.subr.bf16.mxu1 %v795_v1  ;;  %v800_v6 = vld [vmem:[%s1075_s1 + $0x8] sm:$0xff]   ;;  %v804_v10 = vld [vmem:[%s1075_s1 + $0x10] sm:$0xff]  }
   0x4   :  { %v797_v3 = vld [vmem:[%s1075_s1 + $0x80] sm:$0xff]   ;;  %695 = vmatpush3.bf16.msra.mxu0 %v796_v2  ;;  %v801_v7 = vld [vmem:[%s1075_s1 + $0x88] sm:$0xff]   ;;  %v805_v11 = vld [vmem:[%s1075_s1 + $0x90] sm:$0xff]  }
   0x5   :  { %723 = vmatpush3.bf16.msra.mxu1 %v797_v3  ;;  %696 = vmatprep.subr.bf16.mxu0 %v798_v4  ;;  %v806_v12 = vld [vmem:[%s1075_s1 + $0x58] sm:$0xff]   ;;  %v810_v16 = vld [vmem:[%s1075_s1 + $0x60] sm:$0xff]   ;;  %v814_v20 = vld [vmem:[%s1075_s1 + $0x68] sm:$0xff]  }
   0x6   :  { %724 = vmatprep.subr.bf16.mxu1 %v799_v5  ;;  %v807_v13 = vld [vmem:[%s1075_s1 + $0xd8] sm:$0xff]   ;;  %v811_v17 = vld [vmem:[%s1075_s1 + $0xe0] sm:$0xff]   ;;  %v815_v21 = vld [vmem:[%s1075_s1 + $0xe8] sm:$0xff]  }
   0x7   :  { %v808_v14 = vld [vmem:[%s1075_s1 + $0x18] sm:$0xff]   ;;  %v812_v18 = vld [vmem:[%s1075_s1 + $0x20] sm:$0xff]   ;;  %v816_v22 = vld [vmem:[%s1075_s1 + $0x28] sm:$0xff]  }
   0x8   :  { %697 = vmatpush3.bf16.msra.mxu0 %v800_v6  ;;  %v809_v15 = vld [vmem:[%s1075_s1 + $0x98] sm:$0xff]   ;;  %v813_v19 = vld [vmem:[%s1075_s1 + $0xa0] sm:$0xff]   ;;  %v817_v23 = vld [vmem:[%s1075_s1 + $0xa8] sm:$0xff]  }
   0x9   :  { %725 = vmatpush3.bf16.msra.mxu1 %v801_v7  ;;  %698 = vmatprep.subr.bf16.mxu0 %v802_v8  ;;  %v818_v24 = vld [vmem:[%s1075_s1 + $0x70] sm:$0xff]   ;;  %v822_v28 = vld [vmem:[%s1075_s1 + $0x78] sm:$0xff]   ;;  %v829_v34 = vld [vmem:[%s1076_s0 + $0x8] ss:$24 sps:$4 sm:$0xff]  }
   0xa   :  { %726 = vmatprep.subr.bf16.mxu1 %v803_v9  ;;  %v819_v25 = vld [vmem:[%s1075_s1 + $0xf0] sm:$0xff]   ;;  %v823_v29 = vld [vmem:[%s1075_s1 + $0xf8] sm:$0xff]   ;;  %v831_v35 = vld [vmem:[%s1076_s0 + $0xc] ss:$24 sps:$4 sm:$0xff]  }
   0xb   :  { %v820_v26 = vld [vmem:[%s1075_s1 + $0x30] sm:$0xff]   ;;  %v824_v30 = vld [vmem:[%s1075_s1 + $0x38] sm:$0xff]   ;;  %v832_v36 = vld [vmem:[%s1075_s1 + $0x140] sm:$0xff]   ;;  %559 = vmatprep.mubr.bf16.mxu1 %v831_v35 }
   0xc   :  { %699 = vmatpush3.bf16.msra.mxu0 %v804_v10  ;;  %v821_v27 = vld [vmem:[%s1075_s1 + $0xb0] sm:$0xff]   ;;  %v825_v31 = vld [vmem:[%s1075_s1 + $0xb8] sm:$0xff]   ;;  %v833_v37 = vld [vmem:[%s1075_s1 + $0x100] sm:$0xff]  }
   0xd   :  { %727 = vmatpush3.bf16.msra.mxu1 %v805_v11  ;;  %700 = vmatprep.subr.bf16.mxu0 %v806_v12  ;;  %v826_v32 = vld [vmem:[%s1076_s0] ss:$24 sps:$4 sm:$0xff]   ;;  %v828_v33 = vld [vmem:[%s1076_s0 + $0x4] ss:$24 sps:$4 sm:$0xff]   ;;  %v834_v38 = vld [vmem:[%s1075_s1 + $0x148] sm:$0xff]  }
   0xe   :  { %728 = vmatprep.subr.bf16.mxu1 %v807_v13  ;;  %510 = vmatprep.mubr.bf16.mxu0 %v828_v33  ;;  %v835_v39 = vld [vmem:[%s1075_s1 + $0x108] sm:$0xff]   ;;  %v836_v40 = vld [vmem:[%s1075_s1 + $0x150] sm:$0xff]   ;;  %v838_v42 = vld [vmem:[%s1075_s1 + $0x158] sm:$0xff]  }
   0xf   :  { %v837_v41 = vld [vmem:[%s1075_s1 + $0x110] sm:$0xff]   ;;  %v839_v43 = vld [vmem:[%s1075_s1 + $0x118] sm:$0xff]   ;;  %v840_v47 = vld [vmem:[%s1075_s1 + $0x160] sm:$0xff]  }
  0x10   :  { %701 = vmatpush3.bf16.msra.mxu0 %v808_v14  ;;  %v842_v44 = vld [vmem:[%s1076_s0 + $0x34] ss:$24 sps:$4 sm:$0xff]   ;;  %v844_v45 = vld [vmem:[%s1076_s0 + $0x30] ss:$24 sps:$4 sm:$0xff]   ;;  %v841_v49 = vld [vmem:[%s1075_s1 + $0x120] sm:$0xff]  }
  0x11   :  { %729 = vmatpush3.bf16.msra.mxu1 %v809_v15  ;;  %702 = vmatprep.subr.bf16.mxu0 %v810_v16  ;;  %v845_v46 = vld [vmem:[%s1076_s0 + $0x3c] ss:$24 sps:$4 sm:$0xff]   ;;  %v848_v48 = vld [vmem:[%s1076_s0 + $0x38] ss:$24 sps:$4 sm:$0xff]   ;;  %v847_v50 = vld [vmem:[%s1075_s1 + $0x168] sm:$0xff]  }
  0x12   :  { %730 = vmatprep.subr.bf16.mxu1 %v811_v17  ;;  %v849_v51 = vld [vmem:[%s1075_s1 + $0x128] sm:$0xff]   ;;  %v850_v53 = vld [vmem:[%s1075_s1 + $0x170] sm:$0xff]   ;;  %v859_v54 = vld [vmem:[%s1076_s0 + $0x44] ss:$24 sps:$4 sm:$0xff]  }
  0x13   :  { %v856_v52 = vld [vmem:[%s1076_s0 + $0x14] ss:$24 sps:$4 sm:$0xff]   ;;  %v852_v56 = vld [vmem:[%s1075_s1 + $0x178] sm:$0xff]   ;;  %v854_v58 = vld [vmem:[%s1076_s0 + $0x10] ss:$24 sps:$4 sm:$0xff]  }
  0x14   :  { %703 = vmatpush3.bf16.msra.mxu0 %v812_v18  ;;  %v851_v55 = vld [vmem:[%s1075_s1 + $0x130] sm:$0xff]   ;;  %v853_v57 = vld [vmem:[%s1075_s1 + $0x138] sm:$0xff]   ;;  %v633_v62 = vld [vmem:[%s1077_s2] ss:$0 sm:$0xff] }
  0x15   :  { %731 = vmatpush3.bf16.msra.mxu1 %v813_v19  ;;  %704 = vmatprep.subr.bf16.mxu0 %v814_v20  ;;  %v857_v59 = vld [vmem:[%s1076_s0 + $0x40] ss:$24 sps:$4 sm:$0xff]  }
  0x16   :  { %732 = vmatprep.subr.bf16.mxu1 %v815_v21 }
  0x18   :  { %705 = vmatpush3.bf16.msra.mxu0 %v816_v22 }
  0x19   :  { %733 = vmatpush3.bf16.msra.mxu1 %v817_v23  ;;  %706 = vmatprep.subr.bf16.mxu0 %v818_v24 }
  0x1a   :  { %734 = vmatprep.subr.bf16.mxu1 %v819_v25 }
  0x1c   :  { %707 = vmatpush3.bf16.msra.mxu0 %v820_v26 }
  0x1d   :  { %735 = vmatpush3.bf16.msra.mxu1 %v821_v27  ;;  %708 = vmatprep.subr.bf16.mxu0 %v822_v28 }
  0x1e   :  { %736 = vmatprep.subr.bf16.mxu1 %v823_v29 }
  0x20   :  { %709 = vmatpush3.bf16.msra.mxu0 %v824_v30 }
  0x21   :  { %737 = vmatpush3.bf16.msra.mxu1 %v825_v31  ;;  %750 = vmatprep.subr.bf16.mxu0 %v832_v36 }
  0x22   :  { %778 = vmatprep.subr.bf16.mxu1 %v832_v36 }
  0x23   :  { %511 = vmatmul.mubr.bf16.vlgmr.msra.gmra.mrb[0].mxu0 %v826_v32 }
  0x24   :  { %560 = vmatmul.mubr.bf16.vlgmr.msra.gmra.mrb[0].mxu1 %v829_v34  ;;  %751 = vmatpush3.bf16.msra.mxu0 %v833_v37 }
  0x25   :  { %786 = vmatpush3.bf16.msra.mxu1 %v833_v37  ;;  %752 = vmatprep.subr.bf16.mxu0 %v834_v38 }
  0x26   :  { %779 = vmatprep.subr.bf16.mxu1 %v834_v38  ;;  %518 = vmatprep.mubr.bf16.mxu0 %v842_v44 }
  0x27   :  { %567 = vmatprep.mubr.bf16.mxu1 %v845_v46 }
  0x28   :  { %753 = vmatpush3.bf16.msra.mxu0 %v835_v39 }
  0x29   :  { %787 = vmatpush3.bf16.msra.mxu1 %v835_v39  ;;  %754 = vmatprep.subr.bf16.mxu0 %v836_v40 }
  0x2a   :  { %780 = vmatprep.subr.bf16.mxu1 %v836_v40 }
  0x2b   :  { %519 = vmatmul.mubr.bf16.gmra.mrb[4].mxu0 %v844_v45 }
  0x2c   :  { %755 = vmatpush3.bf16.msra.mxu0 %v837_v41  ;;  %568 = vmatmul.mubr.bf16.gmra.mrb[4].mxu1 %v848_v48 }
  0x2d   :  { %788 = vmatpush3.bf16.msra.mxu1 %v837_v41  ;;  %756 = vmatprep.subr.bf16.mxu0 %v838_v42 }
  0x2e   :  { %781 = vmatprep.subr.bf16.mxu1 %v838_v42  ;;  %608 = vmatprep.mubr.bf16.mxu0 %v856_v52 }
  0x2f   :  { %616 = vmatprep.mubr.bf16.mxu1 %v859_v54 }
  0x30   :  { %757 = vmatpush3.bf16.msra.mxu0 %v839_v43 }
  0x31   :  { %789 = vmatpush3.bf16.msra.mxu1 %v839_v43  ;;  %758 = vmatprep.subr.bf16.mxu0 %v840_v47 }
  0x32   :  { %782 = vmatprep.subr.bf16.mxu1 %v840_v47 }
  0x34   :  { %759 = vmatpush3.bf16.msra.mxu0 %v841_v49 }
  0x35   :  { %790 = vmatpush3.bf16.msra.mxu1 %v841_v49  ;;  %760 = vmatprep.subr.bf16.mxu0 %v847_v50 }
  0x36   :  { %783 = vmatprep.subr.bf16.mxu1 %v847_v50 }
  0x38   :  { %761 = vmatpush3.bf16.msra.mxu0 %v849_v51 }
  0x39   :  { %791 = vmatpush3.bf16.msra.mxu1 %v849_v51  ;;  %762 = vmatprep.subr.bf16.mxu0 %v850_v53 }
  0x3a   :  { %784 = vmatprep.subr.bf16.mxu1 %v850_v53 }
  0x3c   :  { %763 = vmatpush3.bf16.msra.mxu0 %v851_v55 }
  0x3d   :  { %792 = vmatpush3.bf16.msra.mxu1 %v851_v55  ;;  %764 = vmatprep.subr.bf16.mxu0 %v852_v56 }
  0x3e   :  { %785 = vmatprep.subr.bf16.mxu1 %v852_v56 }
  0x40   :  { %765 = vmatpush3.bf16.msra.mxu0 %v853_v57 }
  0x41   :  { %793 = vmatpush3.bf16.msra.mxu1 %v853_v57 }
  0x43   :  { %609 = vmatmul.mubr.bf16.vlgmr.msra.gmra.mrb[8].mxu0 %v854_v58 }
  0x44   :  { %617 = vmatmul.mubr.bf16.vlgmr.msra.gmra.mrb[8].mxu1 %v857_v59 }
  0xf6   :  { %v710_v60 = vpop.f32.mrb[0].mxu0 }
  0xf7   :  { %v738_v61 = vpop.f32.mrb[0].mxu1  ;;  %v711_v63 = vpop.f32.mrb[1].mxu0 }
  0xf8   :  { %v712_v0 = vadd.f32 %v711_v63, %v710_v60  ;;  %v739_v1 = vpop.f32.mrb[1].mxu1  ;;  %v713_v2 = vpop.f32.mrb[2].mxu0 }
  0xf9   :  { %v740_v3 = vadd.f32 %v739_v1, %v738_v61  ;;  %v741_v4 = vpop.f32.mrb[2].mxu1  ;;  %v714_v5 = vpop.f32.mrb[3].mxu0 }
  0xfa   :  { %v513_v6 = vadd.f32 %v712_v0, %v633_v62  ;;  %v715_v7 = vadd.f32 %v714_v5, %v713_v2  ;;  %v742_v8 = vpop.f32.mrb[3].mxu1 }
  0xfb   :  { %v743_v9 = vadd.f32 %v742_v8, %v741_v4 }
  0xfc   :  { %v562_v10 = vadd.f32 %v740_v3, %v513_v6  ;;  %v516_v11 = vadd.f32 %v715_v7, %v633_v62 }
  0xfe   :  { %v565_v12 = vadd.f32 %v743_v9, %v516_v11  ;;  %v716_v13 = vpop.f32.mrb[4].mxu0 }
  0xff   :  { %v717_v14 = vpop.f32.mrb[5].mxu0  ;;  %v744_v15 = vpop.f32.mrb[4].mxu1 }
 0x100   :  { %v718_v16 = vadd.f32 %v717_v14, %v716_v13  ;;  %v719_v17 = vpop.f32.mrb[6].mxu0  ;;  %v745_v18 = vpop.f32.mrb[5].mxu1 }
 0x101   :  { %v720_v19 = vpop.f32.mrb[7].mxu0  ;;  %v746_v20 = vadd.f32 %v745_v18, %v744_v15  ;;  %v747_v21 = vpop.f32.mrb[6].mxu1 }
 0x102   :  { %v521_v22 = vadd.f32 %v718_v16, %v633_v62  ;;  %v721_v23 = vadd.f32 %v720_v19, %v719_v17  ;;  %v748_v24 = vpop.f32.mrb[7].mxu1 }
 0x103   :  { %v749_v25 = vadd.f32 %v748_v24, %v747_v21 }
 0x104   :  { %v524_v26 = vadd.f32 %v721_v23, %v633_v62  ;;  %v570_v27 = vadd.f32 %v746_v20, %v521_v22 }
 0x106   :  { %v573_v28 = vadd.f32 %v749_v25, %v524_v26 }
 0x116   :  { %v766_v29 = vpop.f32.mrb[8].mxu0 }
 0x117   :  { %v772_v30 = vpop.f32.mrb[8].mxu1  ;;  %v767_v31 = vpop.f32.mrb[9].mxu0 }
 0x118   :  { %v768_v32 = vadd.f32 %v767_v31, %v766_v29  ;;  %v773_v33 = vpop.f32.mrb[9].mxu1  ;;  %v769_v34 = vpop.f32.mrb[10].mxu0 }
 0x119   :  { %v774_v35 = vadd.f32 %v773_v33, %v772_v30  ;;  %v775_v36 = vpop.f32.mrb[10].mxu1  ;;  %v770_v37 = vpop.f32.mrb[11].mxu0 }
 0x11a   :  { %v611_v38 = vadd.f32 %v768_v32, %v562_v10  ;;  %v771_v39 = vadd.f32 %v770_v37, %v769_v34  ;;  %v776_v40 = vpop.f32.mrb[11].mxu1 }
 0x11b   :  { %v619_v41 = vadd.f32 %v774_v35, %v570_v27  ;;  %v777_v42 = vadd.f32 %v776_v40, %v775_v36 }
 0x11c   :  { %625 = vst [vmem:[%s1078_s3] sm:$0xff] %v611_v38  ;;  %v614_v43 = vadd.f32 %v771_v39, %v565_v12 }
 0x11d   :  { %627 = vst [vmem:[%s1078_s3 + $0x10] sm:$0xff] %v619_v41  ;;  %v622_v44 = vadd.f32 %v777_v42, %v573_v28 }
 0x11e   :  { %626 = vst [vmem:[%s1078_s3 + $0x8] sm:$0xff] %v614_v43 }
 0x11f   :  { %628 = vst [vmem:[%s1078_s3 + $0x18] sm:$0xff] %v622_v44 }

// kernel: kaiko_encoder_forward.3
= control target key start
LH: loop header
LB: loop body
LE: loop exit
PB: predicated region body
PF: predicated region fallthrough
CT: control target
= control target key end

     0   :  { %12 = vsyncpa [#allocation4], 0  ;;  %s4712_s24 = smov 0   ;;  %s5866_s0 = inlined_call_operand.vmem [shape: f32[2,24,128], index: 0, kind: input, shape index: {}]   ;;  %s5867_s1 = inlined_call_operand.vmem [shape: bf16[4,128,384], index: 1, kind: input, shape index: {}]   ;;  %s5868_s2 = inlined_call_operand.vmem [shape: bf16[4,128,128], index: 2, kind: input, shape index: {}]   ;;  %s5869_s3 = inlined_call_operand.vmem [shape: bf16[4,128,512], index: 3, kind: input, shape index: {}]   ;;  %s5870_s4 = inlined_call_operand.vmem [shape: bf16[4,512,128], index: 4, kind: input, shape index: {}]   ;;  %s5871_s5 = inlined_call_operand.vmem [shape: f32[4,16,128], index: 5, kind: input, shape index: {}]   ;;  %s5872_s6 = inlined_call_operand.vmem [shape: f32[2,128], index: 6, kind: input, shape index: {}]   ;;  %s5873_s7 = inlined_call_operand.hbm [shape: f32[2,1,128], index: 7, kind: output, shape index: {}]  }
   0x1 LB: > { %s4718_s25 = sadd.s32 4294967295, %s4661_s24   ;;  %p3685_p0 = scmp.ge.s32.totalorder %s4661_s24, 1  ;;  %s4661_s24 = sphi %s4712_s24, %s18_s24  }
   0x2   : > { %p273_p1 = scmp.lt.s32.totalorder %s4661_s24, 5 }
   0x4   : > { %p274_p2 = pnand %p3685_p0, %p273_p1 }
   0x5   : > { %p320_p3 = scmp.lt.s32.totalorder (!%p274_p2), %s4718_s25, 3  ;;  %p3695_p4 = scmp.ne.s32.totalorder (!%p274_p2), %s4718_s25, 0 }
   0x6   : > { %277 = sbr.rel (%p274_p2) target bundleno = 3561 (0xde9), region = 48 }
   0xd   : > { %s321_s26 = scalar_select %p320_p3, %s4718_s25, 3 }
   0xe   : > { %349 = sbr.rel (%p3695_p4) target bundleno = 21 (0x15), region = 52  ;;  %v350_v0 = vld [vmem:[%s5866_s0] sm:$0xff] (!%p3695_p4)  ;;  %v351_v1 = vld [vmem:[%s5866_s0 + $0x8] sm:$0xff] (!%p3695_p4)  ;;  %v352_v2 = vld [vmem:[%s5866_s0 + $0x10] sm:$0xff] (!%p3695_p4) }
   0xf   : > { %s4195_s27 = smul.u32 192, %s321_s26  ;;  %s3829_s28 = sshll.u32 %s321_s26, 6  ;;  %356 = vst [vmem:[#allocation2] sm:$0xff] (!%p3695_p4), %v350_v0  ;;  %357 = vst [vmem:[#allocation2 + $0x8] sm:$0xff] (!%p3695_p4), %v351_v1  ;;  %v353_v3 = vld [vmem:[%s5866_s0 + $0x18] sm:$0xff] (!%p3695_p4)  ;;  %v354_v4 = vld [vmem:[%s5866_s0 + $0x20] sm:$0xff] (!%p3695_p4) }
  0x10   : > { %s4727_s8 = scalar_lea.vmem %s5868_s2, %s3829_s28  ;;  %s3830_s9 = sshll.u32 %s321_s26, 8  ;;  %358 = vst [vmem:[#allocation2 + $0x10] sm:$0xff] (!%p3695_p4), %v352_v2  ;;  %v355_v5 = vld [vmem:[%s5866_s0 + $0x28] sm:$0xff] (!%p3695_p4)  ;;  %359 = vst [vmem:[#allocation2 + $0x18] sm:$0xff] (!%p3695_p4), %v353_v3 }
  0x11   : > { %s4732_s12 = scalar_lea.vmem %s5867_s1, %s4195_s27  ;;  %s4737_s15 = scalar_lea.vmem %s5869_s3, %s3830_s9  ;;  %360 = vst [vmem:[#allocation2 + $0x20] sm:$0xff] (!%p3695_p4), %v354_v4  ;;  %361 = vst [vmem:[#allocation2 + $0x28] sm:$0xff] (!%p3695_p4), %v355_v5 }
  0x12   : > { %s4742_s18 = scalar_lea.vmem %s5870_s4, %s3830_s9  ;;  %s3832_s19 = sshll.u32 %s321_s26, 4 }
  0x13   : > { %s4747_s22 = scalar_lea.vmem %s5871_s5, %s3832_s19 }
  0x15 PF: > { %v4324_v10 = vld [vmem:[%s4732_s12 + $0x4] ss:$12 sps:$4 sm:$0xff]   ;;  %v4326_v11 = vld [vmem:[%s4732_s12] ss:$12 sps:$4 sm:$0xff]   ;;  %v4663_v12 = vmov 0.0   ;;  %v4664_v53 = vmov 0   ;;  %v444_v59 = vlaneseq }
  0x16   : > { %v371_v6 = vld [vmem:[#allocation2] sm:$0xff]  ;;  %v372_v8 = vld [vmem:[#allocation2 + $0x8] sm:$0xff]  ;;  %3987 = vmatprep.subr.bf16.mxu1 %v4663_v12  ;;  %627 = vmatprep.subr.bf16.mxu0 %v4324_v10  ;;  %v4334_v36 = vld [vmem:[%s4732_s12 + $0x30] ss:$12 sps:$4 sm:$0xff]   ;;  %vm4665_vm0 = vmmov 0   ;;  %vm905_vm1 = vcmask 261120  }
  0x17   : > { %v373_v7 = vld [vmem:[#allocation2 + $0x10] sm:$0xff]  ;;  %377 = vadd.xlane.f32.xlu0 %v371_v6  ;;  %v374_v9 = vld [vmem:[#allocation2 + $0x18] sm:$0xff]  ;;  %628 = vmatpush1.bf16.msra.mxu0 %v4326_v11  ;;  %v4331_v34 = vld [vmem:[%s4732_s12 + $0x20] ss:$12 sps:$4 sm:$0xff]   ;;  %v4826_v2 = vshrl.u32 %v444_v59, 7  ;;  %s4667_s17 = smov 32  }
  0x18   : > { %381 = vadd.xlane.f32.xlu1 %v373_v7  ;;  %v4327_v13 = vld [vmem:[%s4732_s12 + $0x8] ss:$12 sps:$4 sm:$0xff]   ;;  %v4790_v31 = vld [vmem:[#allocation2 + $0x20] sm:$0xff]  ;;  %v4336_v38 = vld [vmem:[%s4732_s12 + $0x4c] ss:$12 sps:$4 sm:$0xff]   ;;  %659 = vmatprep.mubr.bf16.mxu0 %v4664_v53  ;;  %s4668_s19 = smov 64  }
  0x19   : > { %v4328_v14 = vld [vmem:[%s4732_s12 + $0x1c] ss:$12 sps:$4 sm:$0xff]   ;;  %3988 = vmatpush3.bf16.msra.mxu1 %v4327_v13  ;;  %v4330_v33 = vld [vmem:[%s4732_s12 + $0x18] ss:$12 sps:$4 sm:$0xff]   ;;  %v4332_v35 = vld [vmem:[%s4732_s12 + $0x34] ss:$12 sps:$4 sm:$0xff]   ;;  %4003 = vmatprep.mubr.msk.bf16.mxu1 %vm4665_vm0, %v4663_v12 }
  0x1a   : > { %629 = vmatprep.subr.bf16.mxu0 %v4328_v14  ;;  %3989 = vmatprep.subr.bf16.mxu1 %v4663_v12  ;;  %v4793_v32 = vld [vmem:[#allocation2 + $0x28] sm:$0xff]  ;;  %v4335_v37 = vld [vmem:[%s4732_s12 + $0x38] ss:$12 sps:$4 sm:$0xff]   ;;  %v4339_v40 = vld [vmem:[%s4732_s12 + $0x50] ss:$12 sps:$4 sm:$0xff]   ;;  %vm1308_vm2 = vcmask 1043456  }
  0x1b   : > { %379 = vadd.xlane.f32.xlu0 %v372_v8  ;;  %630 = vmatpush1.bf16.msra.mxu0 %v4330_v33  ;;  %v4338_v39 = vld [vmem:[%s4732_s12 + $0x48] ss:$12 sps:$4 sm:$0xff]   ;;  %v4340_v41 = vld [vmem:[%s4732_s12 + $0x64] ss:$12 sps:$4 sm:$0xff]   ;;  %v4342_v42 = vld [vmem:[%s4732_s12 + $0x60] ss:$12 sps:$4 sm:$0xff]  }
  0x1c   : > { %383 = vadd.xlane.f32.xlu1 %v374_v9  ;;  %631 = vmatprep.subr.bf16.mxu0 %v4332_v35  ;;  %v4343_v43 = vld [vmem:[%s4732_s12 + $0x68] ss:$12 sps:$4 sm:$0xff]   ;;  %v4346_v45 = vld [vmem:[%s4732_s12 + $0x78] ss:$12 sps:$4 sm:$0xff]   ;;  %v4347_v46 = vld [vmem:[%s4732_s12 + $0x80] ss:$12 sps:$4 sm:$0xff]  }
  0x1d   : > { %3990 = vmatpush3.bf16.msra.mxu1 %v4331_v34  ;;  %v4344_v44 = vld [vmem:[%s4732_s12 + $0x7c] ss:$12 sps:$4 sm:$0xff]   ;;  %v4348_v47 = vld [vmem:[%s4732_s12 + $0x94] ss:$12 sps:$4 sm:$0xff]   ;;  %v4351_v49 = vld [vmem:[%s4732_s12 + $0x98] ss:$12 sps:$4 sm:$0xff]  }
  0x1e   : > { %3991 = vmatprep.subr.bf16.mxu1 %v4663_v12  ;;  %v4350_v48 = vld [vmem:[%s4732_s12 + $0x90] ss:$12 sps:$4 sm:$0xff]   ;;  %v4352_v50 = vld [vmem:[%s4732_s12 + $0xac] ss:$12 sps:$4 sm:$0xff]   ;;  %v4354_v51 = vld [vmem:[%s4732_s12 + $0xa8] ss:$12 sps:$4 sm:$0xff]  }
  0x1f   : > { %632 = vmatpush1.bf16.msra.mxu0 %v4334_v36  ;;  %v4355_v52 = vld [vmem:[%s4732_s12 + $0xb0] ss:$12 sps:$4 sm:$0xff]   ;;  %v362_v11 = vld [vmem:[%s4747_s22] sm:$0xff]  ;;  %s4666_s12 = smov 96   ;;  %vm1161_vm4 = vcmask 195584   ;;  %vm1570_vm5 = vcmask 523264  }
  0x20   : > { %633 = vmatprep.subr.bf16.mxu0 %v4336_v38  ;;  %vm1574_vm6 = vcmask 785408   ;;  %p3824_p5 = scmp.ne.s32.totalorder %s4718_s25, 3 }
  0x21   : > { %3992 = vmatpush3.bf16.msra.mxu1 %v4335_v37  ;;  %vm3552_vm7 = vcmask (!%p3824_p5), 1040384  }
  0x22   : > { %3993 = vmatprep.subr.bf16.mxu1 %v4663_v12 }
  0x23   : > { %634 = vmatpush1.bf16.msra.mxu0 %v4338_v39 }
  0x24   : > { %635 = vmatprep.subr.bf16.mxu0 %v4340_v41 }
  0x25   : > { %3994 = vmatpush3.bf16.msra.mxu1 %v4339_v40 }
  0x26   : > { %3995 = vmatprep.subr.bf16.mxu1 %v4663_v12 }
  0x27   : > { %636 = vmatpush1.bf16.msra.mxu0 %v4342_v42 }
  0x28   : > { %637 = vmatprep.subr.bf16.mxu0 %v4344_v44 }
  0x29   : > { %3996 = vmatpush3.bf16.msra.mxu1 %v4343_v43 }
  0x2a   : > { %3997 = vmatprep.subr.bf16.mxu1 %v4663_v12 }
  0x2b   : > { %638 = vmatpush1.bf16.msra.mxu0 %v4346_v45 }
  0x2c   : > { %639 = vmatprep.subr.bf16.mxu0 %v4348_v47 }
  0x2d   : > { %3998 = vmatpush3.bf16.msra.mxu1 %v4347_v46 }
  0x2e   : > { %3999 = vmatprep.subr.bf16.mxu1 %v4663_v12 }
  0x2f   : > { %640 = vmatpush1.bf16.msra.mxu0 %v4350_v48 }
  0x30   : > { %641 = vmatprep.subr.bf16.mxu0 %v4352_v50 }
  0x31   : > { %4000 = vmatpush3.bf16.msra.mxu1 %v4351_v49 }
  0x32   : > { %4001 = vmatprep.subr.bf16.mxu1 %v4663_v12 }
  0x33   : > { %642 = vmatpush1.bf16.msra.mxu0 %v4354_v51  ;;  %v749_v51 = vsub.s32 6, %v4826_v2 }
  0x35   : > { %4002 = vmatpush3.bf16.msra.mxu1 %v4355_v52  ;;  %v363_v52 = vld [vmem:[%s4747_s22 + $0x8] sm:$0xff] }
  0xa4   : > { %v378_v15 = vpop.xlane.xlu0 %377 }
  0xa5   : > { %v382_v16 = vpop.xlane.xlu1 %381  ;;  %v390_v17 = vmul.f32 0.0078125, %v378_v15 }
  0xa6   : > { %v392_v18 = vmul.f32 0.0078125, %v382_v16 }
  0xa7   : > { %v4774_v19 = vsub.f32 %v371_v6, %v390_v17  ;;  %v4834_v17 = vsub.s32 1, %v4826_v2 }
  0xa8   : > { %v4776_v20 = vsub.f32 %v373_v7, %v392_v18  ;;  %v380_v21 = vpop.xlane.xlu0 %379 }
  0xa9   : > { %v384_v22 = vpop.xlane.xlu1 %383  ;;  %v391_v23 = vmul.f32 0.0078125, %v380_v21  ;;  %v402_v24 = vmul.f32 %v4774_v19, %v4774_v19 }
  0xaa   : > { %v393_v25 = vmul.f32 0.0078125, %v384_v22  ;;  %v404_v26 = vmul.f32 %v4776_v20, %v4776_v20 }
  0xab   : > { %408 = vadd.xlane.f32.xlu0 %v402_v24  ;;  %v4782_v27 = vsub.f32 %v372_v8, %v391_v23  ;;  %v446_v8 = vsub.s32 0, %v4826_v2  ;;  %v457_v24 = vrot.slane %v362_v11, %v4834_v17 }
  0xac   : > { %v4784_v28 = vsub.f32 %v374_v9, %v393_v25 }
  0xad   : > { %v403_v29 = vmul.f32 %v4782_v27, %v4782_v27  ;;  %v447_v16 = vrot.slane %v362_v11, %v446_v8 }
  0xae   : > { %v405_v30 = vmul.f32 %v4784_v28, %v4784_v28 }
  0xaf   : > { %412 = vadd.xlane.f32.xlu0 %v404_v26  ;;  %410 = vadd.xlane.f32.xlu1 %v403_v29 }
  0xb3   : > { %414 = vadd.xlane.f32.xlu1 %v405_v30  ;;  %385 = vadd.xlane.f32.xlu0 %v4790_v31 }
  0xb7   : > { %387 = vadd.xlane.f32.xlu1 %v4793_v32 }
 0x138   : > { %v409_v54 = vpop.xlane.xlu0 %408 }
 0x139   : > { %v420_v55 = vmul.f32 0.0078125, %v409_v54  ;;  %v759_v54 = vsub.s32 7, %v4826_v2 }
 0x13b   : > { %v426_v56 = vadd.f32 1e-06, %v420_v55  ;;  %v4849_v55 = vrot.slane %v362_v11, %v749_v51 }
 0x13c   : > { %v411_v57 = vpop.xlane.xlu1 %410  ;;  %v413_v58 = vpop.xlane.xlu0 %412 }
 0x13d   : > { %4444 = vrsqrt.f32 %v426_v56  ;;  %v421_v60 = vmul.f32 0.0078125, %v411_v57  ;;  %v422_v61 = vmul.f32 0.0078125, %v413_v58  ;;  %v4851_v56 = vrot.slane %v363_v52, %v446_v8 }
 0x13f   : > { %v427_v62 = vadd.f32 1e-06, %v421_v60  ;;  %v428_v63 = vadd.f32 1e-06, %v422_v61  ;;  %v4853_v60 = vrot.slane %v362_v11, %v759_v54 }
 0x140   : > { %v415_v0 = vpop.xlane.xlu1 %414  ;;  %v386_v1 = vpop.xlane.xlu0 %385 }
 0x141   : > { %4446 = vrsqrt.f32 %v427_v62  ;;  %v423_v3 = vmul.f32 0.0078125, %v415_v0  ;;  %v394_v4 = vmul.f32 0.0078125, %v386_v1 }
 0x142   : > { %4448 = vrsqrt.f32 %v428_v63 }
 0x143   : > { %v429_v5 = vadd.f32 1e-06, %v423_v3  ;;  %v400_v6 = vsub.f32 %v4790_v31, %v394_v4 }
 0x144   : > { %v388_v7 = vpop.xlane.xlu1 %387 }
 0x145   : > { %4450 = vrsqrt.f32 %v429_v5  ;;  %v395_v9 = vmul.f32 0.0078125, %v388_v7  ;;  %v406_v10 = vmul.f32 %v400_v6, %v400_v6 }
 0x147   : > { %v4445_v13 = vpop.eup %4444  ;;  %v401_v14 = vsub.f32 %v4793_v32, %v395_v9  ;;  %416 = vadd.xlane.f32.xlu0 %v406_v10 }
 0x148   : > { %v438_v15 = vmul.f32 %v4445_v13, %v4774_v19 }
 0x149   : > { %v407_v18 = vmul.f32 %v401_v14, %v401_v14 }
 0x14a   : > { %v448_v23 = vmul.f32 %v447_v16, %v438_v15 }
 0x14b   : > { %v4447_v21 = vpop.eup %4446  ;;  %418 = vadd.xlane.f32.xlu1 %v407_v18 }
 0x14c   : > { %v439_v22 = vmul.f32 %v4447_v21, %v4782_v27  ;;  %v4449_v25 = vpop.eup %4448  ;;  %v458_v30 = vadd.f32 %v457_v24, %v448_v23 }
 0x14d   : > { %v440_v32 = vmul.f32 %v4449_v25, %v4776_v20 }
 0x14e   : > { %v449_v26 = vmul.f32 %v447_v16, %v439_v22 }
 0x14f   : > { %v4451_v29 = vpop.eup %4450  ;;  %v450_v35 = vmul.f32 %v447_v16, %v440_v32 }
 0x150   : > { %v459_v31 = vadd.f32 %v457_v24, %v449_v26  ;;  %v441_v19 = vmul.f32 %v4451_v29, %v4784_v28 }
 0x151   : > { %v460_v36 = vadd.f32 %v457_v24, %v450_v35 }
 0x152   : > { %v464_v33 = vpack.c.bf16 %v459_v31, %v458_v30  ;;  %v451_v34 = vmul.f32 %v447_v16, %v441_v19 }
 0x154   : > { %660 = vmatmul.mubr.bf16.vlgmr.msra.gmra.mrb[0].mxu0 %v464_v33  ;;  %4004 = vmatmul.mubr.bf16.vlgmr.msra.gmra.mrb[0].mxu1 %v464_v33  ;;  %v461_v27 = vadd.f32 %v457_v24, %v451_v34 }
 0x155   : > { %669 = vmatprep.mubr.bf16.mxu0 %v4664_v53  ;;  %4007 = vmatprep.mubr.msk.bf16.mxu1 %vm4665_vm0, %v4663_v12 }
 0x156   : > { %v465_v37 = vpack.c.bf16 %v461_v27, %v460_v36 }
 0x15c   : > { %670 = vmatmul.mubr.bf16.gmra.mrb[4].mxu0 %v465_v37  ;;  %4008 = vmatmul.mubr.bf16.gmra.mrb[4].mxu1 %v465_v37 }
 0x15d   : > { %679 = vmatprep.mubr.bf16.mxu0 %v4664_v53  ;;  %4011 = vmatprep.mubr.msk.bf16.mxu1 %vm4665_vm0, %v4663_v12 }
 0x1d4   : > { %v417_v20 = vpop.xlane.xlu0 %416 }
 0x1d5   : > { %v424_v28 = vmul.f32 0.0078125, %v417_v20 }
 0x1d7   : > { %v430_v38 = vadd.f32 1e-06, %v424_v28 }
 0x1d8   : > { %v419_v39 = vpop.xlane.xlu1 %418 }
 0x1d9   : > { %v425_v40 = vmul.f32 0.0078125, %v419_v39  ;;  %4452 = vrsqrt.f32 %v430_v38 }
 0x1db   : > { %v431_v41 = vadd.f32 1e-06, %v425_v40 }
 0x1dd   : > { %4454 = vrsqrt.f32 %v431_v41 }
 0x1e3   : > { %v4453_v42 = vpop.eup %4452 }
 0x1e4   : > { %v442_v43 = vmul.f32 %v4453_v42, %v400_v6 }
 0x1e6   : > { %v452_v44 = vmul.f32 %v447_v16, %v442_v43 }
 0x1e7   : > { %v4455_v45 = vpop.eup %4454 }
 0x1e8   : > { %v443_v46 = vmul.f32 %v4455_v45, %v401_v14  ;;  %v462_v48 = vadd.f32 %v457_v24, %v452_v44 }
 0x1ea   : > { %v453_v47 = vmul.f32 %v447_v16, %v443_v46 }
 0x1ec   : > { %v463_v49 = vadd.f32 %v457_v24, %v453_v47 }
 0x1ee   : > { %v466_v50 = vpack.c.bf16 %v463_v49, %v462_v48 }
 0x1f0   : > { %680 = vmatmul.mubr.bf16.gmra.mrb[8].mxu0 %v466_v50  ;;  %4012 = vmatmul.mubr.bf16.gmra.mrb[8].mxu1 %v466_v50 }
 0x227   : > { %v661_v57 = vpop.f32.mrb[0].mxu0  ;;  %v724_v58 = vpop.f32.mrb[0].mxu1 }
 0x228   : > { %v751_v61 = vadd.f32 %v4849_v55, %v661_v57  ;;  %v663_v62 = vpop.f32.mrb[1].mxu0  ;;  %v4005_v63 = vpop.f32.mrb[1].mxu1  ;;  %v771_v3 = vadd.f32 %v4851_v56, %v724_v58 }
 0x229   : > { %v665_v0 = vpop.f32.mrb[2].mxu0  ;;  %v727_v1 = vpop.f32.mrb[2].mxu1  ;;  %v761_v9 = vadd.f32 %v4853_v60, %v663_v62 }
 0x22a   : > { %v752_v4 = vadd.f32 %v4849_v55, %v665_v0  ;;  %v772_v5 = vadd.f32 %v4851_v56, %v727_v1  ;;  %v4006_v6 = vpop.f32.mrb[3].mxu1  ;;  %782 = vrot.lane.b32.xlu1 %v751_v61, %s4666_s12  ;;  %v667_v7 = vpop.f32.mrb[3].mxu0  ;;  %v809_v8 = vmul.f32 0.17677669, %v751_v61 }
 0x22b   : > { %v762_v10 = vadd.f32 %v4853_v60, %v667_v7 }
 0x22c   : > { %v810_v11 = vmul.f32 0.17677669, %v752_v4  ;;  %v4862_v13 = vpack.c.bf16 %v772_v5, %v771_v3  ;;  %v4864_v14 = vpack.i.bf16 %v772_v5, %v771_v3 }
 0x22d   : > { %v4219_v15 = vpack.i.bf16 %v762_v10, %v761_v9  ;;  %v859_v16 = vpack.c.bf16 %v762_v10, %v761_v9 }
 0x22e   : > { %v821_v18 = vpack.c.bf16 %v810_v11, %v809_v8 }
 0x22f   : > { %v4866_v21 = vpop.f32.mrb[4].mxu1  ;;  %4220 = vrot.lane.b32.xlu0 %v4219_v15, %s4666_s12  ;;  %v671_v22 = vpop.f32.mrb[4].mxu0  ;;  %4171 = vmatprep.subr.msk.bf16.mxu1 %vm905_vm1, %v859_v16  ;;  %v913_v23 = vsel %vm905_vm1, %v859_v16, 0 }
 0x230   : > { %v753_v24 = vadd.f32 %v4849_v55, %v671_v22  ;;  %v673_v25 = vpop.f32.mrb[5].mxu0  ;;  %v4009_v26 = vpop.f32.mrb[5].mxu1  ;;  %4016 = vmatpush3.bf16.xpose.msra.mxu1 %v913_v23  ;;  %4019 = vmatprep.mubr.msk.bf16.mxu1 %vm905_vm1, %v821_v18 }
 0x231   : > { %v763_v29 = vadd.f32 %v4853_v60, %v673_v25  ;;  %v4874_v30 = vpop.f32.mrb[6].mxu0  ;;  %v4876_v31 = vpop.f32.mrb[6].mxu1 }
 0x232   : > { %v4878_v32 = vpop.f32.mrb[7].mxu0  ;;  %v4010_v19 = vpop.f32.mrb[7].mxu1  ;;  %v811_v35 = vmul.f32 0.17677669, %v753_v24 }
 0x233   : > { %786 = vrot.lane.b32.xlu0 %v753_v24, %s4666_s12  ;;  %836 = vrot.lane.b32.xlu1 %v763_v29, %s4666_s12  ;;  %v860_v33 = vpack.c.bf16 %v763_v29, %v763_v29 }
 0x234   : > { %v822_v27 = vpack.c.bf16 %v811_v35, %v811_v35 }
 0x235   : > { %4172 = vmatprep.subr.msk.bf16.mxu1 %vm905_vm1, %v860_v33  ;;  %v916_v34 = vsel %vm905_vm1, %v860_v33, 0 }
 0x237   : > { %4230 = vrot.lane.b32.xlu0 %v4219_v15, %s4667_s17  ;;  %784 = vrot.lane.b32.xlu1 %v752_v4, %s4666_s12 }
 0x238   : > { %4018 = vmatpush3.bf16.xpose.msra.mxu1 %v916_v34 }
 0x23b   : > { %793 = vrot.lane.b32.xlu0 %v752_v4, %s4668_s19  ;;  %4225 = vrot.lane.b32.xlu1 %v4219_v15, %s4668_s19 }
 0x23f   : > { %854 = vrot.lane.b32.xlu0 %v763_v29, %s4667_s17  ;;  %791 = vrot.lane.b32.xlu1 %v751_v61, %s4668_s19 }
 0x240   : > { %4020 = vmatmul.mubr.msk.bf16.vlgmr.msra.gmra.mrb[12].mxu1 %vm905_vm1, %v822_v27 }
 0x243   : > { %800 = vrot.lane.b32.xlu0 %v751_v61, %s4667_s17  ;;  %845 = vrot.lane.b32.xlu1 %v763_v29, %s4668_s19 }
 0x247   : > { %804 = vrot.lane.b32.xlu0 %v753_v24, %s4667_s17  ;;  %795 = vrot.lane.b32.xlu1 %v753_v24, %s4668_s19  ;;  %v4913_v24 = vadd.f32 %v4851_v56, %v4866_v21  ;;  %v774_v21 = vadd.f32 %v4851_v56, %v4876_v31 }
 0x249   : > { %v898_v35 = vpack.c.bf16 %v4913_v24, %v4913_v24 }
 0x24b   : > { %802 = vrot.lane.b32.xlu1 %v752_v4, %s4667_s17 }
 0x29c   : > { %v783_v36 = vpop.permute.xlu1 %782 }
 0x29d   : > { %v812_v45 = vmul.f32 0.17677669, %v783_v36 }
 0x2a1   : > { %v4221_v37 = vpop.permute.xlu0 %4220 }
 0x2a2   : > { %v4223_v20 = vunpack.i.h.bf16 %v4221_v37  ;;  %v4222_v28 = vunpack.i.l.bf16 %v4221_v37 }
 0x2a4   : > { %v861_v38 = vpack.c.bf16 %v4223_v20, %v4222_v28 }
 0x2a5   : > { %v787_v39 = vpop.permute.xlu0 %786  ;;  %v837_v40 = vpop.permute.xlu1 %836 }
 0x2a6   : > { %v862_v41 = vpack.c.bf16 %v837_v40, %v837_v40  ;;  %4173 = vmatprep.subr.msk.bf16.mxu1 %vm905_vm1, %v861_v38  ;;  %v973_v42 = vsel %vm905_vm1, %v861_v38, 0  ;;  %v814_v61 = vmul.f32 0.17677669, %v787_v39  ;;  %v764_v39 = vadd.f32 %v4853_v60, %v4878_v32 }
 0x2a7   : > { %4024 = vmatpush3.bf16.xpose.msra.mxu1 %v973_v42 }
 0x2a8   : > { %4174 = vmatprep.subr.msk.bf16.mxu1 %vm905_vm1, %v862_v41  ;;  %v976_v58 = vsel %vm905_vm1, %v862_v41, 0  ;;  %v824_v5 = vpack.c.bf16 %v814_v61, %v814_v61 }
 0x2a9   : > { %v4231_v43 = vpop.permute.xlu0 %4230  ;;  %v785_v44 = vpop.permute.xlu1 %784 }
 0x2aa   : > { %v4233_v46 = vunpack.i.h.bf16 %v4231_v43  ;;  %v4232_v47 = vunpack.i.l.bf16 %v4231_v43  ;;  %v813_v48 = vmul.f32 0.17677669, %v785_v44 }
 0x2ac   : > { %v823_v49 = vpack.c.bf16 %v813_v48, %v812_v45  ;;  %v865_v52 = vpack.c.bf16 %v4233_v46, %v4232_v47  ;;  %v4947_v47 = vand.u32 127, %v444_v59 }
 0x2ad   : > { %v794_v50 = vpop.permute.xlu0 %793  ;;  %v4226_v51 = vpop.permute.xlu1 %4225 }
 0x2ae   : > { %v4228_v54 = vunpack.i.h.bf16 %v4226_v51  ;;  %v4227_v57 = vunpack.i.l.bf16 %v4226_v51  ;;  %4027 = vmatprep.mubr.msk.bf16.mxu1 %vm905_vm1, %v823_v49  ;;  %v816_v1 = vmul.f32 0.17677669, %v794_v50  ;;  %v1093_v10 = vsel %vm905_vm1, %v865_v52, 0 }
 0x2af   : > { %4026 = vmatpush3.bf16.xpose.msra.mxu1 %v976_v58  ;;  %vm1146_vm3 = vcmp.lt.s32.totalorder %v4947_v47, 17 }
 0x2b0   : > { %v863_v62 = vpack.c.bf16 %v4228_v54, %v4227_v57  ;;  %4177 = vmatprep.subr.msk.bf16.mxu1 %vm905_vm1, %v865_v52 }
 0x2b1   : > { %v855_v63 = vpop.permute.xlu0 %854  ;;  %v792_v0 = vpop.permute.xlu1 %791 }
 0x2b2   : > { %v815_v3 = vmul.f32 0.17677669, %v792_v0  ;;  %4175 = vmatprep.subr.msk.bf16.mxu0 %vm905_vm1, %v863_v62  ;;  %v1033_v4 = vsel %vm905_vm1, %v863_v62, 0  ;;  %v866_v8 = vpack.c.bf16 %v855_v63, %v855_v63 }
 0x2b3   : > { %4032 = vmatpush3.bf16.xpose.msra.mxu0 %v1033_v4 }
 0x2b4   : > { %v825_v6 = vpack.c.bf16 %v816_v1, %v815_v3  ;;  %v1096_v29 = vsel %vm905_vm1, %v866_v8, 0 }
 0x2b5   : > { %v846_v7 = vpop.permute.xlu1 %845  ;;  %v801_v11 = vpop.permute.xlu0 %800 }
 0x2b6   : > { %v864_v9 = vpack.c.bf16 %v846_v7, %v846_v7  ;;  %4028 = vmatmul.mubr.msk.bf16.vlgmr.msra.gmra.mrb[16].mxu1 %vm905_vm1, %v824_v5  ;;  %4035 = vmatprep.mubr.msk.bf16.mxu0 %vm905_vm1, %v825_v6  ;;  %v818_v25 = vmul.f32 0.17677669, %v801_v11 }
 0x2b7   : > { %4040 = vmatpush3.bf16.xpose.msra.mxu1 %v1093_v10 }
 0x2b8   : > { %4176 = vmatprep.subr.msk.bf16.mxu0 %vm905_vm1, %v864_v9  ;;  %4178 = vmatprep.subr.msk.bf16.mxu1 %vm905_vm1, %v866_v8  ;;  %v1036_v16 = vsel %vm905_vm1, %v864_v9, 0 }
 0x2b9   : > { %v796_v15 = vpop.permute.xlu1 %795  ;;  %v805_v22 = vpop.permute.xlu0 %804 }
 0x2ba   : > { %v817_v18 = vmul.f32 0.17677669, %v796_v15  ;;  %v820_v19 = vmul.f32 0.17677669, %v805_v22 }
 0x2bb   : > { %4034 = vmatpush3.bf16.xpose.msra.mxu0 %v1036_v16 }
 0x2bc   : > { %4047 = vmatprep.subr.bf16.mxu0 %v4862_v13  ;;  %v826_v33 = vpack.c.bf16 %v817_v18, %v817_v18  ;;  %v828_v37 = vpack.c.bf16 %v820_v19, %v820_v19 }
 0x2bd   : > { %v803_v23 = vpop.permute.xlu1 %802 }
 0x2be   : > { %v819_v26 = vmul.f32 0.17677669, %v803_v23 }
 0x2bf   : > { %4042 = vmatpush3.bf16.xpose.msra.mxu1 %v1096_v29 }
 0x2c0   : > { %v827_v34 = vpack.c.bf16 %v819_v26, %v818_v25 }
 0x2c2   : > { %4036 = vmatmul.mubr.msk.bf16.vlgmr.msra.gmra.mrb[12].mxu0 %vm905_vm1, %v826_v33  ;;  %4043 = vmatprep.mubr.msk.bf16.mxu1 %vm905_vm1, %v827_v34 }
 0x2c3   : > { %v4920_v27 = vpop.f32.mrb[8].mxu0  ;;  %v740_v36 = vpop.f32.mrb[8].mxu1  ;;  %4048 = vmatpush3.bf16.msra.mxu0 %v4862_v13  ;;  %v1310_v13 = vsel %vm1308_vm2, %v898_v35, 0 }
 0x2c4   : > { %v775_v20 = vadd.f32 %v4851_v56, %v740_v36  ;;  %v683_v28 = vpop.f32.mrb[9].mxu0  ;;  %4179 = vmatprep.subr.msk.bf16.mxu0 %vm1308_vm2, %v898_v35  ;;  %v4013_v38 = vpop.f32.mrb[9].mxu1 }
 0x2c5   : > { %v765_v40 = vadd.f32 %v4853_v60, %v683_v28  ;;  %v4930_v41 = vpop.f32.mrb[10].mxu0  ;;  %v4932_v42 = vpop.f32.mrb[10].mxu1 }
 0x2c6   : > { %4044 = vmatmul.mubr.msk.bf16.vlgmr.msra.gmra.mrb[20].mxu1 %vm905_vm1, %v828_v37  ;;  %v4936_v31 = vpop.f32.mrb[11].mxu0  ;;  %v4014_v43 = vpop.f32.mrb[11].mxu1  ;;  %v4938_v44 = vpack.c.bf16 %v775_v20, %v774_v21  ;;  %v4944_v32 = vpack.i.bf16 %v775_v20, %v774_v21 }
 0x2c7   : > { %4050 = vmatpush3.bf16.msra.mxu0 %v1310_v13  ;;  %v4940_v45 = vpack.i.bf16 %v765_v40, %v764_v39  ;;  %v4942_v46 = vpack.c.bf16 %v765_v40, %v764_v39 }
 0x313   : > { %v4021_v48 = vpop.f32.mrb[12].mxu1 }
 0x314   : > { %v4952_v49 = vsel %vm1146_vm3, %v4021_v48, -1e+30  ;;  %v952_v50 = vpop.f32.mrb[13].mxu1 }
 0x315   : > { %v4956_v51 = vsel %vm1146_vm3, %v952_v50, -1e+30  ;;  %v4022_v52 = vpop.f32.mrb[14].mxu1  ;;  %v1168_v54 = vsel %vm1161_vm4, %v4952_v49, -inf }
 0x316   : > { %1169 = vmax.xlane.f32.xlu0 %v1168_v54  ;;  %v955_v59 = vpop.f32.mrb[15].mxu1  ;;  %v1162_v57 = vsel %vm1161_vm4, %v4956_v51, -inf }
 0x317   : > { %v1150_v58 = vsel %vm1146_vm3, %v955_v59, -1e+30  ;;  %1163 = vmax.xlane.f32.xlu1 %v1162_v57 }
 0x318   : > { %v1165_v61 = vsel %vm1161_vm4, %v1150_v58, -inf }
 0x31a   : > { %1166 = vmax.xlane.f32.xlu0 %v1165_v61 }
 0x389   : > { %v4029_v62 = vpop.f32.mrb[16].mxu1 }
 0x38a   : > { %v1012_v63 = vpop.f32.mrb[17].mxu1  ;;  %v4973_v5 = vsel %vm1146_vm3, %v4029_v62, -1e+30 }
 0x38b   : > { %v4967_v0 = vsel %vm1146_vm3, %v1012_v63, -1e+30  ;;  %v4030_v1 = vpop.f32.mrb[18].mxu1  ;;  %v1177_v6 = vsel %vm1161_vm4, %v4973_v5, -inf }
 0x38c   : > { %v1015_v3 = vpop.f32.mrb[19].mxu1  ;;  %v1171_v4 = vsel %vm1161_vm4, %v4967_v0, -inf }
 0x38d   : > { %1172 = vmax.xlane.f32.xlu0 %v1171_v4  ;;  %v5001_v33 = vsel %vm1146_vm3, %v1015_v3, -1e+30 }
 0x38e   : > { %v1174_v21 = vsel %vm1161_vm4, %v5001_v33, -inf }
 0x391   : > { %1178 = vmax.xlane.f32.xlu0 %v1177_v6 }
 0x395   : > { %v4037_v7 = vpop.f32.mrb[12].mxu0 }
 0x396   : > { %v4979_v8 = vsel %vm1146_vm3, %v4037_v7, -1e+30  ;;  %v1072_v9 = vpop.f32.mrb[13].mxu0 }
 0x397   : > { %v4038_v10 = vpop.f32.mrb[14].mxu0  ;;  %v1186_v11 = vsel %vm1161_vm4, %v4979_v8, -inf  ;;  %v4985_v15 = vsel %vm1146_vm3, %v1072_v9, -1e+30 }
 0x398   : > { %1187 = vmax.xlane.f32.xlu1 %v1186_v11  ;;  %v1075_v16 = vpop.f32.mrb[15].mxu0  ;;  %v1180_v19 = vsel %vm1161_vm4, %v4985_v15, -inf }
 0x399   : > { %v4989_v18 = vsel %vm1146_vm3, %v1075_v16, -1e+30  ;;  %v4045_v22 = vpop.f32.mrb[20].mxu1 }
 0x39a   : > { %v1132_v23 = vpop.f32.mrb[21].mxu1  ;;  %v1183_v25 = vsel %vm1161_vm4, %v4989_v18, -inf  ;;  %v5007_v36 = vsel %vm1146_vm3, %v4045_v22, -1e+30 }
 0x39b   : > { %v4995_v26 = vsel %vm1146_vm3, %v1132_v23, -1e+30  ;;  %v4046_v29 = vpop.f32.mrb[22].mxu1  ;;  %1184 = vmax.xlane.f32.xlu0 %v1183_v25  ;;  %v1195_v37 = vsel %vm1161_vm4, %v5007_v36, -inf }
 0x39c   : > { %v1135_v34 = vpop.f32.mrb[23].mxu1  ;;  %1181 = vmax.xlane.f32.xlu1 %v1180_v19  ;;  %v1189_v35 = vsel %vm1161_vm4, %v4995_v26, -inf }
 0x39d   : > { %v5027_v43 = vsel %vm1146_vm3, %v1135_v34, -1e+30 }
 0x39f   : > { %1190 = vmax.xlane.f32.xlu0 %v1189_v35 }
 0x3a0   : > { %1175 = vmax.xlane.f32.xlu1 %v1174_v21 }
 0x3a3   : > { %1196 = vmax.xlane.f32.xlu0 %v1195_v37  ;;  %v1170_v20 = vpop.xlane.xlu0 %1169 }
 0x3a4   : > { %v1200_v48 = vsub.f32 %v4952_v49, %v1170_v20  ;;  %v1164_v50 = vpop.xlane.xlu1 %1163 }
 0x3a5   : > { %v1198_v54 = vsub.f32 %v4956_v51, %v1164_v50 }
 0x3a6   : > { %v1214_v52 = vmul.f32 1.442695, %v1200_v48 }
 0x3a7   : > { %v1167_v28 = vpop.xlane.xlu0 %1166  ;;  %v1210_v59 = vmul.f32 1.442695, %v1198_v54 }
 0x3a8   : > { %v1199_v38 = vsub.f32 %v1150_v58, %v1167_v28 }
 0x3aa   : > { %v1212_v39 = vmul.f32 1.442695, %v1199_v38 }
 0x3ac   : > { %4456 = vpow2.f32 %v1212_v39 }
 0x3ad   : > { %4458 = vpow2.f32 %v1214_v52 }
 0x3ae   : > { %4460 = vpow2.f32 %v1210_v59 }
 0x3b1   : > { %4235 = vrot.lane.b32.xlu1 %v4864_v14, %s4666_s12 }
 0x3b5   : > { %4240 = vrot.lane.b32.xlu1 %v4864_v14, %s4668_s19 }
 0x3b6   : > { %v5021_v40 = vpop.eup %4456 }
 0x3b7   : > { %v1237_v13 = vsel %vm1161_vm4, %v5021_v40, 0.0  ;;  %v5035_v57 = vpop.eup %4458 }
 0x3b8   : > { %v1240_v58 = vsel %vm1161_vm4, %v5035_v57, 0.0  ;;  %v5039_v61 = vpop.eup %4460 }
 0x3b9   : > { %4245 = vrot.lane.b32.xlu1 %v4864_v14, %s4667_s17  ;;  %874 = vrot.lane.b32.xlu0 %v4913_v24, %s4666_s12  ;;  %v1192_v14 = vsel %vm1161_vm4, %v5027_v43, -inf  ;;  %v1234_v62 = vsel %vm1161_vm4, %v5039_v61, 0.0 }
 0x3d8   : > { %1238 = vadd.xlane.f32.xlu0 %v1237_v13 }
 0x3dd   : > { %1193 = vmax.xlane.f32.xlu1 %v1192_v14 }
 0x3ee   : > { %883 = vrot.lane.b32.xlu1 %v4913_v24, %s4668_s19 }
 0x412   : > { %1241 = vadd.xlane.f32.xlu1 %v1240_v58 }
 0x416   : > { %1235 = vadd.xlane.f32.xlu1 %v1234_v62 }
 0x41a   : > { %v1173_v49 = vpop.xlane.xlu0 %1172 }
 0x41b   : > { %v1201_v63 = vsub.f32 %v4967_v0, %v1173_v49 }
 0x41d   : > { %v1216_v3 = vmul.f32 1.442695, %v1201_v63 }
 0x41e   : > { %v1179_v1 = vpop.xlane.xlu0 %1178 }
 0x41f   : > { %v1203_v51 = vsub.f32 %v4973_v5, %v1179_v1 }
 0x421   : > { %v1220_v4 = vmul.f32 1.442695, %v1203_v51 }
 0x423   : > { %4462 = vpow2.f32 %v1220_v4 }
 0x424   : > { %4464 = vpow2.f32 %v1216_v3 }
 0x425   : > { %v1188_v6 = vpop.xlane.xlu1 %1187 }
 0x426   : > { %v1206_v7 = vsub.f32 %v4979_v8, %v1188_v6 }
 0x428   : > { %v1226_v9 = vmul.f32 1.442695, %v1206_v7  ;;  %v1185_v10 = vpop.xlane.xlu0 %1184 }
 0x429   : > { %v1205_v11 = vsub.f32 %v4989_v18, %v1185_v10  ;;  %v1182_v16 = vpop.xlane.xlu1 %1181 }
 0x42a   : > { %4466 = vpow2.f32 %v1226_v9  ;;  %v1204_v22 = vsub.f32 %v4985_v15, %v1182_v16 }
 0x42b   : > { %v1224_v23 = vmul.f32 1.442695, %v1205_v11 }
 0x42c   : > { %v1222_v0 = vmul.f32 1.442695, %v1204_v22  ;;  %v1191_v25 = vpop.xlane.xlu0 %1190 }
 0x42d   : > { %v5048_v29 = vpop.eup %4462  ;;  %4468 = vpow2.f32 %v1224_v23  ;;  %v1176_v5 = vpop.xlane.xlu1 %1175  ;;  %v1207_v18 = vsub.f32 %v4995_v26, %v1191_v25  ;;  %v5097_v23 = vadd.f32 %v4853_v60, %v4936_v31  ;;  %v754_v60 = vadd.f32 %v4849_v55, %v4874_v30 }
 0x42e   : > { %4470 = vpow2.f32 %v1222_v0  ;;  %v1202_v19 = vsub.f32 %v5001_v33, %v1176_v5  ;;  %v1249_v8 = vsel %vm1161_vm4, %v5048_v29, 0.0  ;;  %v5053_v34 = vpop.eup %4464  ;;  %v5103_v0 = vadd.f32 %v4849_v55, %v4920_v27 }
 0x42f   : > { %1250 = vadd.xlane.f32.xlu0 %v1249_v8  ;;  %v1243_v38 = vsel %vm1161_vm4, %v5053_v34, 0.0  ;;  %v1228_v33 = vmul.f32 1.442695, %v1207_v18  ;;  %v5117_v27 = vadd.f32 %v4849_v55, %v4930_v41 }
 0x430   : > { %v1218_v35 = vmul.f32 1.442695, %v1202_v19  ;;  %v1197_v15 = vpop.xlane.xlu0 %1196 }
 0x431   : > { %v1209_v21 = vsub.f32 %v5007_v36, %v1197_v15  ;;  %v4236_v37 = vpop.permute.xlu1 %4235 }
 0x432   : > { %4472 = vpow2.f32 %v1218_v35  ;;  %v4238_v20 = vunpack.i.h.bf16 %v4236_v37  ;;  %v4237_v28 = vunpack.i.l.bf16 %v4236_v37 }
 0x433   : > { %v1232_v39 = vmul.f32 1.442695, %v1209_v21  ;;  %1244 = vadd.xlane.f32.xlu0 %v1243_v38 }
 0x434   : > { %v5059_v13 = vpop.eup %4466  ;;  %v899_v14 = vpack.c.bf16 %v4238_v20, %v4237_v28  ;;  %v875_v48 = vpop.permute.xlu0 %874 }
 0x435   : > { %4474 = vpow2.f32 %v1232_v39  ;;  %v900_v26 = vpack.c.bf16 %v875_v48, %v875_v48  ;;  %v4241_v50 = vpop.permute.xlu1 %4240  ;;  %v1258_v36 = vsel %vm1161_vm4, %v5059_v13, 0.0 }
 0x436   : > { %v4243_v52 = vunpack.i.h.bf16 %v4241_v50  ;;  %v4242_v54 = vunpack.i.l.bf16 %v4241_v50  ;;  %1259 = vadd.xlane.f32.xlu1 %v1258_v36  ;;  %4055 = vmatprep.subr.bf16.mxu1 %v899_v14  ;;  %4476 = vpow2.f32 %v1228_v33 }
 0x437   : > { %v5063_v59 = vpop.eup %4468  ;;  %4056 = vmatpush3.bf16.msra.mxu1 %v899_v14  ;;  %v1367_v51 = vsel %vm1308_vm2, %v900_v26, 0 }
 0x438   : > { %v5065_v58 = vpop.eup %4470  ;;  %v5067_v62 = vpack.c.bf16 %v4243_v52, %v4242_v54  ;;  %4180 = vmatprep.subr.msk.bf16.mxu1 %vm1308_vm2, %v900_v26  ;;  %v1255_v49 = vsel %vm1161_vm4, %v5063_v59, 0.0 }
 0x439   : > { %v4246_v63 = vpop.permute.xlu1 %4245  ;;  %1256 = vadd.xlane.f32.xlu0 %v1255_v49  ;;  %v1252_v1 = vsel %vm1161_vm4, %v5065_v58, 0.0 }
 0x43a   : > { %v4248_v3 = vunpack.i.h.bf16 %v4246_v63  ;;  %v4247_v4 = vunpack.i.l.bf16 %v4246_v63  ;;  %1253 = vadd.xlane.f32.xlu1 %v1252_v1  ;;  %4063 = vmatprep.subr.bf16.mxu0 %v5067_v62  ;;  %v1609_v63 = vmul.f32 0.17677669, %v5103_v0 }
 0x43b   : > { %4058 = vmatpush3.bf16.msra.mxu1 %v1367_v51 }
 0x43c   : > { %v5076_v6 = vpop.eup %4472  ;;  %v5078_v7 = vpack.c.bf16 %v4248_v3, %v4247_v4  ;;  %v1608_v3 = vmul.f32 0.17677669, %v754_v60 }
 0x43d   : > { %v1246_v9 = vsel %vm1161_vm4, %v5076_v6, 0.0 }
 0x43e   : > { %1247 = vadd.xlane.f32.xlu1 %v1246_v9  ;;  %4071 = vmatprep.subr.bf16.mxu1 %v5078_v7 }
 0x43f   : > { %v5083_v10 = vpop.eup %4474 }
 0x440   : > { %v1267_v11 = vsel %vm1161_vm4, %v5083_v10, 0.0  ;;  %v5087_v16 = vpop.eup %4476 }
 0x441   : > { %1268 = vadd.xlane.f32.xlu0 %v1267_v11  ;;  %v1261_v22 = vsel %vm1161_vm4, %v5087_v16, 0.0 }
 0x445   : > { %1262 = vadd.xlane.f32.xlu0 %v1261_v22 }
 0x44f   : > { %4250 = vrot.lane.b32.xlu1 %v4940_v45, %s4666_s12 }
 0x45b   : > { %892 = vrot.lane.b32.xlu0 %v4913_v24, %s4667_s17 }
 0x45f   : > { %1635 = vrot.lane.b32.xlu0 %v5097_v23, %s4666_s12 }
 0x463   : > { %1583 = vrot.lane.b32.xlu0 %v5103_v0, %s4666_s12 }
 0x465   : > { %v1239_v30 = vpop.xlane.xlu0 %1238 }
 0x467   : > { %4255 = vrot.lane.b32.xlu0 %v4940_v45, %s4668_s19 }
 0x46a   : > { %v1194_v25 = vpop.xlane.xlu1 %1193 }
 0x46b   : > { %v1208_v24 = vsub.f32 %v5027_v43, %v1194_v25  ;;  %1644 = vrot.lane.b32.xlu0 %v5097_v23, %s4668_s19 }
 0x46d   : > { %v1230_v31 = vmul.f32 1.442695, %v1208_v24  ;;  %v1620_v24 = vpack.c.bf16 %v1609_v63, %v1608_v3 }
 0x46e   : > { %v884_v55 = vpop.permute.xlu1 %883 }
 0x46f   : > { %4478 = vpow2.f32 %v1230_v31  ;;  %1590 = vrot.lane.b32.xlu0 %v754_v60, %s4668_s19  ;;  %v902_v28 = vpack.c.bf16 %v884_v55, %v884_v55 }
 0x471   : > { %v1424_v38 = vsel %vm1308_vm2, %v902_v28, 0 }
 0x473   : > { %1594 = vrot.lane.b32.xlu0 %v5117_v27, %s4668_s19 }
 0x477   : > { %1601 = vrot.lane.b32.xlu0 %v5103_v0, %s4667_s17 }
 0x479   : > { %v5123_v43 = vpop.eup %4478 }
 0x47a   : > { %v1264_v5 = vsel %vm1161_vm4, %v5123_v43, 0.0 }
 0x47b   : > { %1265 = vadd.xlane.f32.xlu1 %v1264_v5 }
 0x48c   : > { %1581 = vrot.lane.b32.xlu1 %v754_v60, %s4666_s12 }
 0x490   : > { %1585 = vrot.lane.b32.xlu1 %v5117_v27, %s4666_s12 }
 0x494   : > { %4260 = vrot.lane.b32.xlu1 %v4940_v45, %s4667_s17 }
 0x498   : > { %1653 = vrot.lane.b32.xlu1 %v5097_v23, %s4667_s17 }
 0x49c   : > { %1592 = vrot.lane.b32.xlu1 %v5103_v0, %s4668_s19  ;;  %v1659_v0 = vpack.c.bf16 %v5097_v23, %v5097_v23 }
 0x49f   : > { %v1242_v41 = vpop.xlane.xlu1 %1241 }
 0x4a0   : > { %1599 = vrot.lane.b32.xlu1 %v754_v60, %s4667_s17  ;;  %4480 = vrcp.f32 %v1242_v41  ;;  %v1714_v41 = vsel %vm905_vm1, %v1659_v0, 0 }
 0x4a1   : > { %4482 = vrcp.f32 %v1239_v30 }
 0x4a3   : > { %v1236_v19 = vpop.xlane.xlu1 %1235 }
 0x4a4   : > { %4484 = vrcp.f32 %v1236_v19  ;;  %1603 = vrot.lane.b32.xlu1 %v5117_v27, %s4667_s17  ;;  %v1610_v19 = vmul.f32 0.17677669, %v5117_v27 }
 0x4aa   : > { %v4481_v8 = vpop.eup %4480 }
 0x4ab   : > { %v4483_v45 = vpop.eup %4482  ;;  %v1284_v35 = vmul.f32 %v4481_v8, %v5035_v57 }
 0x4ac   : > { %v1283_v21 = vmul.f32 %v4483_v45, %v5021_v40 }
 0x4ad   : > { %v1295_v20 = vpack.c.bf16 %v1284_v35, %v1284_v35 }
 0x4ae   : > { %v4485_v18 = vpop.eup %4484 }
 0x4af   : > { %v1282_v15 = vmul.f32 %v4485_v18, %v5039_v61 }
 0x4b1   : > { %v1294_v37 = vpack.c.bf16 %v1283_v21, %v1282_v15  ;;  %v1621_v15 = vpack.c.bf16 %v1610_v19, %v1610_v19 }
 0x4b3   : > { %4051 = vmatprep.mubr.msk.bf16.mxu0 %vm1161_vm4, %v1294_v37 }
 0x4b4   : > { %4052 = vmatmul.mubr.msk.bf16.vlgmr.msra.gmra.mrb[16].mxu0 %vm1161_vm4, %v1295_v20 }
 0x4b5   : > { %4064 = vmatpush3.bf16.msra.mxu0 %v5067_v62 }
 0x4b6   : > { %4181 = vmatprep.subr.msk.bf16.mxu0 %vm1308_vm2, %v902_v28 }
 0x4b9   : > { %4066 = vmatpush3.bf16.msra.mxu0 %v1424_v38 }
 0x4ba   : > { %4183 = vmatprep.subr.msk.bf16.mxu0 %vm905_vm1, %v4942_v46 }
 0x4bc   : > { %v1251_v57 = vpop.xlane.xlu0 %1250 }
 0x4c0   : > { %v1245_v61 = vpop.xlane.xlu0 %1244 }
 0x4c3   : > { %v1260_v40 = vpop.xlane.xlu1 %1259 }
 0x4c4   : > { %4486 = vrcp.f32 %v1260_v40 }
 0x4c6   : > { %v1257_v33 = vpop.xlane.xlu0 %1256 }
 0x4c7   : > { %4488 = vrcp.f32 %v1257_v33  ;;  %v1254_v39 = vpop.xlane.xlu1 %1253 }
 0x4c8   : > { %4490 = vrcp.f32 %v1254_v39 }
 0x4c9   : > { %4492 = vrcp.f32 %v1251_v57 }
 0x4ca   : > { %4494 = vrcp.f32 %v1245_v61 }
 0x4cb   : > { %v1248_v14 = vpop.xlane.xlu1 %1247 }
 0x4cc   : > { %4496 = vrcp.f32 %v1248_v14 }
 0x4ce   : > { %v1269_v48 = vpop.xlane.xlu0 %1268  ;;  %v4487_v26 = vpop.eup %4486 }
 0x4cf   : > { %v1290_v52 = vmul.f32 %v4487_v26, %v5059_v13  ;;  %v4251_v60 = vpop.permute.xlu1 %4250  ;;  %4498 = vrcp.f32 %v1269_v48 }
 0x4d1   : > { %v4489_v50 = vpop.eup %4488  ;;  %v1299_v25 = vpack.c.bf16 %v1290_v52, %v1290_v52 }
 0x4d2   : > { %v4491_v36 = vpop.eup %4490  ;;  %v1263_v54 = vpop.xlane.xlu0 %1262  ;;  %v1289_v62 = vmul.f32 %v4489_v50, %v5063_v59 }
 0x4d3   : > { %v4493_v49 = vpop.eup %4492  ;;  %v1288_v1 = vmul.f32 %v4491_v36, %v5065_v58  ;;  %v1711_v58 = vsel %vm905_vm1, %v4942_v46, 0  ;;  %4500 = vrcp.f32 %v1263_v54 }
 0x4d4   : > { %v4495_v51 = vpop.eup %4494  ;;  %v1287_v11 = vmul.f32 %v4493_v49, %v5048_v29 }
 0x4d5   : > { %v1298_v4 = vpack.c.bf16 %v1289_v62, %v1288_v1  ;;  %v1285_v13 = vmul.f32 %v4495_v51, %v5053_v34  ;;  %v4253_v34 = vunpack.i.h.bf16 %v4251_v60 }
 0x4d6   : > { %v4497_v9 = vpop.eup %4496  ;;  %v893_v22 = vpop.permute.xlu0 %892  ;;  %v1297_v5 = vpack.c.bf16 %v1287_v11, %v1287_v11  ;;  %v5188_v11 = vadd.f32 %v4851_v56, %v4932_v42 }
 0x4d7   : > { %4067 = vmatprep.mubr.msk.bf16.mxu0 %vm1161_vm4, %v1298_v4  ;;  %v1286_v59 = vmul.f32 %v4497_v9, %v5076_v6  ;;  %v4252_v6 = vunpack.i.l.bf16 %v4251_v60  ;;  %v904_v55 = vpack.c.bf16 %v893_v22, %v893_v22 }
 0x4d8   : > { %4068 = vmatmul.mubr.msk.bf16.vlgmr.msra.gmra.mrb[20].mxu0 %vm1161_vm4, %v1299_v25 }
 0x4d9   : > { %4080 = vmatpush3.bf16.xpose.msra.mxu0 %v1711_v58  ;;  %4083 = vmatprep.mubr.msk.bf16.mxu0 %vm905_vm1, %v1620_v24  ;;  %v1296_v29 = vpack.c.bf16 %v1286_v59, %v1285_v13  ;;  %v1660_v23 = vpack.c.bf16 %v4253_v34, %v4252_v6  ;;  %v1481_v30 = vsel %vm1308_vm2, %v904_v55, 0  ;;  %v4499_v38 = vpop.eup %4498  ;;  %v1697_v58 = vpack.c.bf16 %v5188_v11, %v5188_v11 }
 0x4da   : > { %4184 = vmatprep.subr.msk.bf16.mxu0 %vm905_vm1, %v1659_v0  ;;  %v1636_v31 = vpop.permute.xlu0 %1635  ;;  %v1293_v33 = vmul.f32 %v4499_v38, %v5083_v10 }
 0x4db   : > { %4059 = vmatprep.mubr.msk.bf16.mxu1 %vm1161_vm4, %v1296_v29  ;;  %v1661_v63 = vpack.c.bf16 %v1636_v31, %v1636_v31  ;;  %v1771_v10 = vsel %vm905_vm1, %v1660_v23, 0  ;;  %v2103_v29 = vsel %vm1308_vm2, %v1697_v58, 0 }
 0x4dc   : > { %4060 = vmatmul.mubr.msk.bf16.vlgmr.msra.gmra.mrb[24].mxu1 %vm1161_vm4, %v1297_v5  ;;  %v1301_v48 = vpack.c.bf16 %v1293_v33, %v1293_v33 }
 0x4dd   : > { %4072 = vmatpush3.bf16.msra.mxu1 %v5078_v7  ;;  %v4501_v61 = vpop.eup %4500  ;;  %v1774_v24 = vsel %vm905_vm1, %v1661_v63, 0 }
 0x4de   : > { %4182 = vmatprep.subr.msk.bf16.mxu1 %vm1308_vm2, %v904_v55  ;;  %v1584_v46 = vpop.permute.xlu0 %1583  ;;  %v1291_v50 = vmul.f32 %v4501_v61, %v5087_v16 }
 0x4df   : > { %v1612_v52 = vmul.f32 0.17677669, %v1584_v46 }
 0x4e1   : > { %4074 = vmatpush3.bf16.msra.mxu1 %v1481_v30  ;;  %4082 = vmatpush3.bf16.xpose.msra.mxu0 %v1714_v41 }
 0x4e2   : > { %4185 = vmatprep.subr.msk.bf16.mxu1 %vm905_vm1, %v1660_v23  ;;  %v4256_v8 = vpop.permute.xlu0 %4255 }
 0x4e3   : > { %v4258_v45 = vunpack.i.h.bf16 %v4256_v8  ;;  %v4257_v18 = vunpack.i.l.bf16 %v4256_v8 }
 0x4e5   : > { %v1662_v35 = vpack.c.bf16 %v4258_v45, %v4257_v18 }
 0x4e6   : > { %v1645_v7 = vpop.permute.xlu0 %1644 }
 0x4e7   : > { %v1663_v21 = vpack.c.bf16 %v1645_v7, %v1645_v7  ;;  %4187 = vmatprep.subr.msk.bf16.mxu0 %vm905_vm1, %v1662_v35  ;;  %v1831_v37 = vsel %vm905_vm1, %v1662_v35, 0 }
 0x4e8   : > { %4084 = vmatmul.mubr.msk.bf16.vlgmr.msra.gmra.mrb[24].mxu0 %vm905_vm1, %v1621_v15 }
 0x4e9   : > { %4096 = vmatpush3.bf16.xpose.msra.mxu0 %v1831_v37  ;;  %v1834_v27 = vsel %vm905_vm1, %v1663_v21, 0 }
 0x4ea   : > { %4188 = vmatprep.subr.msk.bf16.mxu0 %vm905_vm1, %v1663_v21  ;;  %v1591_v39 = vpop.permute.xlu0 %1590 }
 0x4eb   : > { %v1614_v51 = vmul.f32 0.17677669, %v1591_v39 }
 0x4ee   : > { %v1595_v1 = vpop.permute.xlu0 %1594 }
 0x4ef   : > { %v1616_v16 = vmul.f32 0.17677669, %v1595_v1 }
 0x4f1   : > { %4098 = vmatpush3.bf16.xpose.msra.mxu0 %v1834_v27  ;;  %v1625_v25 = vpack.c.bf16 %v1616_v16, %v1616_v16 }
 0x4f2   : > { %4111 = vmatprep.subr.bf16.mxu0 %v4938_v44  ;;  %v1602_v0 = vpop.permute.xlu0 %1601 }
 0x4f3   : > { %v1618_v42 = vmul.f32 0.17677669, %v1602_v0 }
 0x508   : > { %v1266_v20 = vpop.xlane.xlu1 %1265 }
 0x509   : > { %4502 = vrcp.f32 %v1266_v20 }
 0x50c   : > { %v1582_v28 = vpop.permute.xlu1 %1581 }
 0x50d   : > { %v1611_v14 = vmul.f32 0.17677669, %v1582_v28 }
 0x50f   : > { %v1622_v54 = vpack.c.bf16 %v1612_v52, %v1611_v14 }
 0x510   : > { %v1586_v57 = vpop.permute.xlu1 %1585 }
 0x511   : > { %v1613_v60 = vmul.f32 0.17677669, %v1586_v57 }
 0x513   : > { %v4503_v40 = vpop.eup %4502  ;;  %v1623_v31 = vpack.c.bf16 %v1613_v60, %v1613_v60 }
 0x514   : > { %v4261_v26 = vpop.permute.xlu1 %4260  ;;  %v1292_v36 = vmul.f32 %v4503_v40, %v5123_v43 }
 0x515   : > { %v4263_v3 = vunpack.i.h.bf16 %v4261_v26  ;;  %v4262_v4 = vunpack.i.l.bf16 %v4261_v26 }
 0x516   : > { %v1300_v62 = vpack.c.bf16 %v1292_v36, %v1291_v50 }
 0x517   : > { %v1664_v13 = vpack.c.bf16 %v4263_v3, %v4262_v4 }
 0x518   : > { %4075 = vmatprep.mubr.msk.bf16.mxu1 %vm1161_vm4, %v1300_v62  ;;  %v1654_v49 = vpop.permute.xlu1 %1653 }
 0x519   : > { %4076 = vmatmul.mubr.msk.bf16.vlgmr.msra.gmra.mrb[28].mxu1 %vm1161_vm4, %v1301_v48  ;;  %v1665_v34 = vpack.c.bf16 %v1654_v49, %v1654_v49  ;;  %v1891_v6 = vsel %vm905_vm1, %v1664_v13, 0 }
 0x51a   : > { %4088 = vmatpush3.bf16.xpose.msra.mxu1 %v1771_v10  ;;  %4091 = vmatprep.mubr.msk.bf16.mxu1 %vm905_vm1, %v1622_v54 }
 0x51b   : > { %4186 = vmatprep.subr.msk.bf16.mxu1 %vm905_vm1, %v1661_v63  ;;  %v1894_v55 = vsel %vm905_vm1, %v1665_v34, 0 }
 0x51c   : > { %v1593_v43 = vpop.permute.xlu1 %1592 }
 0x51d   : > { %v1615_v9 = vmul.f32 0.17677669, %v1593_v43 }
 0x51f   : > { %v1624_v22 = vpack.c.bf16 %v1615_v9, %v1614_v51 }
 0x520   : > { %v1600_v59 = vpop.permute.xlu1 %1599 }
 0x521   : > { %4099 = vmatprep.mubr.msk.bf16.mxu0 %vm905_vm1, %v1624_v22  ;;  %v1617_v56 = vmul.f32 0.17677669, %v1600_v59 }
 0x522   : > { %4090 = vmatpush3.bf16.xpose.msra.mxu1 %v1774_v24  ;;  %4100 = vmatmul.mubr.msk.bf16.vlgmr.msra.gmra.mrb[28].mxu0 %vm905_vm1, %v1625_v25 }
 0x523   : > { %4189 = vmatprep.subr.msk.bf16.mxu1 %vm905_vm1, %v1664_v13  ;;  %4112 = vmatpush3.bf16.msra.mxu0 %v4938_v44  ;;  %v1626_v5 = vpack.c.bf16 %v1618_v42, %v1617_v56 }
 0x524   : > { %4191 = vmatprep.subr.msk.bf16.mxu0 %vm1308_vm2, %v1697_v58  ;;  %v1604_v44 = vpop.permute.xlu1 %1603 }
 0x525   : > { %v1619_v46 = vmul.f32 0.17677669, %v1604_v44 }
 0x527   : > { %4114 = vmatpush3.bf16.msra.mxu0 %v2103_v29  ;;  %v1627_v23 = vpack.c.bf16 %v1619_v46, %v1619_v46 }
 0x529   : > { %4092 = vmatmul.mubr.msk.bf16.vlgmr.msra.gmra.mrb[32].mxu1 %vm905_vm1, %v1623_v31 }
 0x52a   : > { %4104 = vmatpush3.bf16.xpose.msra.mxu1 %v1891_v6  ;;  %4107 = vmatprep.mubr.msk.bf16.mxu1 %vm905_vm1, %v1626_v5 }
 0x52b   : > { %4190 = vmatprep.subr.msk.bf16.mxu1 %vm905_vm1, %v1665_v34 }
 0x532   : > { %4106 = vmatpush3.bf16.xpose.msra.mxu1 %v1894_v55 }
 0x539   : > { %4108 = vmatmul.mubr.msk.bf16.vlgmr.msra.gmra.mrb[36].mxu1 %vm905_vm1, %v1627_v23 }
 0x587   : > { %v5205_v30 = vpop.f32.mrb[16].mxu0 }
 0x588   : > { %v5207_v41 = vpop.f32.mrb[17].mxu0 }
 0x589   : > { %v4054_v19 = vpop.f32.mrb[18].mxu0 }
 0x58a   : > { %v5209_v8 = vpop.f32.mrb[19].mxu0 }
 0x5ab   : > { %v5211_v45 = vpop.f32.mrb[20].mxu0 }
 0x5ac   : > { %v5213_v18 = vpop.f32.mrb[21].mxu0 }
 0x5ad   : > { %v4070_v35 = vpop.f32.mrb[22].mxu0 }
 0x5ae   : > { %v5215_v15 = vpop.f32.mrb[23].mxu0 }
 0x5af   : > { %v4284_v7 = vpack.i.bf16 %v5215_v15, %v5213_v18  ;;  %v5219_v21 = vpop.f32.mrb[24].mxu1 }
 0x5b0   : > { %v5221_v37 = vpop.f32.mrb[25].mxu1 }
 0x5b1   : > { %v4062_v27 = vpop.f32.mrb[26].mxu1 }
 0x5b2   : > { %v5223_v20 = vpop.f32.mrb[27].mxu1 }
 0x5b3   : > { %v4279_v28 = vpack.i.bf16 %v5223_v20, %v5221_v37 }
 0x5bb   : > { %v4085_v38 = vpop.f32.mrb[24].mxu0 }
 0x5bc   : > { %v1946_v57 = vsel %vm1146_vm3, %v4085_v38, -1e+30  ;;  %v1750_v61 = vpop.f32.mrb[25].mxu0 }
 0x5bd   : > { %v4086_v40 = vpop.f32.mrb[26].mxu0  ;;  %v1962_v33 = vsel %vm1161_vm4, %v1946_v57, -inf  ;;  %v5232_v39 = vsel %vm1146_vm3, %v1750_v61, -1e+30 }
 0x5be   : > { %1963 = vmax.xlane.f32.xlu0 %v1962_v33  ;;  %v1753_v14 = vpop.f32.mrb[27].mxu0  ;;  %v1956_v36 = vsel %vm1161_vm4, %v5232_v39, -inf }
 0x5bf   : > { %v1945_v26 = vsel %vm1146_vm3, %v1753_v14, -1e+30 }
 0x5c0   : > { %v1959_v50 = vsel %vm1161_vm4, %v1945_v26, -inf }
 0x5c1   : > { %1960 = vmax.xlane.f32.xlu1 %v1959_v50 }
 0x5c2   : > { %1957 = vmax.xlane.f32.xlu0 %v1956_v36 }
 0x5ec   : > { %v5239_v52 = vpop.f32.mrb[28].mxu1 }
 0x5ed   : > { %v5241_v62 = vpop.f32.mrb[29].mxu1 }
 0x5ee   : > { %v4078_v48 = vpop.f32.mrb[30].mxu1 }
 0x5ef   : > { %v5243_v54 = vpop.f32.mrb[31].mxu1 }
 0x5f0   : > { %v4289_v49 = vpack.i.bf16 %v5243_v54, %v5241_v62 }
 0x5f5   : > { %v4101_v63 = vpop.f32.mrb[28].mxu0 }
 0x5f6   : > { %v1870_v1 = vpop.f32.mrb[29].mxu0  ;;  %v1952_v42 = vsel %vm1146_vm3, %v4101_v63, -1e+30 }
 0x5f7   : > { %v4102_v10 = vpop.f32.mrb[30].mxu0  ;;  %v5262_v59 = vsel %vm1146_vm3, %v1870_v1, -1e+30  ;;  %v1980_v29 = vsel %vm1161_vm4, %v1952_v42, -inf }
 0x5f8   : > { %v1873_v16 = vpop.f32.mrb[31].mxu0  ;;  %v1974_v0 = vsel %vm1161_vm4, %v5262_v59, -inf }
 0x5f9   : > { %v5257_v25 = vsel %vm1146_vm3, %v1873_v16, -1e+30 }
 0x5fa   : > { %v1977_v58 = vsel %vm1161_vm4, %v5257_v25, -inf }
 0x5fc   : > { %v4093_v43 = vpop.f32.mrb[32].mxu1 }
 0x5fd   : > { %v5249_v51 = vsel %vm1146_vm3, %v4093_v43, -1e+30  ;;  %v1810_v3 = vpop.f32.mrb[33].mxu1 }
 0x5fe   : > { %v1947_v4 = vsel %vm1146_vm3, %v1810_v3, -1e+30  ;;  %v4094_v9 = vpop.f32.mrb[34].mxu1  ;;  %v1971_v22 = vsel %vm1161_vm4, %v5249_v51, -inf }
 0x5ff   : > { %v1813_v24 = vpop.f32.mrb[35].mxu1  ;;  %1972 = vmax.xlane.f32.xlu1 %v1971_v22  ;;  %v1965_v13 = vsel %vm1161_vm4, %v1947_v4, -inf }
 0x600   : > { %1966 = vmax.xlane.f32.xlu0 %v1965_v13  ;;  %v5270_v60 = vsel %vm1146_vm3, %v1813_v24, -1e+30 }
 0x601   : > { %v1968_v56 = vsel %vm1161_vm4, %v5270_v60, -inf }
 0x603   : > { %1978 = vmax.xlane.f32.xlu1 %v1977_v58 }
 0x604   : > { %1975 = vmax.xlane.f32.xlu0 %v1974_v0 }
 0x608   : > { %1969 = vmax.xlane.f32.xlu0 %v1968_v56 }
 0x60c   : > { %v4109_v31 = vpop.f32.mrb[36].mxu1  ;;  %1981 = vmax.xlane.f32.xlu0 %v1980_v29 }
 0x60d   : > { %v1930_v5 = vpop.f32.mrb[37].mxu1  ;;  %v5285_v46 = vsel %vm1146_vm3, %v4109_v31, -1e+30 }
 0x60e   : > { %v5279_v34 = vsel %vm1146_vm3, %v1930_v5, -1e+30  ;;  %v4110_v6 = vpop.f32.mrb[38].mxu1  ;;  %v1989_v35 = vsel %vm1161_vm4, %v5285_v46, -inf }
 0x60f   : > { %v1933_v44 = vpop.f32.mrb[39].mxu1  ;;  %v1983_v55 = vsel %vm1161_vm4, %v5279_v34, -inf }
 0x610   : > { %v5289_v23 = vsel %vm1146_vm3, %v1933_v44, -1e+30  ;;  %1984 = vmax.xlane.f32.xlu1 %v1983_v55 }
 0x611   : > { %v1986_v19 = vsel %vm1161_vm4, %v5289_v23, -inf }
 0x612   : > { %1987 = vmax.xlane.f32.xlu0 %v1986_v19 }
 0x614   : > { %1990 = vmax.xlane.f32.xlu1 %v1989_v35 }
 0x625   : > { %1673 = vrot.lane.b32.xlu1 %v5188_v11, %s4666_s12 }
 0x628   : > { %4265 = vrot.lane.b32.xlu0 %v4944_v32, %s4666_s12 }
 0x629   : > { %4270 = vrot.lane.b32.xlu1 %v4944_v32, %s4668_s19 }
 0x62d   : > { %4275 = vrot.lane.b32.xlu1 %v4944_v32, %s4667_s17 }
 0x64b   : > { %v1964_v47 = vpop.xlane.xlu0 %1963 }
 0x64c   : > { %v1994_v27 = vsub.f32 %v1946_v57, %v1964_v47 }
 0x64e   : > { %v2008_v38 = vmul.f32 1.442695, %v1994_v27  ;;  %v1961_v61 = vpop.xlane.xlu1 %1960 }
 0x64f   : > { %v1993_v40 = vsub.f32 %v1945_v26, %v1961_v61  ;;  %v1958_v33 = vpop.xlane.xlu0 %1957 }
 0x650   : > { %4504 = vpow2.f32 %v2008_v38  ;;  %v1992_v14 = vsub.f32 %v5232_v39, %v1958_v33 }
 0x651   : > { %v2006_v50 = vmul.f32 1.442695, %v1993_v40 }
 0x652   : > { %v2004_v36 = vmul.f32 1.442695, %v1992_v14 }
 0x653   : > { %4506 = vpow2.f32 %v2006_v50 }
 0x654   : > { %4508 = vpow2.f32 %v2004_v36 }
 0x65a   : > { %v5304_v48 = vpop.eup %4504 }
 0x65b   : > { %v2034_v63 = vsel %vm1161_vm4, %v5304_v48, 0.0 }
 0x65c   : > { %2035 = vadd.xlane.f32.xlu0 %v2034_v63 }
 0x65d   : > { %v5308_v32 = vpop.eup %4506 }
 0x65e   : > { %v5310_v57 = vpop.eup %4508  ;;  %v2031_v26 = vsel %vm1161_vm4, %v5308_v32, 0.0 }
 0x65f   : > { %2032 = vadd.xlane.f32.xlu1 %v2031_v26  ;;  %v2028_v39 = vsel %vm1161_vm4, %v5310_v57, 0.0 }
 0x660   : > { %2029 = vadd.xlane.f32.xlu0 %v2028_v39 }
 0x68c   : > { %v1973_v1 = vpop.xlane.xlu1 %1972 }
 0x68d   : > { %v1997_v10 = vsub.f32 %v5249_v51, %v1973_v1  ;;  %v1967_v16 = vpop.xlane.xlu0 %1966 }
 0x68e   : > { %v1995_v43 = vsub.f32 %v1947_v4, %v1967_v16 }
 0x68f   : > { %v2014_v3 = vmul.f32 1.442695, %v1997_v10 }
 0x690   : > { %v2010_v9 = vmul.f32 1.442695, %v1995_v43  ;;  %v1979_v22 = vpop.xlane.xlu1 %1978 }
 0x691   : > { %4510 = vpow2.f32 %v2014_v3  ;;  %v1999_v24 = vsub.f32 %v5257_v25, %v1979_v22  ;;  %v1976_v13 = vpop.xlane.xlu0 %1975 }
 0x692   : > { %4512 = vpow2.f32 %v2010_v9  ;;  %v1998_v56 = vsub.f32 %v5262_v59, %v1976_v13 }
 0x693   : > { %v2018_v58 = vmul.f32 1.442695, %v1999_v24 }
 0x694   : > { %v2016_v4 = vmul.f32 1.442695, %v1998_v56 }
 0x695   : > { %v1970_v0 = vpop.xlane.xlu0 %1969  ;;  %4514 = vpow2.f32 %v2018_v58 }
 0x696   : > { %v1996_v51 = vsub.f32 %v5270_v60, %v1970_v0 }
 0x698   : > { %v2012_v19 = vmul.f32 1.442695, %v1996_v51 }
 0x699   : > { %v1982_v29 = vpop.xlane.xlu0 %1981 }
 0x69a   : > { %v2000_v31 = vsub.f32 %v1952_v42, %v1982_v29 }
 0x69b   : > { %v5319_v5 = vpop.eup %4510 }
 0x69c   : > { %v2020_v6 = vmul.f32 1.442695, %v2000_v31  ;;  %v2043_v44 = vsel %vm1161_vm4, %v5319_v5, 0.0  ;;  %v5324_v55 = vpop.eup %4512 }
 0x69d   : > { %2044 = vadd.xlane.f32.xlu1 %v2043_v44  ;;  %v1985_v25 = vpop.xlane.xlu1 %1984  ;;  %v2037_v60 = vsel %vm1161_vm4, %v5324_v55, 0.0 }
 0x69e   : > { %4516 = vpow2.f32 %v2020_v6  ;;  %v2001_v35 = vsub.f32 %v5279_v34, %v1985_v25 }
 0x69f   : > { %v1988_v59 = vpop.xlane.xlu0 %1987  ;;  %v5327_v47 = vpop.eup %4514  ;;  %4518 = vpow2.f32 %v2016_v4 }
 0x6a0   : > { %v2002_v42 = vsub.f32 %v5289_v23, %v1988_v59  ;;  %4520 = vpow2.f32 %v2012_v19  ;;  %v2022_v61 = vmul.f32 1.442695, %v2001_v35  ;;  %v2049_v33 = vsel %vm1161_vm4, %v5327_v47, 0.0 }
 0x6a1   : > { %2038 = vadd.xlane.f32.xlu1 %v2037_v60  ;;  %v1991_v27 = vpop.xlane.xlu1 %1990 }
 0x6a2   : > { %v2003_v38 = vsub.f32 %v5285_v46, %v1991_v27  ;;  %v2024_v34 = vmul.f32 1.442695, %v2002_v42 }
 0x6a3   : > { %v4266_v40 = vpop.permute.xlu0 %4265 }
 0x6a4   : > { %v2026_v14 = vmul.f32 1.442695, %v2003_v38  ;;  %v4268_v50 = vunpack.i.h.bf16 %v4266_v40  ;;  %v4267_v36 = vunpack.i.l.bf16 %v4266_v40 }
 0x6a5   : > { %2050 = vadd.xlane.f32.xlu1 %v2049_v33  ;;  %v1674_v63 = vpop.permute.xlu1 %1673 }
 0x6a6   : > { %4522 = vpow2.f32 %v2026_v14  ;;  %v1698_v23 = vpack.c.bf16 %v4268_v50, %v4267_v36  ;;  %v1699_v39 = vpack.c.bf16 %v1674_v63, %v1674_v63 }
 0x6a7   : > { %4524 = vpow2.f32 %v2022_v61 }
 0x6a8   : > { %v5335_v26 = vpop.eup %4516  ;;  %4526 = vpow2.f32 %v2024_v34  ;;  %4119 = vmatprep.subr.bf16.mxu1 %v1698_v23  ;;  %v2160_v3 = vsel %vm1308_vm2, %v1699_v39, 0 }
 0x6a9   : > { %4120 = vmatpush3.bf16.msra.mxu1 %v1698_v23  ;;  %v4271_v46 = vpop.permute.xlu1 %4270  ;;  %v2052_v1 = vsel %vm1161_vm4, %v5335_v26, 0.0  ;;  %v5339_v10 = vpop.eup %4518 }
 0x6aa   : > { %v4273_v16 = vunpack.i.h.bf16 %v4271_v46  ;;  %v4272_v43 = vunpack.i.l.bf16 %v4271_v46  ;;  %2053 = vadd.xlane.f32.xlu0 %v2052_v1  ;;  %4192 = vmatprep.subr.msk.bf16.mxu1 %vm1308_vm2, %v1699_v39  ;;  %v5343_v22 = vpop.eup %4520  ;;  %v2046_v13 = vsel %vm1161_vm4, %v5339_v10, 0.0 }
 0x6ab   : > { %v2040_v51 = vsel %vm1161_vm4, %v5343_v22, 0.0 }
 0x6ac   : > { %v1700_v9 = vpack.c.bf16 %v4273_v16, %v4272_v43 }
 0x6ad   : > { %4122 = vmatpush3.bf16.msra.mxu1 %v2160_v3  ;;  %v4276_v24 = vpop.permute.xlu1 %4275 }
 0x6ae   : > { %v4278_v58 = vunpack.i.h.bf16 %v4276_v24  ;;  %v4277_v0 = vunpack.i.l.bf16 %v4276_v24  ;;  %2047 = vadd.xlane.f32.xlu0 %v2046_v13  ;;  %4127 = vmatprep.subr.bf16.mxu0 %v1700_v9  ;;  %v4356_v13 = vld [vmem:[%s4727_s8] sm:$0xff]  }
 0x6b0   : > { %v5347_v56 = vpop.eup %4522  ;;  %v5349_v29 = vpack.c.bf16 %v4278_v58, %v4277_v0 }
 0x6b1   : > { %v5351_v31 = vpop.eup %4524  ;;  %v2061_v4 = vsel %vm1161_vm4, %v5347_v56, 0.0 }
 0x6b2   : > { %v5357_v6 = vpop.eup %4526  ;;  %2041 = vadd.xlane.f32.xlu0 %v2040_v51  ;;  %2062 = vadd.xlane.f32.xlu1 %v2061_v4  ;;  %v2055_v25 = vsel %vm1161_vm4, %v5351_v31, 0.0 }
 0x6b3   : > { %4135 = vmatprep.subr.bf16.mxu1 %v5349_v29  ;;  %v2058_v44 = vsel %vm1161_vm4, %v5357_v6, 0.0 }
 0x6b6   : > { %2059 = vadd.xlane.f32.xlu0 %v2058_v44  ;;  %2056 = vadd.xlane.f32.xlu1 %v2055_v25 }
 0x6c7   : > { %1691 = vrot.lane.b32.xlu1 %v5188_v11, %s4667_s17 }
 0x6cb   : > { %4285 = vrot.lane.b32.xlu1 %v4284_v7, %s4668_s19 }
 0x6cc   : > { %1682 = vrot.lane.b32.xlu0 %v5188_v11, %s4668_s19 }
 0x6d0   : > { %4280 = vrot.lane.b32.xlu0 %v4279_v28, %s4667_s17 }
 0x6d4   : > { %4290 = vrot.lane.b32.xlu0 %v4289_v49, %s4666_s12 }
 0x6e9   : > { %v2036_v19 = vpop.xlane.xlu0 %2035 }
 0x6ea   : > { %4528 = vrcp.f32 %v2036_v19 }
 0x6ec   : > { %v2033_v35 = vpop.xlane.xlu1 %2032 }
 0x6ed   : > { %4530 = vrcp.f32 %v2033_v35  ;;  %v2030_v59 = vpop.xlane.xlu0 %2029 }
 0x6ee   : > { %4532 = vrcp.f32 %v2030_v59 }
 0x6f4   : > { %v4529_v18 = vpop.eup %4528 }
 0x6f5   : > { %v2078_v11 = vmul.f32 %v4529_v18, %v5304_v48 }
 0x6f7   : > { %v4531_v15 = vpop.eup %4530  ;;  %v2089_v28 = vpack.c.bf16 %v2078_v11, %v2078_v11 }
 0x6f8   : > { %v4533_v7 = vpop.eup %4532  ;;  %v2077_v42 = vmul.f32 %v4531_v15, %v5308_v32  ;;  %v4357_v15 = vld [vmem:[%s4727_s8 + $0x8] sm:$0xff]  }
 0x6f9   : > { %v2076_v37 = vmul.f32 %v4533_v7, %v5310_v57 }
 0x6fb   : > { %v2088_v20 = vpack.c.bf16 %v2077_v42, %v2076_v37 }
 0x6fd   : > { %4115 = vmatprep.mubr.msk.bf16.mxu0 %vm1161_vm4, %v2088_v20 }
 0x6fe   : > { %4116 = vmatmul.mubr.msk.bf16.vlgmr.msra.gmra.mrb[32].mxu0 %vm1161_vm4, %v2089_v28 }
 0x6ff   : > { %4128 = vmatpush3.bf16.msra.mxu0 %v1700_v9 }
 0x72a   : > { %v2045_v62 = vpop.xlane.xlu1 %2044 }
 0x72e   : > { %v2039_v54 = vpop.xlane.xlu1 %2038 }
 0x732   : > { %v2051_v49 = vpop.xlane.xlu1 %2050 }
 0x733   : > { %4534 = vrcp.f32 %v2051_v49  ;;  %v4359_v49 = vld [vmem:[%s4727_s8 + $0x18] sm:$0xff]  }
 0x737   : > { %v2054_v60 = vpop.xlane.xlu0 %2053 }
 0x738   : > { %4536 = vrcp.f32 %v2054_v60  ;;  %v4360_v60 = vld [vmem:[%s4727_s8 + $0x20] sm:$0xff]  }
 0x73b   : > { %v2048_v27 = vpop.xlane.xlu0 %2047 }
 0x73c   : > { %4538 = vrcp.f32 %v2048_v27  ;;  %v4361_v27 = vld [vmem:[%s4727_s8 + $0x28] sm:$0xff]  }
 0x73d   : > { %4540 = vrcp.f32 %v2045_v62  ;;  %v4535_v61 = vpop.eup %4534 }
 0x73e   : > { %4542 = vrcp.f32 %v2039_v54  ;;  %v2083_v63 = vmul.f32 %v4535_v61, %v5327_v47  ;;  %v4358_v54 = vld [vmem:[%s4727_s8 + $0x10] sm:$0xff]  }
 0x73f   : > { %v2042_v48 = vpop.xlane.xlu0 %2041  ;;  %v2063_v32 = vpop.xlane.xlu1 %2062 }
 0x740   : > { %4544 = vrcp.f32 %v2042_v48  ;;  %v4362_v48 = vld [vmem:[%s4727_s8 + $0x30] sm:$0xff]  }
 0x741   : > { %4546 = vrcp.f32 %v2063_v32  ;;  %v4363_v32 = vld [vmem:[%s4727_s8 + $0x38] sm:$0xff]  }
 0x742   : > { %v4537_v40 = vpop.eup %4536 }
 0x743   : > { %v2060_v57 = vpop.xlane.xlu0 %2059  ;;  %v2057_v38 = vpop.xlane.xlu1 %2056  ;;  %v2084_v39 = vmul.f32 %v4537_v40, %v5335_v26 }
 0x744   : > { %4548 = vrcp.f32 %v2060_v57 }
 0x745   : > { %4550 = vrcp.f32 %v2057_v38  ;;  %v2093_v0 = vpack.c.bf16 %v2084_v39, %v2084_v39 }
 0x746   : > { %v4539_v33 = vpop.eup %4538 }
 0x747   : > { %v4541_v34 = vpop.eup %4540  ;;  %v1683_v14 = vpop.permute.xlu0 %1682  ;;  %v2082_v36 = vmul.f32 %v4539_v33, %v5339_v10 }
 0x748   : > { %v1692_v50 = vpop.permute.xlu1 %1691  ;;  %v4543_v23 = vpop.eup %4542  ;;  %v1701_v46 = vpack.c.bf16 %v1683_v14, %v1683_v14  ;;  %v2081_v43 = vmul.f32 %v4541_v34, %v5319_v5 }
 0x749   : > { %v2092_v1 = vpack.c.bf16 %v2083_v63, %v2082_v36  ;;  %v2079_v10 = vmul.f32 %v4543_v23, %v5324_v55  ;;  %v1703_v7 = vpack.c.bf16 %v1692_v50, %v1692_v50 }
 0x74a   : > { %v4545_v16 = vpop.eup %4544  ;;  %v2217_v3 = vsel %vm1308_vm2, %v1701_v46, 0  ;;  %4193 = vmatprep.subr.msk.bf16.mxu0 %vm1308_vm2, %v1701_v46 }
 0x74b   : > { %v4281_v9 = vpop.permute.xlu0 %4280  ;;  %4131 = vmatprep.mubr.msk.bf16.mxu0 %vm1161_vm4, %v2092_v1  ;;  %4130 = vmatpush3.bf16.msra.mxu0 %v2217_v3  ;;  %v2080_v47 = vmul.f32 %v4545_v16, %v5343_v22  ;;  %v4547_v5 = vpop.eup %4546  ;;  %v2091_v22 = vpack.c.bf16 %v2081_v43, %v2081_v43 }
 0x74c   : > { %v4286_v24 = vpop.permute.xlu1 %4285  ;;  %v4283_v26 = vunpack.i.h.bf16 %v4281_v9  ;;  %v4282_v58 = vunpack.i.l.bf16 %v4281_v9  ;;  %4143 = vmatprep.subr.bf16.mxu0 %v4663_v12 }
 0x74d   : > { %v4288_v51 = vunpack.i.h.bf16 %v4286_v24  ;;  %v4287_v4 = vunpack.i.l.bf16 %v4286_v24  ;;  %v2090_v44 = vpack.c.bf16 %v2080_v47, %v2079_v10 }
 0x74e   : > { %v4549_v25 = vpop.eup %4548  ;;  %v1568_v19 = vsel %vm905_vm1, %v5209_v8, %v4283_v26  ;;  %v1567_v55 = vsel %vm905_vm1, %v5207_v41, %v4282_v58  ;;  %4132 = vmatmul.mubr.msk.bf16.vlgmr.msra.gmra.mrb[36].mxu0 %vm1161_vm4, %v2093_v0  ;;  %v2501_v0 = vsub.s32 2, %v4826_v2 }
 0x74f   : > { %v4551_v35 = vpop.eup %4550  ;;  %v4291_v59 = vpop.permute.xlu0 %4290  ;;  %4123 = vmatprep.mubr.msk.bf16.mxu1 %vm1161_vm4, %v2090_v44  ;;  %4144 = vmatpush3.bf16.msra.mxu0 %v4356_v13  ;;  %v2086_v18 = vmul.f32 %v4549_v25, %v5357_v6  ;;  %v1572_v42 = vsel %vm1570_vm5, %v1568_v19, %v4288_v51  ;;  %v1571_v37 = vsel %vm1570_vm5, %v1567_v55, %v4287_v4  ;;  %v5449_v4 = vld [vmem:[%s4747_s22] sm:$0xff] }
 0x750   : > { %v4293_v11 = vunpack.i.h.bf16 %v4291_v59  ;;  %v4292_v8 = vunpack.i.l.bf16 %v4291_v59  ;;  %4124 = vmatmul.mubr.msk.bf16.vlgmr.msra.gmra.mrb[40].mxu1 %vm1161_vm4, %v2091_v22  ;;  %4145 = vmatprep.subr.bf16.mxu0 %v4663_v12  ;;  %v2085_v41 = vmul.f32 %v4551_v35, %v5351_v31  ;;  %v2087_v6 = vmul.f32 %v4547_v5, %v5347_v56  ;;  %v4612_v5 = vld [vmem:[#allocation2 + $0x8] sm:$0xff]  ;;  %v4614_v25 = vld [vmem:[#allocation2] sm:$0xff] }
 0x751   : > { %4136 = vmatpush3.bf16.msra.mxu1 %v5349_v29  ;;  %4159 = vmatprep.mubr.msk.bf16.mxu0 %vm4665_vm0, %v4663_v12  ;;  %v2274_v29 = vsel %vm1308_vm2, %v1703_v7, 0 }
 0x752   : > { %v1575_v20 = vsel %vm1574_vm6, %v1571_v37, %v4292_v8  ;;  %v1576_v28 = vsel %vm1574_vm6, %v1572_v42, %v4293_v11  ;;  %4194 = vmatprep.subr.msk.bf16.mxu1 %vm1308_vm2, %v1703_v7  ;;  %v2094_v31 = vpack.c.bf16 %v2086_v18, %v2085_v41  ;;  %v2095_v56 = vpack.c.bf16 %v2087_v6, %v2087_v6 }
 0x753   : > { %v2369_v62 = vpack.c.bf16 %v1576_v28, %v1575_v20  ;;  %4146 = vmatpush3.bf16.msra.mxu0 %v4357_v15 }
 0x754   : > { %4139 = vmatprep.mubr.msk.bf16.mxu1 %vm1161_vm4, %v2094_v31  ;;  %4147 = vmatprep.subr.bf16.mxu0 %v4663_v12 }
 0x755   : > { %4138 = vmatpush3.bf16.msra.mxu1 %v2274_v29 }
 0x757   : > { %4148 = vmatpush3.bf16.msra.mxu0 %v4358_v54 }
 0x758   : > { %4140 = vmatmul.mubr.msk.bf16.vlgmr.msra.gmra.mrb[44].mxu1 %vm1161_vm4, %v2095_v56  ;;  %4149 = vmatprep.subr.bf16.mxu0 %v4663_v12 }
 0x759   : > { %2838 = vmatprep.mubr.bf16.mxu1 %v4664_v53 }
 0x75b   : > { %4150 = vmatpush3.bf16.msra.mxu0 %v4359_v49 }
 0x75c   : > { %4151 = vmatprep.subr.bf16.mxu0 %v4663_v12 }
 0x75f   : > { %4152 = vmatpush3.bf16.msra.mxu0 %v4360_v60 }
 0x760   : > { %4153 = vmatprep.subr.bf16.mxu0 %v4663_v12 }
 0x763   : > { %4154 = vmatpush3.bf16.msra.mxu0 %v4361_v27 }
 0x764   : > { %4155 = vmatprep.subr.bf16.mxu0 %v4663_v12 }
 0x767   : > { %4156 = vmatpush3.bf16.msra.mxu0 %v4362_v48 }
 0x768   : > { %4157 = vmatprep.subr.bf16.mxu0 %v4663_v12 }
 0x76b   : > { %4158 = vmatpush3.bf16.msra.mxu0 %v4363_v32 }
 0x76e   : > { %4160 = vmatmul.mubr.bf16.vlgmr.msra.gmra.mrb[40].mxu0 %v2369_v62 }
 0x76f   : > { %4163 = vmatprep.mubr.msk.bf16.mxu0 %vm4665_vm0, %v4663_v12 }
 0x7d1   : > { %v5434_v57 = vpop.f32.mrb[32].mxu0 }
 0x7d2   : > { %v2139_v38 = vpop.f32.mrb[33].mxu0 }
 0x7d3   : > { %v4118_v61 = vpop.f32.mrb[34].mxu0 }
 0x7d4   : > { %v5436_v40 = vpop.f32.mrb[35].mxu0 }
 0x821   : > { %v4133_v33 = vpop.f32.mrb[36].mxu0 }
 0x822   : > { %v2253_v34 = vpop.f32.mrb[37].mxu0 }
 0x823   : > { %v4299_v14 = vpack.i.bf16 %v2253_v34, %v5211_v45  ;;  %v4125_v50 = vpop.f32.mrb[40].mxu1  ;;  %v4134_v36 = vpop.f32.mrb[38].mxu0 }
 0x824   : > { %v2196_v63 = vpop.f32.mrb[41].mxu1  ;;  %v2256_v23 = vpop.f32.mrb[39].mxu0 }
 0x825   : > { %v4294_v39 = vpack.i.bf16 %v2196_v63, %v5219_v21  ;;  %v4314_v46 = vpack.i.bf16 %v4133_v33, %v2256_v23  ;;  %v4126_v1 = vpop.f32.mrb[42].mxu1  ;;  %4300 = vrot.lane.b32.xlu0 %v4299_v14, %s4668_s19 }
 0x826   : > { %v2199_v16 = vpop.f32.mrb[43].mxu1  ;;  %v4616_v1 = vld [vmem:[#allocation2 + $0x18] sm:$0xff] }
 0x827   : > { %v4309_v43 = vpack.i.bf16 %v4125_v50, %v2199_v16  ;;  %4295 = vrot.lane.b32.xlu1 %v4294_v39, %s4667_s17 }
 0x829   : > { %4310 = vrot.lane.b32.xlu0 %v4309_v43, %s4667_s17 }
 0x82b   : > { %v4141_v3 = vpop.f32.mrb[44].mxu1 }
 0x82c   : > { %v2310_v9 = vpop.f32.mrb[45].mxu1 }
 0x82d   : > { %v4304_v45 = vpack.i.bf16 %v2310_v9, %v5239_v52  ;;  %v4142_v24 = vpop.f32.mrb[46].mxu1  ;;  %v5452_v52 = vrot.slane %v5449_v4, %v2501_v0 }
 0x82e   : > { %v2313_v10 = vpop.f32.mrb[47].mxu1 }
 0x82f   : > { %v4319_v47 = vpack.i.bf16 %v4141_v3, %v2313_v10  ;;  %4305 = vrot.lane.b32.xlu1 %v4304_v45, %s4666_s12 }
 0x831   : > { %4320 = vrot.lane.b32.xlu0 %v4319_v47, %s4666_s12  ;;  %v4617_v47 = vld [vmem:[#allocation2 + $0x20] sm:$0xff] }
 0x833   : > { %4315 = vrot.lane.b32.xlu1 %v4314_v46, %s4668_s19 }
 0x841   : > { %v2470_v21 = vpop.f32.mrb[40].mxu0 }
 0x842   : > { %v4161_v13 = vpop.f32.mrb[41].mxu0  ;;  %v2493_v19 = vadd.f32 %v4614_v25, %v2470_v21 }
 0x843   : > { %v2473_v26 = vpop.f32.mrb[42].mxu0 }
 0x844   : > { %v4162_v58 = vpop.f32.mrb[43].mxu0  ;;  %v2494_v51 = vadd.f32 %v4612_v5, %v2473_v26  ;;  %v5459_v55 = vadd.f32 %v5452_v52, %v2493_v19  ;;  %v4618_v5 = vld [vmem:[#allocation2 + $0x28] sm:$0xff] }
 0x846   : > { %v5455_v44 = vadd.f32 %v5452_v52, %v2494_v51 }
 0x850   : > { %2511 = vadd.xlane.f32.xlu0 %v5455_v44 }
 0x857   : > { %2509 = vadd.xlane.f32.xlu1 %v5459_v55 }
 0x897   : > { %v4301_v35 = vpop.permute.xlu0 %4300 }
 0x898   : > { %v4303_v8 = vunpack.i.h.bf16 %v4301_v35  ;;  %v4302_v41 = vunpack.i.l.bf16 %v4301_v35 }
 0x899   : > { %v4296_v22 = vpop.permute.xlu1 %4295 }
 0x89a   : > { %v4298_v59 = vunpack.i.h.bf16 %v4296_v22  ;;  %v4297_v18 = vunpack.i.l.bf16 %v4296_v22 }
 0x89b   : > { %v4311_v11 = vpop.permute.xlu0 %4310 }
 0x89c   : > { %v2360_v15 = vsel %vm905_vm1, %v2139_v38, %v4298_v59  ;;  %v1569_v7 = vsel %vm905_vm1, %v5205_v30, %v4297_v18  ;;  %v4313_v20 = vunpack.i.h.bf16 %v4311_v11  ;;  %v4312_v28 = vunpack.i.l.bf16 %v4311_v11  ;;  %v4366_v18 = vld [vmem:[%s4737_s15 + $0x4] ss:$16 sps:$4 sm:$0xff]  }
 0x89d   : > { %v1573_v31 = vsel %vm1570_vm5, %v1569_v7, %v4302_v41  ;;  %v2363_v62 = vsel %vm1570_vm5, %v2360_v15, %v4303_v8  ;;  %v4369_v15 = vld [vmem:[%s4737_s15 + $0xc] ss:$16 sps:$4 sm:$0xff]   ;;  %v4367_v7 = vld [vmem:[%s4737_s15 + $0x8] ss:$16 sps:$4 sm:$0xff]   ;;  %2806 = vmatprep.subr.bf16.mxu1 %v4366_v18  ;;  %v4372_v11 = vld [vmem:[%s4737_s15 + $0x24] ss:$16 sps:$4 sm:$0xff]  }
 0x89e   : > { %v2362_v48 = vsel %vm905_vm1, %v5434_v57, %v4313_v20  ;;  %v2361_v32 = vsel %vm905_vm1, %v5436_v40, %v4312_v28  ;;  %v4615_v40 = vld [vmem:[#allocation2 + $0x10] sm:$0xff]  ;;  %2869 = vmatprep.subr.bf16.mxu0 %v4369_v15  ;;  %v4375_v8 = vld [vmem:[%s4737_s15 + $0x2c] ss:$16 sps:$4 sm:$0xff]   ;;  %v4379_v28 = vld [vmem:[%s4737_s15 + $0x48] ss:$16 sps:$4 sm:$0xff]  }
 0x89f   : > { %2870 = vmatpush1.bf16.msra.mxu0 %v4367_v7  ;;  %v4370_v41 = vld [vmem:[%s4737_s15 + $0x20] ss:$16 sps:$4 sm:$0xff]  }
 0x8a0   : > { %2871 = vmatprep.subr.bf16.mxu0 %v4375_v8  ;;  %v4376_v20 = vld [vmem:[%s4737_s15 + $0x40] ss:$16 sps:$4 sm:$0xff]  }
 0x8a1   : > { %v4306_v42 = vpop.permute.xlu1 %4305 }
 0x8a2   : > { %v4308_v37 = vunpack.i.h.bf16 %v4306_v42  ;;  %v4307_v6 = vunpack.i.l.bf16 %v4306_v42  ;;  %v4373_v42 = vld [vmem:[%s4737_s15 + $0x28] ss:$16 sps:$4 sm:$0xff]  }
 0x8a3   : > { %v4321_v54 = vpop.permute.xlu0 %4320  ;;  %2872 = vmatpush1.bf16.msra.mxu0 %v4373_v42 }
 0x8a4   : > { %v1577_v29 = vsel %vm1574_vm6, %v1573_v31, %v4307_v6  ;;  %v2366_v56 = vsel %vm1574_vm6, %v2363_v62, %v4308_v37  ;;  %v4323_v38 = vunpack.i.h.bf16 %v4321_v54  ;;  %v4322_v61 = vunpack.i.l.bf16 %v4321_v54  ;;  %v4378_v37 = vld [vmem:[%s4737_s15 + $0x44] ss:$16 sps:$4 sm:$0xff]   ;;  %v4381_v6 = vld [vmem:[%s4737_s15 + $0x4c] ss:$16 sps:$4 sm:$0xff]   ;;  %v4382_v54 = vld [vmem:[%s4737_s15 + $0x60] ss:$16 sps:$4 sm:$0xff]  }
 0x8a5   : > { %v4316_v49 = vpop.permute.xlu1 %4315  ;;  %v2370_v60 = vpack.c.bf16 %v2366_v56, %v1577_v29  ;;  %2873 = vmatprep.subr.bf16.mxu0 %v4381_v6  ;;  %v4384_v31 = vld [vmem:[%s4737_s15 + $0x64] ss:$16 sps:$4 sm:$0xff]   ;;  %v4387_v62 = vld [vmem:[%s4737_s15 + $0x6c] ss:$16 sps:$4 sm:$0xff]   ;;  %v4385_v29 = vld [vmem:[%s4737_s15 + $0x68] ss:$16 sps:$4 sm:$0xff]  }
 0x8a6   : > { %v4318_v30 = vunpack.i.h.bf16 %v4316_v49  ;;  %v4317_v27 = vunpack.i.l.bf16 %v4316_v49  ;;  %v4390_v56 = vld [vmem:[%s4737_s15 + $0x84] ss:$16 sps:$4 sm:$0xff]   ;;  %v4393_v49 = vld [vmem:[%s4737_s15 + $0x8c] ss:$16 sps:$4 sm:$0xff]  }
 0x8a7   : > { %4164 = vmatmul.mubr.bf16.gmra.mrb[44].mxu0 %v2370_v60  ;;  %v4388_v60 = vld [vmem:[%s4737_s15 + $0x80] ss:$16 sps:$4 sm:$0xff]  }
 0x8a8   : > { %v2365_v33 = vsel %vm1570_vm5, %v2362_v48, %v4318_v30  ;;  %v2364_v34 = vsel %vm1570_vm5, %v2361_v32, %v4317_v27  ;;  %4167 = vmatprep.mubr.msk.bf16.mxu0 %vm4665_vm0, %v4663_v12  ;;  %2874 = vmatpush1.bf16.msra.mxu0 %v4379_v28  ;;  %v4391_v30 = vld [vmem:[%s4737_s15 + $0x88] ss:$16 sps:$4 sm:$0xff]   ;;  %v4396_v27 = vld [vmem:[%s4737_s15 + $0xa4] ss:$16 sps:$4 sm:$0xff]   ;;  %v4399_v48 = vld [vmem:[%s4737_s15 + $0xac] ss:$16 sps:$4 sm:$0xff]  }
 0x8a9   : > { %v2367_v14 = vsel %vm1574_vm6, %v2364_v34, %v4322_v61  ;;  %v2368_v50 = vsel %vm1574_vm6, %v2365_v33, %v4323_v38  ;;  %2875 = vmatprep.subr.bf16.mxu0 %v4387_v62  ;;  %v4394_v32 = vld [vmem:[%s4737_s15 + $0xa0] ss:$16 sps:$4 sm:$0xff]   ;;  %v4397_v38 = vld [vmem:[%s4737_s15 + $0xa8] ss:$16 sps:$4 sm:$0xff]   ;;  %v4402_v33 = vld [vmem:[%s4737_s15 + $0xc4] ss:$16 sps:$4 sm:$0xff]  }
 0x8aa   : > { %v2371_v36 = vpack.c.bf16 %v2368_v50, %v2367_v14  ;;  %v4400_v61 = vld [vmem:[%s4737_s15 + $0xc0] ss:$16 sps:$4 sm:$0xff]   ;;  %v4403_v34 = vld [vmem:[%s4737_s15 + $0xc8] ss:$16 sps:$4 sm:$0xff]   ;;  %v4405_v14 = vld [vmem:[%s4737_s15 + $0xcc] ss:$16 sps:$4 sm:$0xff]  }
 0x8ab   : > { %v4408_v50 = vld [vmem:[%s4737_s15 + $0xe4] ss:$16 sps:$4 sm:$0xff]  }
 0x8ac   : > { %2876 = vmatpush1.bf16.msra.mxu0 %v4385_v29  ;;  %v4415_v29 = vld [vmem:[%s4742_s18 + $0x80] sm:$0xff]  }
 0x8ad   : > { %2877 = vmatprep.subr.bf16.mxu0 %v4393_v49  ;;  %v4417_v49 = vld [vmem:[%s4742_s18 + $0xc8] sm:$0xff]  }
 0x8af   : > { %4168 = vmatmul.mubr.bf16.gmra.mrb[48].mxu0 %v2371_v36  ;;  %v4411_v36 = vld [vmem:[%s4737_s15 + $0xec] ss:$16 sps:$4 sm:$0xff]  }
 0x8b0   : > { %2901 = vmatprep.mubr.bf16.mxu0 %v4664_v53  ;;  %2878 = vmatpush1.bf16.msra.mxu0 %v4391_v30  ;;  %v4419_v30 = vld [vmem:[%s4742_s18 + $0x88] sm:$0xff]  }
 0x8b1   : > { %2879 = vmatprep.subr.bf16.mxu0 %v4399_v48  ;;  %v4421_v48 = vld [vmem:[%s4742_s18 + $0xd0] sm:$0xff]  }
 0x8b4   : > { %2880 = vmatpush1.bf16.msra.mxu0 %v4397_v38  ;;  %v4423_v38 = vld [vmem:[%s4742_s18 + $0x90] sm:$0xff]  }
 0x8b5   : > { %2881 = vmatprep.subr.bf16.mxu0 %v4405_v14  ;;  %v4427_v14 = vld [vmem:[%s4742_s18 + $0x98] sm:$0xff]  }
 0x8b8   : > { %2882 = vmatpush1.bf16.msra.mxu0 %v4403_v34  ;;  %v4426_v34 = vld [vmem:[%s4742_s18 + $0x18] sm:$0xff]  }
 0x8b9   : > { %2883 = vmatprep.subr.bf16.mxu0 %v4411_v36  ;;  %v4429_v36 = vld [vmem:[%s4742_s18 + $0xe0] sm:$0xff]  }
 0x8dd   : > { %v2512_v3 = vpop.xlane.xlu0 %2511 }
 0x8de   : > { %v2522_v10 = vmul.f32 0.0078125, %v2512_v3 }
 0x8e0   : > { %v5495_v19 = vsub.f32 %v5455_v44, %v2522_v10 }
 0x8e2   : > { %v2534_v59 = vmul.f32 %v5495_v19, %v5495_v19 }
 0x8e4   : > { %v2510_v12 = vpop.xlane.xlu1 %2509 }
 0x8e5   : > { %v2521_v9 = vmul.f32 0.0078125, %v2510_v12 }
 0x8e7   : > { %v5489_v58 = vsub.f32 %v5459_v55, %v2521_v9 }
 0x8e9   : > { %v2533_v35 = vmul.f32 %v5489_v58, %v5489_v58 }
 0x97a   : > { %v2478_v57 = vpop.f32.mrb[44].mxu0 }
 0x97b   : > { %v2495_v63 = vadd.f32 %v4615_v40, %v2478_v57  ;;  %v4165_v23 = vpop.f32.mrb[45].mxu0  ;;  %v4406_v57 = vld [vmem:[%s4737_s15 + $0xe0] ss:$16 sps:$4 sm:$0xff]   ;;  %v4409_v40 = vld [vmem:[%s4737_s15 + $0xe8] ss:$16 sps:$4 sm:$0xff]  }
 0x97c   : > { %v2481_v39 = vpop.f32.mrb[46].mxu0  ;;  %2884 = vmatpush1.bf16.msra.mxu0 %v4409_v40  ;;  %v4431_v40 = vld [vmem:[%s4742_s18 + $0xa0] sm:$0xff]  }
 0x97d   : > { %v5481_v46 = vadd.f32 %v5452_v52, %v2495_v63  ;;  %v2496_v16 = vadd.f32 %v4616_v1, %v2481_v39  ;;  %v4166_v43 = vpop.f32.mrb[47].mxu0 }
 0x97f   : > { %2513 = vadd.xlane.f32.xlu0 %v5481_v46  ;;  %v5485_v45 = vadd.f32 %v5452_v52, %v2496_v16 }
 0x982   : > { %v2486_v24 = vpop.f32.mrb[48].mxu0 }
 0x983   : > { %v2497_v21 = vadd.f32 %v4617_v47, %v2486_v24  ;;  %2515 = vadd.xlane.f32.xlu0 %v5485_v45  ;;  %v4169_v13 = vpop.f32.mrb[49].mxu0 }
 0x984   : > { %v2489_v26 = vpop.f32.mrb[50].mxu0 }
 0x985   : > { %v5492_v0 = vadd.f32 %v5452_v52, %v2497_v21  ;;  %v2498_v51 = vadd.f32 %v4618_v5, %v2489_v26  ;;  %v4170_v25 = vpop.f32.mrb[51].mxu0 }
 0x987   : > { %v5498_v22 = vadd.f32 %v5452_v52, %v2498_v51  ;;  %2517 = vadd.xlane.f32.xlu1 %v5492_v0  ;;  %v4364_v52 = vld [vmem:[%s4737_s15] ss:$16 sps:$4 sm:$0xff]  }
 0x988   : > { %2807 = vmatpush1.bf16.msra.mxu1 %v4364_v52  ;;  %v2577_v52 = vsub.s32 3, %v4826_v2 }
 0x989   : > { %2519 = vadd.xlane.f32.xlu0 %v5498_v22  ;;  %2808 = vmatprep.subr.bf16.mxu1 %v4372_v11  ;;  %v2587_v11 = vsub.s32 4, %v4826_v2 }
 0x98a   : > { %v5560_v7 = vrot.slane %v5449_v4, %v2577_v52  ;;  %v4443_v52 = vld [vmem:[%s4742_s18 + $0xb8] sm:$0xff]  }
 0x98b   : > { %2539 = vadd.xlane.f32.xlu1 %v2533_v35 }
 0x98c   : > { %2809 = vmatpush1.bf16.msra.mxu1 %v4370_v41 }
 0x98d   : > { %2541 = vadd.xlane.f32.xlu0 %v2534_v59  ;;  %2810 = vmatprep.subr.bf16.mxu1 %v4378_v37 }
 0x990   : > { %2811 = vmatpush1.bf16.msra.mxu1 %v4376_v20  ;;  %v5567_v20 = vrot.slane %v5449_v4, %v2587_v11  ;;  %v4413_v4 = vld [vmem:[%s4742_s18 + $0xc0] sm:$0xff]  }
 0x991   : > { %2812 = vmatprep.subr.bf16.mxu1 %v4384_v31  ;;  %3953 = vmatprep.subr.bf16.mxu0 %v4413_v4 }
 0x994   : > { %2813 = vmatpush1.bf16.msra.mxu1 %v4382_v54 }
 0x995   : > { %2814 = vmatprep.subr.bf16.mxu1 %v4390_v56  ;;  %v4416_v56 = vld [vmem:[%s4742_s18 + $0x48] sm:$0xff]  }
 0x998   : > { %2815 = vmatpush1.bf16.msra.mxu1 %v4388_v60  ;;  %v4418_v60 = vld [vmem:[%s4742_s18 + $0x8] sm:$0xff]  }
 0x999   : > { %2816 = vmatprep.subr.bf16.mxu1 %v4396_v27  ;;  %v4420_v27 = vld [vmem:[%s4742_s18 + $0x50] sm:$0xff]  }
 0x99c   : > { %2817 = vmatpush1.bf16.msra.mxu1 %v4394_v32  ;;  %v4422_v32 = vld [vmem:[%s4742_s18 + $0x10] sm:$0xff]  }
 0x99d   : > { %2818 = vmatprep.subr.bf16.mxu1 %v4402_v33  ;;  %v4425_v33 = vld [vmem:[%s4742_s18 + $0xd8] sm:$0xff]  }
 0x9a0   : > { %2819 = vmatpush1.bf16.msra.mxu1 %v4400_v61  ;;  %v4424_v61 = vld [vmem:[%s4742_s18 + $0x58] sm:$0xff]  }
 0x9a1   : > { %2820 = vmatprep.subr.bf16.mxu1 %v4408_v50  ;;  %v4428_v50 = vld [vmem:[%s4742_s18 + $0x60] sm:$0xff]  }
 0x9a4   : > { %2821 = vmatpush1.bf16.msra.mxu1 %v4406_v57  ;;  %v4430_v57 = vld [vmem:[%s4742_s18 + $0x20] sm:$0xff]  }
 0xa0c   : > { %v2514_v63 = vpop.xlane.xlu0 %2513 }
 0xa0d   : > { %v2523_v23 = vmul.f32 0.0078125, %v2514_v63  ;;  %v4432_v63 = vld [vmem:[%s4742_s18 + $0x68] sm:$0xff]  }
 0xa0f   : > { %v5539_v39 = vsub.f32 %v5481_v46, %v2523_v23  ;;  %v4433_v23 = vld [vmem:[%s4742_s18 + $0xe8] sm:$0xff]  }
 0xa10   : > { %v2516_v1 = vpop.xlane.xlu0 %2515 }
 0xa11   : > { %v2524_v16 = vmul.f32 0.0078125, %v2516_v1  ;;  %v2535_v43 = vmul.f32 %v5539_v39, %v5539_v39 }
 0xa13   : > { %v5544_v12 = vsub.f32 %v5485_v45, %v2524_v16  ;;  %2543 = vadd.xlane.f32.xlu1 %v2535_v43  ;;  %v4434_v16 = vld [vmem:[%s4742_s18 + $0x28] sm:$0xff]  }
 0xa14   : > { %v2518_v3 = vpop.xlane.xlu1 %2517  ;;  %v4435_v43 = vld [vmem:[%s4742_s18 + $0xa8] sm:$0xff]  }
 0xa15   : > { %v2525_v9 = vmul.f32 0.0078125, %v2518_v3  ;;  %v2536_v24 = vmul.f32 %v5544_v12, %v5544_v12 }
 0xa16   : > { %v2520_v10 = vpop.xlane.xlu0 %2519 }
 0xa17   : > { %v5549_v47 = vsub.f32 %v5492_v0, %v2525_v9  ;;  %v2526_v21 = vmul.f32 0.0078125, %v2520_v10  ;;  %2545 = vadd.xlane.f32.xlu0 %v2536_v24  ;;  %v4436_v24 = vld [vmem:[%s4742_s18 + $0x70] sm:$0xff]  }
 0xa18   : > { %v2540_v13 = vpop.xlane.xlu1 %2539  ;;  %v4437_v10 = vld [vmem:[%s4742_s18 + $0xf0] sm:$0xff]  }
 0xa19   : > { %v5552_v26 = vsub.f32 %v5498_v22, %v2526_v21  ;;  %v2551_v5 = vmul.f32 0.0078125, %v2540_v13  ;;  %v2537_v51 = vmul.f32 %v5549_v47, %v5549_v47  ;;  %v4438_v13 = vld [vmem:[%s4742_s18 + $0x30] sm:$0xff]  }
 0xa1a   : > { %v2542_v25 = vpop.xlane.xlu0 %2541 }
 0xa1b   : > { %v2557_v35 = vadd.f32 1e-06, %v2551_v5  ;;  %v2552_v59 = vmul.f32 0.0078125, %v2542_v25  ;;  %2547 = vadd.xlane.f32.xlu1 %v2537_v51  ;;  %v2538_v18 = vmul.f32 %v5552_v26, %v5552_v26  ;;  %v4439_v5 = vld [vmem:[%s4742_s18 + $0xb0] sm:$0xff]  }
 0xa1d   : > { %4552 = vrsqrt.f32 %v2557_v35  ;;  %v2558_v15 = vadd.f32 1e-06, %v2552_v59  ;;  %2549 = vadd.xlane.f32.xlu0 %v2538_v18  ;;  %v4440_v35 = vld [vmem:[%s4742_s18 + $0x78] sm:$0xff]  }
 0xa1e   : > { %v4441_v59 = vld [vmem:[%s4742_s18 + $0xf8] sm:$0xff]  }
 0xa1f   : > { %4554 = vrsqrt.f32 %v2558_v15  ;;  %v4442_v15 = vld [vmem:[%s4742_s18 + $0x38] sm:$0xff]  }
 0xa27   : > { %v4553_v8 = vpop.eup %4552 }
 0xa28   : > { %v2569_v41 = vmul.f32 %v4553_v8, %v5489_v58  ;;  %v4412_v58 = vld [vmem:[%s4742_s18 + $0x40] sm:$0xff]  }
 0xa29   : > { %v4555_v42 = vpop.eup %4554  ;;  %3919 = vmatprep.subr.bf16.mxu1 %v4412_v58 }
 0xa2a   : > { %v2570_v37 = vmul.f32 %v4555_v42, %v5495_v19  ;;  %v2579_v6 = vmul.f32 %v5560_v7, %v2569_v41  ;;  %v4414_v19 = vld [vmem:[%s4742_s18] sm:$0xff]  }
 0xa2c   : > { %v2580_v28 = vmul.f32 %v5560_v7, %v2570_v37  ;;  %v2589_v31 = vadd.f32 %v5567_v20, %v2579_v6 }
 0xa2e   : > { %v2590_v62 = vadd.f32 %v5567_v20, %v2580_v28 }
 0xa30   : > { %v2595_v54 = vpack.c.bf16 %v2590_v62, %v2589_v31 }
 0xa32   : > { %2839 = vmatmul.mubr.bf16.vlgmr.msra.gmra.mrb[48].mxu1 %v2595_v54  ;;  %2902 = vmatmul.mubr.bf16.vlgmr.msra.gmra.mrb[52].mxu0 %v2595_v54 }
 0xa33   : > { %2848 = vmatprep.mubr.bf16.mxu1 %v4664_v53  ;;  %2911 = vmatprep.mubr.bf16.mxu0 %v4664_v53 }
 0xa34   : > { %3920 = vmatpush3.bf16.msra.mxu1 %v4414_v19  ;;  %3954 = vmatpush3.bf16.msra.mxu0 %v4415_v29 }
 0xa35   : > { %3921 = vmatprep.subr.bf16.mxu1 %v4416_v56  ;;  %3955 = vmatprep.subr.bf16.mxu0 %v4417_v49 }
 0xa38   : > { %3922 = vmatpush3.bf16.msra.mxu1 %v4418_v60  ;;  %3956 = vmatpush3.bf16.msra.mxu0 %v4419_v30 }
 0xa39   : > { %3923 = vmatprep.subr.bf16.mxu1 %v4420_v27  ;;  %3957 = vmatprep.subr.bf16.mxu0 %v4421_v48 }
 0xa3c   : > { %3924 = vmatpush3.bf16.msra.mxu1 %v4422_v32  ;;  %3958 = vmatpush3.bf16.msra.mxu0 %v4423_v38 }
 0xa3d   : > { %3925 = vmatprep.subr.bf16.mxu1 %v4424_v61  ;;  %3959 = vmatprep.subr.bf16.mxu0 %v4425_v33 }
 0xa40   : > { %3926 = vmatpush3.bf16.msra.mxu1 %v4426_v34  ;;  %3960 = vmatpush3.bf16.msra.mxu0 %v4427_v14 }
 0xa41   : > { %3927 = vmatprep.subr.bf16.mxu1 %v4428_v50  ;;  %3961 = vmatprep.subr.bf16.mxu0 %v4429_v36 }
 0xa44   : > { %3928 = vmatpush3.bf16.msra.mxu1 %v4430_v57  ;;  %3962 = vmatpush3.bf16.msra.mxu0 %v4431_v40 }
 0xa45   : > { %3929 = vmatprep.subr.bf16.mxu1 %v4432_v63  ;;  %3963 = vmatprep.subr.bf16.mxu0 %v4433_v23 }
 0xa48   : > { %3930 = vmatpush3.bf16.msra.mxu1 %v4434_v16  ;;  %3964 = vmatpush3.bf16.msra.mxu0 %v4435_v43 }
 0xa49   : > { %3931 = vmatprep.subr.bf16.mxu1 %v4436_v24  ;;  %3965 = vmatprep.subr.bf16.mxu0 %v4437_v10 }
 0xa4c   : > { %3932 = vmatpush3.bf16.msra.mxu1 %v4438_v13  ;;  %3966 = vmatpush3.bf16.msra.mxu0 %v4439_v5 }
 0xa4d   : > { %3933 = vmatprep.subr.bf16.mxu1 %v4440_v35  ;;  %3967 = vmatprep.subr.bf16.mxu0 %v4441_v59 }
 0xa50   : > { %3934 = vmatpush3.bf16.msra.mxu1 %v4442_v15  ;;  %3968 = vmatpush3.bf16.msra.mxu0 %v4443_v52 }
 0xaa0   : > { %v2544_v1 = vpop.xlane.xlu1 %2543 }
 0xaa1   : > { %v2553_v3 = vmul.f32 0.0078125, %v2544_v1 }
 0xaa3   : > { %v2559_v9 = vadd.f32 1e-06, %v2553_v3 }
 0xaa4   : > { %v2546_v21 = vpop.xlane.xlu0 %2545 }
 0xaa5   : > { %4556 = vrsqrt.f32 %v2559_v9  ;;  %v2554_v51 = vmul.f32 0.0078125, %v2546_v21 }
 0xaa7   : > { %v2560_v25 = vadd.f32 1e-06, %v2554_v51 }
 0xaa8   : > { %v2548_v18 = vpop.xlane.xlu1 %2547 }
 0xaa9   : > { %4558 = vrsqrt.f32 %v2560_v25  ;;  %v2555_v11 = vmul.f32 0.0078125, %v2548_v18 }
 0xaaa   : > { %v2550_v8 = vpop.xlane.xlu0 %2549 }
 0xaab   : > { %v2561_v41 = vadd.f32 1e-06, %v2555_v11  ;;  %v2556_v42 = vmul.f32 0.0078125, %v2550_v8 }
 0xaad   : > { %4560 = vrsqrt.f32 %v2561_v41  ;;  %v2562_v37 = vadd.f32 1e-06, %v2556_v42 }
 0xaaf   : > { %v4557_v6 = vpop.eup %4556  ;;  %4562 = vrsqrt.f32 %v2562_v37 }
 0xab0   : > { %v2571_v28 = vmul.f32 %v4557_v6, %v5539_v39 }
 0xab2   : > { %v2581_v54 = vmul.f32 %v5560_v7, %v2571_v28 }
 0xab3   : > { %v4559_v31 = vpop.eup %4558 }
 0xab4   : > { %v2572_v62 = vmul.f32 %v4559_v31, %v5544_v12  ;;  %v2591_v19 = vadd.f32 %v5567_v20, %v2581_v54 }
 0xab6   : > { %v2582_v58 = vmul.f32 %v5560_v7, %v2572_v62 }
 0xab7   : > { %v4561_v4 = vpop.eup %4560 }
 0xab8   : > { %v2592_v29 = vadd.f32 %v5567_v20, %v2582_v58  ;;  %v2573_v56 = vmul.f32 %v4561_v4, %v5549_v47  ;;  %v4619_v47 = vld [vmem:[%s4747_s22 + $0x8] sm:$0xff] }
 0xab9   : > { %v4563_v49 = vpop.eup %4562  ;;  %v367_v38 = vrot.slane %v4619_v47, 2  ;;  %v369_v61 = vrot.slane %v4619_v47, 3  ;;  %v5622_v33 = vrot.slane %v4619_v47, %v4834_v17 }
 0xaba   : > { %v2596_v60 = vpack.c.bf16 %v2592_v29, %v2591_v19  ;;  %v2574_v30 = vmul.f32 %v4563_v49, %v5552_v26  ;;  %v2583_v39 = vmul.f32 %v5560_v7, %v2573_v56  ;;  %v365_v26 = vrot.slane %v4619_v47, 1 }
 0xabc   : > { %2849 = vmatmul.mubr.bf16.gmra.mrb[52].mxu1 %v2596_v60  ;;  %2912 = vmatmul.mubr.bf16.gmra.mrb[56].mxu0 %v2596_v60  ;;  %v2584_v12 = vmul.f32 %v5560_v7, %v2574_v30  ;;  %v2593_v48 = vadd.f32 %v5567_v20, %v2583_v39  ;;  %v5625_v7 = vrot.slane %v367_v38, %v4834_v17 }
 0xabd   : > { %2858 = vmatprep.mubr.bf16.mxu1 %v4664_v53  ;;  %2921 = vmatprep.mubr.bf16.mxu0 %v4664_v53  ;;  %v5628_v34 = vrot.slane %v365_v26, %v4834_v17  ;;  %v5631_v53 = vrot.slane %v369_v61, %v4834_v17 }
 0xabe   : > { %v2594_v27 = vadd.f32 %v5567_v20, %v2584_v12 }
 0xac0   : > { %v2597_v32 = vpack.c.bf16 %v2594_v27, %v2593_v48 }
 0xac4   : > { %2859 = vmatmul.mubr.bf16.gmra.mrb[56].mxu1 %v2597_v32  ;;  %2922 = vmatmul.mubr.bf16.gmra.mrb[60].mxu0 %v2597_v32 }
 0xb05   : > { %v2840_v20 = vpop.f32.mrb[48].mxu1  ;;  %v2903_v14 = vpop.f32.mrb[52].mxu0 }
 0xb06   : > { %v5634_v50 = vadd.f32 %v2840_v20, %v5622_v33  ;;  %v5637_v36 = vadd.f32 %v2903_v14, %v5625_v7  ;;  %v2842_v57 = vpop.f32.mrb[49].mxu1  ;;  %v2905_v40 = vpop.f32.mrb[53].mxu0 }
 0xb07   : > { %v5640_v63 = vadd.f32 %v2842_v57, %v5628_v34  ;;  %v5643_v23 = vadd.f32 %v2905_v40, %v5631_v53  ;;  %v2844_v1 = vpop.f32.mrb[50].mxu1  ;;  %v2907_v16 = vpop.f32.mrb[54].mxu0 }
 0xb08   : > { %v2932_v17 = vmul.f32 %v5634_v50, %v5634_v50  ;;  %v2934_v43 = vmul.f32 %v5637_v36, %v5637_v36  ;;  %v5650_v3 = vadd.f32 %v2844_v1, %v5622_v33  ;;  %v5653_v9 = vadd.f32 %v2907_v16, %v5625_v7  ;;  %v2846_v24 = vpop.f32.mrb[51].mxu1  ;;  %v2909_v10 = vpop.f32.mrb[55].mxu0 }
 0xb09   : > { %v2933_v21 = vmul.f32 %v5640_v63, %v5640_v63  ;;  %v2935_v13 = vmul.f32 %v5643_v23, %v5643_v23  ;;  %v5660_v5 = vadd.f32 %v2846_v24, %v5628_v34  ;;  %v5663_v51 = vadd.f32 %v2909_v10, %v5631_v53 }
 0xb0a   : > { %v2956_v25 = vmul.f32 %v2932_v17, %v5634_v50  ;;  %v2958_v35 = vmul.f32 %v2934_v43, %v5637_v36  ;;  %v2936_v59 = vmul.f32 %v5650_v3, %v5650_v3  ;;  %v2938_v18 = vmul.f32 %v5653_v9, %v5653_v9 }
 0xb0b   : > { %v2957_v15 = vmul.f32 %v2933_v21, %v5640_v63  ;;  %v2959_v52 = vmul.f32 %v2935_v13, %v5643_v23  ;;  %v2937_v11 = vmul.f32 %v5660_v5, %v5660_v5  ;;  %v2939_v8 = vmul.f32 %v5663_v51, %v5663_v51 }
 0xb0c   : > { %v2980_v41 = vmul.f32 0.044715, %v2956_v25  ;;  %v2982_v42 = vmul.f32 0.044715, %v2958_v35  ;;  %v2960_v37 = vmul.f32 %v2936_v59, %v5650_v3  ;;  %v2962_v6 = vmul.f32 %v2938_v18, %v5653_v9 }
 0xb0d   : > { %v2981_v28 = vmul.f32 0.044715, %v2957_v15  ;;  %v2983_v31 = vmul.f32 0.044715, %v2959_v52  ;;  %v2961_v62 = vmul.f32 %v2937_v11, %v5660_v5  ;;  %v2963_v54 = vmul.f32 %v2939_v8, %v5663_v51 }
 0xb0e   : > { %v3004_v58 = vadd.f32 %v2980_v41, %v5634_v50  ;;  %v3006_v4 = vadd.f32 %v2982_v42, %v5637_v36  ;;  %v2984_v19 = vmul.f32 0.044715, %v2960_v37  ;;  %v2986_v29 = vmul.f32 0.044715, %v2962_v6 }
 0xb0f   : > { %v3005_v56 = vadd.f32 %v2981_v28, %v5640_v63  ;;  %v3007_v49 = vadd.f32 %v2983_v31, %v5643_v23  ;;  %v2985_v60 = vmul.f32 0.044715, %v2961_v62  ;;  %v2987_v30 = vmul.f32 0.044715, %v2963_v54 }
 0xb10   : > { %v3028_v39 = vmul.f32 0.7978846, %v3004_v58  ;;  %v3030_v12 = vmul.f32 0.7978846, %v3006_v4  ;;  %v3008_v27 = vadd.f32 %v2984_v19, %v5650_v3  ;;  %v3010_v48 = vadd.f32 %v2986_v29, %v5653_v9 }
 0xb11   : > { %v3029_v32 = vmul.f32 0.7978846, %v3005_v56  ;;  %v3031_v47 = vmul.f32 0.7978846, %v3007_v49  ;;  %v3009_v38 = vadd.f32 %v2985_v60, %v5660_v5  ;;  %v3011_v26 = vadd.f32 %v2987_v30, %v5663_v51 }
 0xb12   : > { %4564 = vtanh.f32 %v3028_v39  ;;  %v3032_v61 = vmul.f32 0.7978846, %v3008_v27  ;;  %v3034_v20 = vmul.f32 0.7978846, %v3010_v48 }
 0xb13   : > { %4566 = vtanh.f32 %v3030_v12  ;;  %v3033_v14 = vmul.f32 0.7978846, %v3009_v38  ;;  %v3035_v57 = vmul.f32 0.7978846, %v3011_v26 }
 0xb14   : > { %4568 = vtanh.f32 %v3029_v32 }
 0xb15   : > { %4570 = vtanh.f32 %v3031_v47 }
 0xb16   : > { %4572 = vtanh.f32 %v3032_v61 }
 0xb17   : > { %4574 = vtanh.f32 %v3034_v20 }
 0xb18   : > { %4576 = vtanh.f32 %v3033_v14 }
 0xb19   : > { %4578 = vtanh.f32 %v3035_v57 }
 0xb1c   : > { %v4565_v40 = vpop.eup %4564 }
 0xb1d   : > { %v4567_v1 = vpop.eup %4566  ;;  %v3076_v16 = vadd.f32 1.0, %v4565_v40 }
 0xb1e   : > { %v4569_v17 = vpop.eup %4568  ;;  %v3078_v43 = vadd.f32 1.0, %v4567_v1 }
 0xb1f   : > { %v4571_v24 = vpop.eup %4570  ;;  %v3077_v10 = vadd.f32 1.0, %v4569_v17  ;;  %v3100_v35 = vmul.f32 0.5, %v3076_v16 }
 0xb20   : > { %v4573_v21 = vpop.eup %4572  ;;  %v3079_v13 = vadd.f32 1.0, %v4571_v24  ;;  %v3102_v15 = vmul.f32 0.5, %v3078_v43 }
 0xb21   : > { %v4575_v25 = vpop.eup %4574  ;;  %v3080_v59 = vadd.f32 1.0, %v4573_v21  ;;  %v3101_v42 = vmul.f32 0.5, %v3077_v10  ;;  %v3124_v31 = vmul.f32 %v3100_v35, %v5634_v50 }
 0xb22   : > { %v4577_v18 = vpop.eup %4576  ;;  %v3082_v52 = vadd.f32 1.0, %v4575_v25  ;;  %v3103_v28 = vmul.f32 0.5, %v3079_v13  ;;  %v3126_v58 = vmul.f32 %v3102_v15, %v5637_v36 }
 0xb23   : > { %v4579_v11 = vpop.eup %4578  ;;  %v3104_v8 = vmul.f32 0.5, %v3080_v59  ;;  %v3081_v41 = vadd.f32 1.0, %v4577_v18  ;;  %v3125_v56 = vmul.f32 %v3101_v42, %v5640_v63 }
 0xb24   : > { %v3106_v37 = vmul.f32 0.5, %v3082_v52  ;;  %v3083_v6 = vadd.f32 1.0, %v4579_v11  ;;  %v3127_v30 = vmul.f32 %v3103_v28, %v5643_v23 }
 0xb25   : > { %v3128_v62 = vmul.f32 %v3104_v8, %v5650_v3  ;;  %v3105_v54 = vmul.f32 0.5, %v3081_v41 }
 0xb26   : > { %v3130_v4 = vmul.f32 %v3106_v37, %v5653_v9  ;;  %v3107_v19 = vmul.f32 0.5, %v3083_v6 }
 0xb27   : > { %v3148_v29 = vpack.c.bf16 %v3128_v62, %v3124_v31  ;;  %v3129_v49 = vmul.f32 %v3105_v54, %v5660_v5 }
 0xb28   : > { %v3150_v60 = vpack.c.bf16 %v3130_v4, %v3126_v58  ;;  %v3131_v39 = vmul.f32 %v3107_v19, %v5663_v51 }
 0xb29   : > { %v3149_v12 = vpack.c.bf16 %v3129_v49, %v3125_v56 }
 0xb2a   : > { %v3151_v50 = vpack.c.bf16 %v3131_v39, %v3127_v30 }
 0xb2b   : > { %3452 = vmatprep.mubr.bf16.mxu1 %v3149_v12 }
 0xb2c   : > { %3509 = vmatprep.mubr.bf16.mxu0 %v3151_v50  ;;  %3453 = vmatmul.mubr.bf16.vlgmr.msra.gmra.mrb[60].mxu1 %v3148_v29 }
 0xb2d   : > { %3510 = vmatmul.mubr.bf16.vlgmr.msra.gmra.mrb[64].mxu0 %v3150_v60 }
 0xb8f   : > { %v2850_v36 = vpop.f32.mrb[52].mxu1  ;;  %v2913_v3 = vpop.f32.mrb[56].mxu0 }
 0xb90   : > { %v5698_v9 = vadd.f32 %v2850_v36, %v5622_v33  ;;  %v5701_v63 = vadd.f32 %v2913_v3, %v5625_v7  ;;  %v2852_v5 = vpop.f32.mrb[53].mxu1  ;;  %v2915_v27 = vpop.f32.mrb[57].mxu0 }
 0xb91   : > { %v5704_v23 = vadd.f32 %v2852_v5, %v5628_v34  ;;  %v5707_v51 = vadd.f32 %v2915_v27, %v5631_v53  ;;  %v2854_v48 = vpop.f32.mrb[54].mxu1  ;;  %v2917_v32 = vpop.f32.mrb[58].mxu0 }
 0xb92   : > { %v2940_v47 = vmul.f32 %v5698_v9, %v5698_v9  ;;  %v2942_v38 = vmul.f32 %v5701_v63, %v5701_v63  ;;  %v5714_v26 = vadd.f32 %v2854_v48, %v5622_v33  ;;  %v5717_v61 = vadd.f32 %v2917_v32, %v5625_v7  ;;  %v2856_v20 = vpop.f32.mrb[55].mxu1  ;;  %v2919_v14 = vpop.f32.mrb[59].mxu0 }
 0xb93   : > { %v2941_v57 = vmul.f32 %v5704_v23, %v5704_v23  ;;  %v2943_v40 = vmul.f32 %v5707_v51, %v5707_v51  ;;  %v5724_v1 = vadd.f32 %v2856_v20, %v5628_v34  ;;  %v5727_v16 = vadd.f32 %v2919_v14, %v5631_v53 }
 0xb94   : > { %v2964_v17 = vmul.f32 %v2940_v47, %v5698_v9  ;;  %v2966_v43 = vmul.f32 %v2942_v38, %v5701_v63  ;;  %v2944_v24 = vmul.f32 %v5714_v26, %v5714_v26  ;;  %v2946_v10 = vmul.f32 %v5717_v61, %v5717_v61 }
 0xb95   : > { %v2965_v21 = vmul.f32 %v2941_v57, %v5704_v23  ;;  %v2967_v13 = vmul.f32 %v2943_v40, %v5707_v51  ;;  %v2945_v25 = vmul.f32 %v5724_v1, %v5724_v1  ;;  %v2947_v35 = vmul.f32 %v5727_v16, %v5727_v16 }
 0xb96   : > { %v2988_v59 = vmul.f32 0.044715, %v2964_v17  ;;  %v2990_v18 = vmul.f32 0.044715, %v2966_v43  ;;  %v2968_v15 = vmul.f32 %v2944_v24, %v5714_v26  ;;  %v2970_v52 = vmul.f32 %v2946_v10, %v5717_v61 }
 0xb97   : > { %v2989_v11 = vmul.f32 0.044715, %v2965_v21  ;;  %v2991_v8 = vmul.f32 0.044715, %v2967_v13  ;;  %v2969_v41 = vmul.f32 %v2945_v25, %v5724_v1  ;;  %v2971_v42 = vmul.f32 %v2947_v35, %v5727_v16  ;;  %v2860_v37 = vpop.f32.mrb[56].mxu1  ;;  %v2923_v6 = vpop.f32.mrb[60].mxu0 }
 0xb98   : > { %v3012_v28 = vadd.f32 %v2988_v59, %v5698_v9  ;;  %v3014_v31 = vadd.f32 %v2990_v18, %v5701_v63  ;;  %v2992_v62 = vmul.f32 0.044715, %v2968_v15  ;;  %v2994_v54 = vmul.f32 0.044715, %v2970_v52  ;;  %v2862_v58 = vpop.f32.mrb[57].mxu1  ;;  %v2925_v4 = vpop.f32.mrb[61].mxu0 }
 0xb99   : > { %v3013_v19 = vadd.f32 %v2989_v11, %v5704_v23  ;;  %v3015_v29 = vadd.f32 %v2991_v8, %v5707_v51  ;;  %v2993_v56 = vmul.f32 0.044715, %v2969_v41  ;;  %v2995_v49 = vmul.f32 0.044715, %v2971_v42  ;;  %v2864_v60 = vpop.f32.mrb[58].mxu1  ;;  %v2927_v30 = vpop.f32.mrb[62].mxu0 }
 0xb9a   : > { %v3036_v39 = vmul.f32 0.7978846, %v3012_v28  ;;  %v3038_v12 = vmul.f32 0.7978846, %v3014_v31  ;;  %v3016_v50 = vadd.f32 %v2992_v62, %v5714_v26  ;;  %v3018_v36 = vadd.f32 %v2994_v54, %v5717_v61  ;;  %v2866_v3 = vpop.f32.mrb[59].mxu1  ;;  %v2929_v5 = vpop.f32.mrb[63].mxu0 }
 0xb9b   : > { %v3037_v27 = vmul.f32 0.7978846, %v3013_v19  ;;  %v3039_v48 = vmul.f32 0.7978846, %v3015_v29  ;;  %v3017_v32 = vadd.f32 %v2993_v56, %v5724_v1  ;;  %v3019_v47 = vadd.f32 %v2995_v49, %v5727_v16 }
 0xb9c   : > { %4580 = vtanh.f32 %v3036_v39  ;;  %v3040_v38 = vmul.f32 0.7978846, %v3016_v50  ;;  %v3042_v20 = vmul.f32 0.7978846, %v3018_v36  ;;  %v5754_v14 = vadd.f32 %v2860_v37, %v5622_v33 }
 0xb9d   : > { %4582 = vtanh.f32 %v3038_v12  ;;  %v3041_v57 = vmul.f32 0.7978846, %v3017_v32  ;;  %v3043_v40 = vmul.f32 0.7978846, %v3019_v47  ;;  %v5757_v17 = vadd.f32 %v2923_v6, %v5625_v7 }
 0xb9e   : > { %4584 = vtanh.f32 %v3037_v27  ;;  %v2948_v43 = vmul.f32 %v5754_v14, %v5754_v14  ;;  %v5762_v24 = vadd.f32 %v2862_v58, %v5628_v34  ;;  %v5765_v10 = vadd.f32 %v2925_v4, %v5631_v53 }
 0xb9f   : > { %4586 = vtanh.f32 %v3039_v48  ;;  %v2950_v21 = vmul.f32 %v5757_v17, %v5757_v17  ;;  %v5770_v13 = vadd.f32 %v2864_v60, %v5622_v33  ;;  %v5773_v25 = vadd.f32 %v2927_v30, %v5625_v7 }
 0xba0   : > { %4588 = vtanh.f32 %v3040_v38  ;;  %v2972_v35 = vmul.f32 %v2948_v43, %v5754_v14  ;;  %v2949_v59 = vmul.f32 %v5762_v24, %v5762_v24  ;;  %v2951_v18 = vmul.f32 %v5765_v10, %v5765_v10 }
 0xba1   : > { %4590 = vtanh.f32 %v3042_v20  ;;  %v2974_v15 = vmul.f32 %v2950_v21, %v5757_v17  ;;  %v2952_v52 = vmul.f32 %v5770_v13, %v5770_v13  ;;  %v2954_v33 = vmul.f32 %v5773_v25, %v5773_v25 }
 0xba2   : > { %4592 = vtanh.f32 %v3041_v57  ;;  %v2996_v7 = vmul.f32 0.044715, %v2972_v35  ;;  %v2973_v11 = vmul.f32 %v2949_v59, %v5762_v24  ;;  %v2975_v8 = vmul.f32 %v2951_v18, %v5765_v10 }
 0xba3   : > { %4594 = vtanh.f32 %v3043_v40  ;;  %v2998_v41 = vmul.f32 0.044715, %v2974_v15  ;;  %v2976_v42 = vmul.f32 %v2952_v52, %v5770_v13  ;;  %v2978_v37 = vmul.f32 %v2954_v33, %v5773_v25 }
 0xba4   : > { %v3020_v6 = vadd.f32 %v2996_v7, %v5754_v14  ;;  %v2997_v28 = vmul.f32 0.044715, %v2973_v11  ;;  %v2999_v31 = vmul.f32 0.044715, %v2975_v8  ;;  %v5791_v62 = vadd.f32 %v2866_v3, %v5628_v34 }
 0xba5   : > { %v3022_v54 = vadd.f32 %v2998_v41, %v5757_v17  ;;  %v3000_v58 = vmul.f32 0.044715, %v2976_v42  ;;  %v3002_v4 = vmul.f32 0.044715, %v2978_v37  ;;  %v5795_v19 = vadd.f32 %v2929_v5, %v5631_v53 }
 0xba6   : > { %v4581_v29 = vpop.eup %4580  ;;  %v3044_v56 = vmul.f32 0.7978846, %v3020_v6  ;;  %v3021_v49 = vadd.f32 %v2997_v28, %v5762_v24  ;;  %v3023_v60 = vadd.f32 %v2999_v31, %v5765_v10  ;;  %v2953_v30 = vmul.f32 %v5791_v62, %v5791_v62 }
 0xba7   : > { %v4583_v39 = vpop.eup %4582  ;;  %v3046_v12 = vmul.f32 0.7978846, %v3022_v54  ;;  %v3024_v34 = vadd.f32 %v3000_v58, %v5770_v13  ;;  %v3026_v50 = vadd.f32 %v3002_v4, %v5773_v25  ;;  %v2955_v36 = vmul.f32 %v5795_v19, %v5795_v19 }
 0xba8   : > { %v4585_v53 = vpop.eup %4584  ;;  %4596 = vtanh.f32 %v3044_v56  ;;  %v3045_v3 = vmul.f32 0.7978846, %v3021_v49  ;;  %v3047_v5 = vmul.f32 0.7978846, %v3023_v60  ;;  %v2977_v27 = vmul.f32 %v2953_v30, %v5791_v62 }
 0xba9   : > { %v4587_v48 = vpop.eup %4586  ;;  %4598 = vtanh.f32 %v3046_v12  ;;  %v3048_v32 = vmul.f32 0.7978846, %v3024_v34  ;;  %v3050_v47 = vmul.f32 0.7978846, %v3026_v50  ;;  %v2979_v38 = vmul.f32 %v2955_v36, %v5795_v19 }
 0xbaa   : > { %v4589_v20 = vpop.eup %4588  ;;  %4600 = vtanh.f32 %v3045_v3  ;;  %v3001_v57 = vmul.f32 0.044715, %v2977_v27  ;;  %v3085_v40 = vadd.f32 1.0, %v4585_v53  ;;  %v3087_v43 = vadd.f32 1.0, %v4587_v48 }
 0xbab   : > { %v4591_v21 = vpop.eup %4590  ;;  %4602 = vtanh.f32 %v3047_v5  ;;  %v3003_v35 = vmul.f32 0.044715, %v2979_v38  ;;  %v3084_v59 = vadd.f32 1.0, %v4581_v29  ;;  %v3088_v18 = vadd.f32 1.0, %v4589_v20 }
 0xbac   : > { %v4593_v15 = vpop.eup %4592  ;;  %4604 = vtanh.f32 %v3048_v32  ;;  %v3025_v52 = vadd.f32 %v3001_v57, %v5791_v62  ;;  %v3109_v33 = vmul.f32 0.5, %v3085_v40  ;;  %v3111_v6 = vmul.f32 0.5, %v3087_v43 }
 0xbad   : > { %v4595_v7 = vpop.eup %4594  ;;  %4606 = vtanh.f32 %v3050_v47  ;;  %v3027_v11 = vadd.f32 %v3003_v35, %v5795_v19  ;;  %v3089_v8 = vadd.f32 1.0, %v4593_v15  ;;  %v3108_v41 = vmul.f32 0.5, %v3084_v59 }
 0xbae   : > { %v3049_v42 = vmul.f32 0.7978846, %v3025_v52  ;;  %v3091_v37 = vadd.f32 1.0, %v4595_v7  ;;  %v3133_v54 = vmul.f32 %v3109_v33, %v5704_v23  ;;  %v3112_v58 = vmul.f32 0.5, %v3088_v18 }
 0xbaf   : > { %v3051_v28 = vmul.f32 0.7978846, %v3027_v11  ;;  %v3113_v31 = vmul.f32 0.5, %v3089_v8  ;;  %v3086_v29 = vadd.f32 1.0, %v4583_v39  ;;  %v3090_v56 = vadd.f32 1.0, %v4591_v21 }
 0xbb0   : > { %4608 = vtanh.f32 %v3049_v42  ;;  %v3115_v4 = vmul.f32 0.5, %v3091_v37  ;;  %v3132_v60 = vmul.f32 %v3108_v41, %v5698_v9  ;;  %v3136_v30 = vmul.f32 %v3112_v58, %v5714_v26 }
 0xbb1   : > { %4610 = vtanh.f32 %v3051_v28  ;;  %v3137_v49 = vmul.f32 %v3113_v31, %v5724_v1  ;;  %v3135_v34 = vmul.f32 %v3111_v6, %v5707_v51  ;;  %v3110_v36 = vmul.f32 0.5, %v3086_v29  ;;  %v4620_v29 = vld [vmem:[%s4747_s22] sm:$0xff] }
 0xbb2   : > { %v4597_v12 = vpop.eup %4596  ;;  %v3139_v50 = vmul.f32 %v3115_v4, %v5727_v16  ;;  %v3114_v53 = vmul.f32 0.5, %v3090_v56  ;;  %v3152_v5 = vpack.c.bf16 %v3136_v30, %v3132_v60 }
 0xbb3   : > { %v4599_v23 = vpop.eup %4598  ;;  %v3153_v3 = vpack.c.bf16 %v3137_v49, %v3133_v54  ;;  %v3092_v27 = vadd.f32 1.0, %v4597_v12  ;;  %v3134_v32 = vmul.f32 %v3110_v36, %v5701_v63 }
 0xbb4   : > { %v4601_v39 = vpop.eup %4600  ;;  %v3155_v48 = vpack.c.bf16 %v3139_v50, %v3135_v34  ;;  %v3138_v1 = vmul.f32 %v3114_v53, %v5717_v61  ;;  %v3094_v9 = vadd.f32 1.0, %v4599_v23 }
 0xbb5   : > { %v4603_v47 = vpop.eup %4602  ;;  %3460 = vmatprep.mubr.bf16.mxu1 %v3153_v3  ;;  %v3093_v38 = vadd.f32 1.0, %v4601_v39  ;;  %v3116_v57 = vmul.f32 0.5, %v3092_v27 }
 0xbb6   : > { %v4605_v26 = vpop.eup %4604  ;;  %3517 = vmatprep.mubr.bf16.mxu0 %v3155_v48  ;;  %3461 = vmatmul.mubr.bf16.gmra.mrb[64].mxu1 %v3152_v5  ;;  %v3154_v51 = vpack.c.bf16 %v3138_v1, %v3134_v32  ;;  %v3095_v40 = vadd.f32 1.0, %v4603_v47  ;;  %v3118_v21 = vmul.f32 0.5, %v3094_v9 }
 0xbb7   : > { %v4607_v16 = vpop.eup %4606  ;;  %v3096_v20 = vadd.f32 1.0, %v4605_v26  ;;  %v3117_v15 = vmul.f32 0.5, %v3093_v38  ;;  %v3140_v52 = vmul.f32 %v3116_v57, %v5754_v14 }
 0xbb8   : > { %3518 = vmatmul.mubr.bf16.gmra.mrb[68].mxu0 %v3154_v51  ;;  %v3098_v43 = vadd.f32 1.0, %v4607_v16  ;;  %v3119_v11 = vmul.f32 0.5, %v3095_v40  ;;  %v3142_v8 = vmul.f32 %v3118_v21, %v5757_v17  ;;  %v3226_v17 = vsub.s32 5, %v4826_v2 }
 0xbb9   : > { %v3120_v35 = vmul.f32 0.5, %v3096_v20  ;;  %v3141_v31 = vmul.f32 %v3117_v15, %v5762_v24 }
 0xbba   : > { %v4609_v59 = vpop.eup %4608  ;;  %v3122_v63 = vmul.f32 0.5, %v3098_v43  ;;  %v3143_v58 = vmul.f32 %v3119_v11, %v5765_v10  ;;  %v3227_v56 = vrot.slane %v4620_v29, %v3226_v17 }
 0xbbb   : > { %v4611_v18 = vpop.eup %4610  ;;  %v3097_v61 = vadd.f32 1.0, %v4609_v59  ;;  %v3144_v33 = vmul.f32 %v3120_v35, %v5770_v13 }
 0xbbc   : > { %v3099_v7 = vadd.f32 1.0, %v4611_v18  ;;  %v3146_v41 = vmul.f32 %v3122_v63, %v5773_v25 }
 0xbbd   : > { %v3121_v42 = vmul.f32 0.5, %v3097_v61  ;;  %v3156_v37 = vpack.c.bf16 %v3144_v33, %v3140_v52 }
 0xbbe   : > { %v3123_v6 = vmul.f32 0.5, %v3099_v7  ;;  %v3158_v28 = vpack.c.bf16 %v3146_v41, %v3142_v8 }
 0xbbf   : > { %v3145_v54 = vmul.f32 %v3121_v42, %v5791_v62 }
 0xbc0   : > { %v3147_v14 = vmul.f32 %v3123_v6, %v5795_v19 }
 0xbc1   : > { %v3157_v13 = vpack.c.bf16 %v3145_v54, %v3141_v31 }
 0xbc2   : > { %v3159_v4 = vpack.c.bf16 %v3147_v14, %v3143_v58 }
 0xbc3   : > { %3468 = vmatprep.mubr.bf16.mxu1 %v3157_v13 }
 0xbc4   : > { %3525 = vmatprep.mubr.bf16.mxu0 %v3159_v4  ;;  %3469 = vmatmul.mubr.bf16.gmra.mrb[68].mxu1 %v3156_v37 }
 0xbc5   : > { %3526 = vmatmul.mubr.bf16.gmra.mrb[72].mxu0 %v3158_v28 }
 0xbff   : > { %v3935_v25 = vpop.f32.mrb[60].mxu1 }
 0xc00   : > { %v3969_v49 = vpop.f32.mrb[64].mxu0  ;;  %v3936_v60 = vpop.f32.mrb[61].mxu1 }
 0xc01   : > { %v3937_v24 = vadd.f32 %v3936_v60, %v3935_v25  ;;  %v3970_v30 = vpop.f32.mrb[65].mxu0  ;;  %v3938_v62 = vpop.f32.mrb[62].mxu1 }
 0xc02   : > { %v3971_v12 = vadd.f32 %v3970_v30, %v3969_v49  ;;  %v3972_v10 = vpop.f32.mrb[66].mxu0  ;;  %v3939_v34 = vpop.f32.mrb[63].mxu1 }
 0xc03   : > { %v3455_v19 = vadd.f32 %v3937_v24, %v3227_v56  ;;  %v3940_v50 = vadd.f32 %v3939_v34, %v3938_v62  ;;  %v3973_v36 = vpop.f32.mrb[67].mxu0 }
 0xc04   : > { %v3974_v53 = vadd.f32 %v3973_v36, %v3972_v10  ;;  %v3551_v36 = vld [vmem:[%s5872_s6 + $0x1] sm:$0x1] (!%p3824_p5) }
 0xc05   : > { %v3512_v23 = vadd.f32 %v3971_v12, %v3455_v19  ;;  %v3458_v3 = vadd.f32 %v3940_v50, %v3227_v56  ;;  %v3550_v19 = vld [vmem:[%s5872_s6] sm:$0x1] (!%p3824_p5) }
 0xc07   : > { %v3534_v5 = vadd.f32 %v3512_v23, %v5459_v55  ;;  %v3515_v2 = vadd.f32 %v3974_v53, %v3458_v3 }
 0xc09   : > { %3540 = vst [vmem:[#allocation2] sm:$0xff] %v3534_v5  ;;  %v3535_v27 = vadd.f32 %v3515_v2, %v5455_v44  ;;  %v3553_v54 = vsel (!%p3824_p5), %vm3552_vm7, %v3534_v5, 0.0 }
 0xc0a   : > { %3554 = vadd.xlane.f32.xlu0 (!%p3824_p5), %v3553_v54 }
 0xc0b   : > { %3541 = vst [vmem:[#allocation2 + $0x8] sm:$0xff] %v3535_v27 }
 0xc89   : > { %v3941_v39 = vpop.f32.mrb[64].mxu1 }
 0xc8a   : > { %v3942_v48 = vpop.f32.mrb[65].mxu1 }
 0xc8b   : > { %v3975_v32 = vpop.f32.mrb[68].mxu0  ;;  %v3943_v1 = vadd.f32 %v3942_v48, %v3941_v39  ;;  %v3944_v9 = vpop.f32.mrb[66].mxu1 }
 0xc8c   : > { %v3976_v47 = vpop.f32.mrb[69].mxu0  ;;  %v3945_v26 = vpop.f32.mrb[67].mxu1 }
 0xc8d   : > { %v3463_v51 = vadd.f32 %v3943_v1, %v3227_v56  ;;  %v3977_v16 = vadd.f32 %v3976_v47, %v3975_v32  ;;  %v3978_v38 = vpop.f32.mrb[70].mxu0  ;;  %v3946_v20 = vadd.f32 %v3945_v26, %v3944_v9 }
 0xc8e   : > { %v3979_v57 = vpop.f32.mrb[71].mxu0 }
 0xc8f   : > { %v3520_v40 = vadd.f32 %v3977_v16, %v3463_v51  ;;  %v3466_v43 = vadd.f32 %v3946_v20, %v3227_v56  ;;  %v3980_v55 = vadd.f32 %v3979_v57, %v3978_v38 }
 0xc91   : > { %v3536_v21 = vadd.f32 %v3520_v40, %v5481_v46  ;;  %v3523_v35 = vadd.f32 %v3980_v55, %v3466_v43 }
 0xc93   : > { %3542 = vst [vmem:[#allocation2 + $0x10] sm:$0xff] %v3536_v21  ;;  %v3537_v44 = vadd.f32 %v3523_v35, %v5485_v45 }
 0xc95   : > { %3543 = vst [vmem:[#allocation2 + $0x18] sm:$0xff] %v3537_v44  ;;  %v3569_v58 = vsel (!%p3824_p5), %vm3552_vm7, %v3537_v44, 0.0 }
 0xc96   : > { %3570 = vadd.xlane.f32.xlu0 (!%p3824_p5), %v3569_v58 }
 0xc97   : > { %v3947_v59 = vpop.f32.mrb[68].mxu1  ;;  %v3555_v14 = vpop.xlane.xlu0 (!%p3824_p5), %3554 }
 0xc98   : > { %v3981_v63 = vpop.f32.mrb[72].mxu0  ;;  %v3948_v18 = vpop.f32.mrb[69].mxu1  ;;  %v3556_v13 = vmul.f32 (!%p3824_p5), 0.0078125, %v3555_v14 }
 0xc99   : > { %v3949_v61 = vadd.f32 %v3948_v18, %v3947_v59  ;;  %v3982_v15 = vpop.f32.mrb[73].mxu0  ;;  %v3950_v52 = vpop.f32.mrb[70].mxu1 }
 0xc9a   : > { %v3983_v33 = vadd.f32 %v3982_v15, %v3981_v63  ;;  %v3984_v7 = vpop.f32.mrb[74].mxu0  ;;  %v3951_v11 = vpop.f32.mrb[71].mxu1  ;;  %v3557_v4 = vsub.f32 (!%p3824_p5), %v3534_v5, %v3556_v13 }
 0xc9b   : > { %v3471_v8 = vadd.f32 %v3949_v61, %v3227_v56  ;;  %v3952_v41 = vadd.f32 %v3951_v11, %v3950_v52  ;;  %v3985_v42 = vpop.f32.mrb[75].mxu0 }
 0xc9c   : > { %v3986_v37 = vadd.f32 %v3985_v42, %v3984_v7  ;;  %v3558_v29 = vmul.f32 (!%p3824_p5), %v3557_v4, %v3557_v4 }
 0xc9d   : > { %v3528_v6 = vadd.f32 %v3983_v33, %v3471_v8  ;;  %v3474_v46 = vadd.f32 %v3952_v41, %v3227_v56  ;;  %3549 = sbr.rel (%p3824_p5) target bundleno = 3535 (0xdcf), region = 56 }
 0xc9e   : > { %v3559_v56 = vsel (!%p3824_p5), %vm3552_vm7, %v3558_v29, 0.0 }
 0xc9f   : > { %v3538_v28 = vadd.f32 %v3528_v6, %v5492_v0  ;;  %v3531_v31 = vadd.f32 %v3986_v37, %v3474_v46  ;;  %3560 = vadd.xlane.f32.xlu1 (!%p3824_p5), %v3559_v56 }
 0xca1   : > { %3544 = vst [vmem:[#allocation2 + $0x20] sm:$0xff] %v3538_v28  ;;  %v3539_v45 = vadd.f32 %v3531_v31, %v5498_v22 }
 0xca3   : > { %3545 = vst [vmem:[#allocation2 + $0x28] sm:$0xff] %v3539_v45 }
 0xd23   : > { %v3571_v17 = vpop.xlane.xlu0 %3570 }
 0xd24   : > { %v3572_v25 = vmul.f32 0.0078125, %v3571_v17 }
 0xd26   : > { %v3573_v0 = vsub.f32 %v3537_v44, %v3572_v25 }
 0xd28   : > { %v3574_v49 = vmul.f32 %v3573_v0, %v3573_v0 }
 0xd2a   : > { %v3575_v22 = vsel %vm3552_vm7, %v3574_v49, 0.0 }
 0xd2b   : > { %3576 = vadd.xlane.f32.xlu1 %v3575_v22 }
 0xd2c   : > { %v3561_v60 = vpop.xlane.xlu1 %3560 }
 0xd2d   : > { %v3562_v24 = vmul.f32 0.0078125, %v3561_v60 }
 0xd2f   : > { %v3563_v30 = vadd.f32 1e-06, %v3562_v24 }
 0xd31   : > { %4621 = vrsqrt.f32 %v3563_v30 }
 0xd3b   : > { %v4622_v34 = vpop.eup %4621 }
 0xd3c   : > { %v3565_v50 = vmul.f32 %v4622_v34, %v3557_v4 }
 0xd3e   : > { %v3566_v53 = vmul.f32 %v3565_v50, %v3550_v19 }
 0xd40   : > { %v3567_v3 = vadd.f32 %v3566_v53, %v3551_v36 }
 0xd42   : > { %3568 = vst [vmem:[#allocation3] sm:$0x1] %v3567_v3 }
 0xdb8   : > { %v3577_v62 = vpop.xlane.xlu1 %3576 }
 0xdb9   : > { %v3578_v12 = vmul.f32 0.0078125, %v3577_v62 }
 0xdbb   : > { %v3579_v10 = vadd.f32 1e-06, %v3578_v12 }
 0xdbd   : > { %4623 = vrsqrt.f32 %v3579_v10 }
 0xdc7   : > { %v4624_v23 = vpop.eup %4623 }
 0xdc8   : > { %v3581_v5 = vmul.f32 %v4624_v23, %v3573_v0 }
 0xdca   : > { %v3582_v2 = vmul.f32 %v3581_v5, %v3550_v19 }
 0xdcc   : > { %v3583_v27 = vadd.f32 %v3582_v2, %v3551_v36 }
 0xdce   : > { %3585 = vst [vmem:[#allocation3 + $0x1] sm:$0x1] %v3583_v27 }
 0xdcf PF: > { %p4200_p6 = scmp.eq.s32.totalorder %s4718_s25, 3  ;;  %s4669_s21 = smov [#allocation3]  }
 0xdd0   : > { %s3592_s22 = sshll.u32 %s4669_s21, 4  ;;  %s3593_s22 = int_to_ptr.vmem [resolvable:$true] %s3592_s22 }
 0xdd1   : > { %s4625_s23 = scalar_lea.vmem %s3593_s22, 32  ;;  %p4632_p10 = scmp.lt.s32.totalorder %s3593_s22, %s3593_s22 }
 0xdd2   : > { %p4626_p7 = scmp.ne.s32.totalorder %s3593_s22, %s4625_s23  ;;  %p4633_p11 = scmp.lt.s32.totalorder %s4625_s23, %s4625_s23 }
 0xdd4   : > { %p4627_p8 = pnand %p4626_p7, %p4200_p6  ;;  %p4634_p12 = por %p4633_p11, %p4632_p10 }
 0xdd6   : > { %p4628_p9 = pneg %p4627_p8 }
 0xdd8   : > { %p4635_p13 = pnand %p4634_p12, %p4628_p9 }
 0xdda   : > { %4638 = shalt.err (!%p4635_p13)
}
 0xddb   : > { %s4639_s29 = scalar_lea.hbm %s5873_s7, 32 }
 0xddc   : > { %p4640_p0 = scmp.ne.s32.totalorder %s5873_s7, %s4639_s29  ;;  %p4645_p3 = scmp.lt.u32.totalorder %s4639_s29, %s5873_s7 }
 0xdde   : > { %p4641_p1 = pnand %p4640_p0, %p4200_p6 }
 0xde0   : > { %p4642_p2 = pneg %p4641_p1 }
 0xde2   : > { %p4647_p4 = pnand %p4645_p3, %p4642_p2 }
 0xde4   : > { %4650 = shalt.err (!%p4647_p4)
}
 0xde5   : > { %s4670_s11 = smov 16   ;;  %s4671_s13 = smov 1  }
 0xde6   : > { %4197 = dma.vmem_to_hbm [thread:$0]  (%p4200_p6), %s3593_s22, 32, %s5873_s7, [#allocation4], %s4670_s11, %s4670_s11, %s4671_s13  }
 0xde7   : > { %4656 = dma.done.wait (%p4200_p6), [#allocation4], 32  }
 0xde8   : > { %4658 = vsyncadd (%p4200_p6), [#allocation4], 4294967264 }
 0xde9 PF: > { %s18_s24 = sadd.s32 1, %s4661_s24  }
 0xdea   : > { %p15_p5 = scmp.ge.s32.totalorder %s18_s24, 6  }
 0xdec   :  { %17 = sbr.rel (!%p15_p5) target bundleno = 1 (0x1), region = 96 }
 0xdf3   :  { %3608 = vsyncpa [#allocation4], 1 }
 0xdf4   :  { %3610 = vsyncpa [#allocation4 + $0x1], 1 }

</bundles_post_ra>
